<compile_context>
chip_gen: v7x
topology: tpu7x:2x2x1
jax: 0.10.0
libtpu: 0.0.40
codegen_flags: <defaults>
</compile_context>

<pallas_src>
import math
from functools import partial

import jax
import jax.numpy as jnp
from jax.experimental import pallas as pl
from jax.experimental.pallas import tpu as pltpu


# float32 parity with PyTorch matmuls (kernel is weight-bandwidth bound, so
# the extra MXU passes of HIGHEST precision are essentially free here).
_MM_PRECISION = jax.lax.Precision.HIGHEST


# ----------------------------------------------------------------------------
# Tiling heuristics (generation / VMEM aware)
# ----------------------------------------------------------------------------
def _largest_divisor_leq(n, cap):
    cap = max(1, min(n, int(cap)))
    for d in range(cap, 0, -1):
        if n % d == 0:
            return d
    return 1


def _num_tensorcores():
    """Best-effort TC-per-chip detection: v7x has 2, v5e/v6e have 1."""
    try:
        kind = (jax.devices()[0].device_kind or "").lower()
    except Exception:
        return 1
    return 2 if ("v7" in kind or "7x" in kind) else 1


def _pick_pblock(P, ci, co, vmem_budget_bytes=8 << 20):
    """Mode-chunk size: largest divisor of P whose DOUBLE-BUFFERED weight tile
    fits the VMEM budget.  Keep >= 2 grid steps only when the part actually
    has >= 2 TensorCores (megacore sharding); on single-TC parts a single
    bigger tile amortizes per-step overhead."""
    w_bytes_per_mode = ci * (2 * co) * 4
    cap_by_vmem = max(1, vmem_budget_bytes // max(1, 2 * w_bytes_per_mode))
    cap = min(P, cap_by_vmem, 256)
    if _num_tensorcores() >= 2 and P >= 2:
        cap = min(cap, max(1, P // 2))
    return _largest_divisor_leq(P, cap)


# ----------------------------------------------------------------------------
# Pallas kernel: per-mode complex channel mixing, modes batched per grid step.
#   xr_ref, xi_ref : (pblock, B, Ci)       real / imag of the retained modes
#   w_ref          : (pblock, Ci, 2*Co)    compact [wr | wi] weights
#   o_ref          : (pblock, B, 2*Co)     [yr | yi]
# ----------------------------------------------------------------------------
def _spectral_kernel(xr_ref, xi_ref, w_ref, o_ref, *, co):
    # Batched over the mode axis -> one dot_general per operand, Mosaic
    # pipelines the per-mode MXU pushes instead of 64 serialized micro-dots.
    dn = (((2,), (1,)), ((0,), (0,)))  # contract Ci; batch over modes
    a = jax.lax.dot_general(xr_ref[...], w_ref[...], dn,
                            preferred_element_type=jnp.float32,
                            precision=_MM_PRECISION)   # [xr@wr | xr@wi]
    b = jax.lax.dot_general(xi_ref[...], w_ref[...], dn,
                            preferred_element_type=jnp.float32,
                            precision=_MM_PRECISION)   # [xi@wr | xi@wi]
    # Complex recombination on the VPU (weight traffic already halved by the
    # compact [wr|wi] layout; slice/concat here is a cheap in-vreg shuffle and
    # is robust for 2*Co < 128 lanes, unlike a lane rotate).
    yr = a[..., :co] - b[..., co:]
    yi = a[..., co:] + b[..., :co]
    o_ref[...] = jnp.concatenate([yr, yi], axis=-1).astype(o_ref.dtype)


def pallas_spectral_mul(xr, xi, w_packed):
    """xr, xi: (P, B, Ci) f32;  w_packed: (P, Ci, 2*Co) f32 -> (P, B, 2*Co) f32."""
    P, B, Ci = xr.shape
    Co2 = w_packed.shape[-1]
    co = Co2 // 2
    pblock = _pick_pblock(P, Ci, co)

    # Explicit VMEM limit: double-buffered x/w/out tiles plus slack,
    # clamped to the smallest physical VMEM across generations (v7x: 64 MiB).
    tile_bytes = pblock * (2 * B * Ci + Ci * Co2 + B * Co2) * 4
    vmem_limit = int(min(max(4 * tile_bytes + (4 << 20), 16 << 20), 64 << 20))

    kernel = partial(_spectral_kernel, co=co)
    return pl.pallas_call(
        kernel,
        out_shape=jax.ShapeDtypeStruct((P, B, Co2), jnp.float32),
        grid_spec=pltpu.PrefetchScalarGridSpec(
            num_scalar_prefetch=0,
            grid=(P // pblock,),
            in_specs=[
                pl.BlockSpec((pblock, B, Ci), lambda p: (p, 0, 0)),
                pl.BlockSpec((pblock, B, Ci), lambda p: (p, 0, 0)),
                pl.BlockSpec((pblock, Ci, Co2), lambda p: (p, 0, 0)),
            ],
            out_specs=pl.BlockSpec((pblock, B, Co2), lambda p: (p, 0, 0)),
        ),
        compiler_params=pltpu.CompilerParams(
            dimension_semantics=("parallel",),
            vmem_limit_bytes=vmem_limit,
        ),
    )(xr, xi, w_packed)


# ----------------------------------------------------------------------------
# SpectralConv2d forward (glue in plain JAX, channel mixing in Pallas)
# ----------------------------------------------------------------------------
def spectral_conv2d_forward(x, params, *, modes1, modes2):
    """x: (B, Cin, H, W) f32 -> (B, Cout, H, W) f32 (matches the torch module)."""
    B, Ci, H, W = x.shape
    Co = params["spec_w"].shape[-1] // 2
    Wf = W // 2 + 1
    m1, m2 = modes1, modes2
    assert H >= 2 * m1 and Wf >= m2, "retained Fourier modes overlap/clip"

    # TODO(synk): rfft2/irfft2 have no Pallas primitive; they run via jnp.fft (XLA).
    x_ft = jnp.fft.rfft2(x, axes=(-2, -1))                # (B, Ci, H, Wf) c64

    # Gather retained modes into mode-major (P, B, Ci) real/imag arrays
    # (same mode ordering as the packed weights).
    s1 = x_ft[:, :, :m1, :m2]                              # (B, Ci, m1, m2)
    s2 = x_ft[:, :, H - m1:, :m2]
    modes = jnp.stack([s1, s2], axis=0)                    # (2, B, Ci, m1, m2)
    modes = jnp.transpose(modes, (0, 3, 4, 1, 2))          # (2, m1, m2, B, Ci)
    P = 2 * m1 * m2
    modes = modes.reshape(P, B, Ci)
    xr = jnp.real(modes).astype(jnp.float32)
    xi = jnp.imag(modes).astype(jnp.float32)

    y = pallas_spectral_mul(xr, xi, params["spec_w"])      # (P, B, 2*Co)
    y = y.reshape(2, m1, m2, B, 2 * Co)
    y = jnp.transpose(y, (3, 0, 1, 2, 4))                  # (B, 2, m1, m2, 2Co)
    y_c = jax.lax.complex(y[..., :Co], y[..., Co:])        # (B, 2, m1, m2, Co)
    y_c = jnp.transpose(y_c, (0, 4, 1, 2, 3))              # (B, Co, 2, m1, m2)

    out_ft = jnp.zeros((B, Co, H, Wf), dtype=jnp.complex64)
    out_ft = out_ft.at[:, :, :m1, :m2].set(y_c[:, :, 0])
    out_ft = out_ft.at[:, :, H - m1:, :m2].set(y_c[:, :, 1])
    return jnp.fft.irfft2(out_ft, s=(H, W), axes=(-2, -1)).astype(jnp.float32)


# ----------------------------------------------------------------------------
# Parameters: module-layout init + one-time compact kernel-layout packing
# ----------------------------------------------------------------------------
def init_params(key, *, in_channels, out_channels, modes1, modes2):
    """Mirrors: scale * torch.rand(Cin, Cout, m1, m2, dtype=cfloat), twice."""
    scale = 1.0 / (in_channels * out_channels)
    ks = jax.random.split(key, 4)
    u = lambda k, shp: jax.random.uniform(k, shp, dtype=jnp.float32)
    shp = (in_channels, out_channels, modes1, modes2)
    return {
        "w1_re": scale * u(ks[0], shp), "w1_im": scale * u(ks[1], shp),
        "w2_re": scale * u(ks[2], shp), "w2_im": scale * u(ks[3], shp),
    }


def pack_params(raw, *, modes1, modes2):
    """Hoisted (one-time) repack into the compact kernel layout
    (P, Cin, 2*Cout) = [wr | wi], mode-major.  Half the bytes of the old
    complex-as-2x2-block packing -> half the HBM weight traffic per call."""
    Ci, Co = raw["w1_re"].shape[:2]
    P = 2 * modes1 * modes2
    wre = jnp.stack([raw["w1_re"], raw["w2_re"]], axis=0)   # (2, Ci, Co, m1, m2)
    wim = jnp.stack([raw["w1_im"], raw["w2_im"]], axis=0)
    wre = jnp.transpose(wre, (0, 3, 4, 1, 2)).reshape(P, Ci, Co)
    wim = jnp.transpose(wim, (0, 3, 4, 1, 2)).reshape(P, Ci, Co)
    return {"spec_w": jnp.concatenate([wre, wim], axis=-1)}  # (P, Ci, 2Co)


# ----------------------------------------------------------------------------
# Pure-JAX reference (torch semantics) for correctness checking
# ----------------------------------------------------------------------------
def _reference_forward(x, raw, *, modes1, modes2):
    B, Ci, H, W = x.shape
    Co = raw["w1_re"].shape[1]
    x_ft = jnp.fft.rfft2(x, axes=(-2, -1))
    w1 = jax.lax.complex(raw["w1_re"], raw["w1_im"])
    w2 = jax.lax.complex(raw["w2_re"], raw["w2_im"])
    mul = lambda a, w: jnp.einsum("bixy,ioxy->boxy", a, w,
                                  precision=jax.lax.Precision.HIGHEST)
    out_ft = jnp.zeros((B, Co, H, W // 2 + 1), dtype=jnp.complex64)
    out_ft = out_ft.at[:, :, :modes1, :modes2].set(
        mul(x_ft[:, :, :modes1, :modes2], w1))
    out_ft = out_ft.at[:, :, H - modes1:, :modes2].set(
        mul(x_ft[:, :, H - modes1:, :modes2], w2))
    return jnp.fft.irfft2(out_ft, s=(H, W), axes=(-2, -1))


if __name__ == "__main__":
    B, Ci, Co, S = 2, 4, 4, 16
    modes1, modes2 = 4, 4

    key = jax.random.PRNGKey(0)
    k_w, k_x = jax.random.split(key)
    raw = init_params(k_w, in_channels=Ci, out_channels=Co,
                      modes1=modes1, modes2=modes2)
    params = pack_params(raw, modes1=modes1, modes2=modes2)  # kernel-layout weights

    x = jax.random.normal(k_x, (B, Ci, S, S), dtype=jnp.float32)

    fwd = jax.jit(partial(spectral_conv2d_forward, modes1=modes1, modes2=modes2))
    y = jax.block_until_ready(fwd(x, params))

    assert y.shape == (B, Co, S, S), y.shape
    assert bool(jnp.all(jnp.isfinite(y)))

    y_ref = _reference_forward(x, raw, modes1=modes1, modes2=modes2)
    err = float(jnp.max(jnp.abs(y - y_ref)))
    assert bool(jnp.allclose(y, y_ref, rtol=1e-4, atol=1e-5)), err

    print("KERNEL_OK")
</pallas_src>

<mosaic_0001>
module attributes {stable_mosaic.version = 11 : i64} {
  func.func @_spectral_kernel(%arg0: i32, %arg1: memref<32x2x4xf32, #tpu.memory_space<vmem>>, %arg2: memref<32x2x4xf32, #tpu.memory_space<vmem>>, %arg3: memref<32x4x8xf32, #tpu.memory_space<vmem>>, %arg4: memref<32x2x8xf32, #tpu.memory_space<vmem>>) attributes {dimension_semantics = [#tpu.dimension_semantics<parallel>], iteration_bounds = array<i64: 1>, scalar_prefetch = 0 : i64, scratch_operands = 0 : i64, tpu.core_type = #tpu.core_type<tc>, window_params = [{transform_indices = @transform_0, window_bounds = array<i64: 32, 2, 4>}, {transform_indices = @transform_1, window_bounds = array<i64: 32, 2, 4>}, {transform_indices = @transform_2, window_bounds = array<i64: 32, 4, 8>}, {transform_indices = @transform_3, window_bounds = array<i64: 32, 2, 8>}]} {
    %c0 = arith.constant 0 : index
    %c0_0 = arith.constant 0 : index
    %c0_1 = arith.constant 0 : index
    %0 = vector.load %arg1[%c0, %c0_0, %c0_1] : memref<32x2x4xf32, #tpu.memory_space<vmem>>, vector<32x2x4xf32>
    %c0_2 = arith.constant 0 : index
    %c0_3 = arith.constant 0 : index
    %c0_4 = arith.constant 0 : index
    %1 = vector.load %arg3[%c0_2, %c0_3, %c0_4] : memref<32x4x8xf32, #tpu.memory_space<vmem>>, vector<32x4x8xf32>
    %cst = arith.constant dense<0.000000e+00> : vector<32x2x8xf32>
    %2 = tpu.matmul %0, %1, %cst {dimension_numbers = #tpu.dot_dimension_numbers<[2], [1], [1], [2], [0, 0, 0, 1, 1, 2], [0], [0]>, precision = #tpu.contract_precision<fp32>} : vector<32x2x4xf32>, vector<32x4x8xf32>, vector<32x2x8xf32> -> vector<32x2x8xf32>
    %c0_5 = arith.constant 0 : index
    %c0_6 = arith.constant 0 : index
    %c0_7 = arith.constant 0 : index
    %3 = vector.load %arg2[%c0_5, %c0_6, %c0_7] : memref<32x2x4xf32, #tpu.memory_space<vmem>>, vector<32x2x4xf32>
    %c0_8 = arith.constant 0 : index
    %c0_9 = arith.constant 0 : index
    %c0_10 = arith.constant 0 : index
    %4 = vector.load %arg3[%c0_8, %c0_9, %c0_10] : memref<32x4x8xf32, #tpu.memory_space<vmem>>, vector<32x4x8xf32>
    %cst_11 = arith.constant dense<0.000000e+00> : vector<32x2x8xf32>
    %5 = tpu.matmul %3, %4, %cst_11 {dimension_numbers = #tpu.dot_dimension_numbers<[2], [1], [1], [2], [0, 0, 0, 1, 1, 2], [0], [0]>, precision = #tpu.contract_precision<fp32>} : vector<32x2x4xf32>, vector<32x4x8xf32>, vector<32x2x8xf32> -> vector<32x2x8xf32>
    %6 = vector.extract_strided_slice %2 {offsets = [0, 0, 0], sizes = [32, 2, 4], strides = [1, 1, 1]} : vector<32x2x8xf32> to vector<32x2x4xf32>
    %7 = vector.extract_strided_slice %5 {offsets = [0, 0, 4], sizes = [32, 2, 4], strides = [1, 1, 1]} : vector<32x2x8xf32> to vector<32x2x4xf32>
    %8 = arith.subf %6, %7 : vector<32x2x4xf32>
    %9 = vector.extract_strided_slice %2 {offsets = [0, 0, 4], sizes = [32, 2, 4], strides = [1, 1, 1]} : vector<32x2x8xf32> to vector<32x2x4xf32>
    %10 = vector.extract_strided_slice %5 {offsets = [0, 0, 0], sizes = [32, 2, 4], strides = [1, 1, 1]} : vector<32x2x8xf32> to vector<32x2x4xf32>
    %11 = arith.addf %9, %10 : vector<32x2x4xf32>
    %12 = tpu.concatenate %8, %11 in 2 : vector<32x2x4xf32>, vector<32x2x4xf32> -> vector<32x2x8xf32>
    %c0_12 = arith.constant 0 : index
    %c0_13 = arith.constant 0 : index
    %c0_14 = arith.constant 0 : index
    %13 = vector.load %arg4[%c0_12, %c0_13, %c0_14] : memref<32x2x8xf32, #tpu.memory_space<vmem>>, vector<32x2x8xf32>
    tpu.vector_store %arg4[%c0_12, %c0_13, %c0_14], %12 {strides = array<i32>} : memref<32x2x8xf32, #tpu.memory_space<vmem>>, vector<32x2x8xf32>,
    return
  }
  func.func @transform_0(%arg0: i32) -> (i32, i32, i32) {
    %c0_i32 = arith.constant 0 : i32
    %c0_i32_0 = arith.constant 0 : i32
    %c0_i32_1 = arith.constant 0 : i32
    return %arg0, %c0_i32, %c0_i32_0 : i32, i32, i32
  }
  func.func @transform_1(%arg0: i32) -> (i32, i32, i32) {
    %c0_i32 = arith.constant 0 : i32
    %c0_i32_0 = arith.constant 0 : i32
    %c0_i32_1 = arith.constant 0 : i32
    return %arg0, %c0_i32, %c0_i32_0 : i32, i32, i32
  }
  func.func @transform_2(%arg0: i32) -> (i32, i32, i32) {
    %c0_i32 = arith.constant 0 : i32
    %c0_i32_0 = arith.constant 0 : i32
    %c0_i32_1 = arith.constant 0 : i32
    return %arg0, %c0_i32, %c0_i32_0 : i32, i32, i32
  }
  func.func @transform_3(%arg0: i32) -> (i32, i32, i32) {
    %c0_i32 = arith.constant 0 : i32
    %c0_i32_0 = arith.constant 0 : i32
    %c0_i32_1 = arith.constant 0 : i32
    return %arg0, %c0_i32, %c0_i32_0 : i32, i32, i32
  }
}

</mosaic_0001>

<bundles_post_ra>
// kernel: reverse.1
= control target key start
LH: loop header
LB: loop body
LE: loop exit
PB: predicated region body
PF: predicated region fallthrough
CT: control target
= control target key end

     0   :  { %v71_v3 = vlaneseq  ;;  %v64_v9 = vld [vmem:[#allocation0 + $0x7] ss:$-1 sm:$0xff]  ;;  %v78_v12 = vld [vmem:[#allocation0 + $0x17] ss:$-1 sm:$0xff]  ;;  %s329_s0 = inlined_call_operand.vmem [shape: f32[2,4,16,7], index: 0, kind: input, shape index: {}]   ;;  %s330_s1 = inlined_call_operand.vmem [shape: f32[2,4,16,7], index: 1, kind: output, shape index: {}]  }
   0x1   :  { %v44_v0 = vld [vmem:[%s329_s0] sm:$0xff]  ;;  %v46_v1 = vld [vmem:[%s329_s0 + $0x8] sm:$0xff]  ;;  %v48_v2 = vld [vmem:[%s329_s0 + $0x10] sm:$0xff]  ;;  %v65_v10 = vrot.slane %v64_v9, 1  ;;  %v79_v14 = vrot.slane %v78_v12, 1 }
   0x2   :  { %45 = vst [vmem:[#allocation0 + $0x8] sm:$0xff] %v44_v0  ;;  %47 = vst [vmem:[#allocation0 + $0x18] sm:$0xff] %v46_v1  ;;  %v50_v4 = vld [vmem:[%s329_s0 + $0x18] sm:$0xff]  ;;  %v52_v5 = vld [vmem:[%s329_s0 + $0x20] sm:$0xff]  ;;  %v72_v11 = vshrl.u32 %v71_v3, 7 }
   0x3   :  { %49 = vst [vmem:[#allocation0 + $0x28] sm:$0xff] %v48_v2  ;;  %v54_v6 = vld [vmem:[%s329_s0 + $0x28] sm:$0xff]  ;;  %51 = vst [vmem:[#allocation0 + $0x38] sm:$0xff] %v50_v4  ;;  %v56_v7 = vld [vmem:[%s329_s0 + $0x30] sm:$0xff] }
   0x4   :  { %53 = vst [vmem:[#allocation0 + $0x48] sm:$0xff] %v52_v5  ;;  %55 = vst [vmem:[#allocation0 + $0x58] sm:$0xff] %v54_v6  ;;  %v58_v8 = vld [vmem:[%s329_s0 + $0x38] sm:$0xff]  ;;  %v92_v13 = vld [vmem:[#allocation0 + $0x27] ss:$-1 sm:$0xff]  ;;  %vm73_vm0 = vcmp.lt.s32.totalorder %v72_v11, 7 }
   0x5   :  { %57 = vst [vmem:[#allocation0 + $0x68] sm:$0xff] %v56_v7  ;;  %59 = vst [vmem:[#allocation0 + $0x78] sm:$0xff] %v58_v8  ;;  %v93_v15 = vrot.slane %v92_v13, 1  ;;  %v106_v16 = vld [vmem:[#allocation0 + $0x37] ss:$-1 sm:$0xff] }
   0x6   :  { %66 = vst [vmem:[#allocation1] sm:$0xff] %v65_v10  ;;  %v107_v17 = vrot.slane %v106_v16, 1  ;;  %v120_v18 = vld [vmem:[#allocation0 + $0x47] ss:$-1 sm:$0xff]  ;;  %v134_v19 = vld [vmem:[#allocation0 + $0x57] ss:$-1 sm:$0xff] }
   0x7   :  { %80 = vst [vmem:[#allocation1 + $0x8] sm:$0xff] %v79_v14  ;;  %94 = vst [vmem:[#allocation1 + $0x10] sm:$0xff] %v93_v15  ;;  %v121_v20 = vrot.slane %v120_v18, 1  ;;  %v135_v21 = vrot.slane %v134_v19, 1  ;;  %v148_v22 = vld [vmem:[#allocation0 + $0x67] ss:$-1 sm:$0xff] }
   0x8   :  { %v162_v23 = vld [vmem:[#allocation0 + $0x77] ss:$-1 sm:$0xff]  ;;  %108 = vst [vmem:[#allocation1 + $0x18] sm:$0xff] %v107_v17  ;;  %v149_v24 = vrot.slane %v148_v22, 1 }
   0x9   :  { %v163_v25 = vrot.slane %v162_v23, 1  ;;  %v69_v26 = vld [vmem:[#allocation0 + $0xf] ss:$-1 sm:$0xff]  ;;  %v83_v27 = vld [vmem:[#allocation0 + $0x1f] ss:$-1 sm:$0xff]  ;;  %122 = vst [vmem:[#allocation1 + $0x20] sm:$0xff] %v121_v20 }
   0xa   :  { %v97_v28 = vld [vmem:[#allocation0 + $0x2f] ss:$-1 sm:$0xff]  ;;  %136 = vst [vmem:[#allocation1 + $0x28] sm:$0xff] %v135_v21  ;;  %v70_v29 = vrot.slane %v69_v26, 1  ;;  %v84_v30 = vrot.slane %v83_v27, 1  ;;  %150 = vst [vmem:[#allocation1 + $0x30] sm:$0xff] %v149_v24 }
   0xb   :  { %v98_v31 = vrot.slane %v97_v28, 1  ;;  %v111_v32 = vld [vmem:[#allocation0 + $0x3f] ss:$-1 sm:$0xff]  ;;  %164 = vst [vmem:[#allocation1 + $0x38] sm:$0xff] %v163_v25  ;;  %v125_v34 = vld [vmem:[#allocation0 + $0x4f] ss:$-1 sm:$0xff] }
   0xc   :  { %v112_v33 = vrot.slane %v111_v32, 1  ;;  %v139_v35 = vld [vmem:[#allocation0 + $0x5f] ss:$-1 sm:$0xff]  ;;  %74 = vst.msk [vmem:[#allocation1] sm:$0xff] %vm73_vm0, %v70_v29  ;;  %88 = vst.msk [vmem:[#allocation1 + $0x8] sm:$0xff] %vm73_vm0, %v84_v30  ;;  %v126_v36 = vrot.slane %v125_v34, 1 }
   0xd   :  { %102 = vst.msk [vmem:[#allocation1 + $0x10] sm:$0xff] %vm73_vm0, %v98_v31  ;;  %v140_v37 = vrot.slane %v139_v35, 1  ;;  %v153_v38 = vld [vmem:[#allocation0 + $0x6f] ss:$-1 sm:$0xff]  ;;  %v167_v39 = vld [vmem:[#allocation0 + $0x7f] ss:$-1 sm:$0xff] }
   0xe   :  { %116 = vst.msk [vmem:[#allocation1 + $0x18] sm:$0xff] %vm73_vm0, %v112_v33  ;;  %v154_v40 = vrot.slane %v153_v38, 1  ;;  %v168_v41 = vrot.slane %v167_v39, 1  ;;  %130 = vst.msk [vmem:[#allocation1 + $0x20] sm:$0xff] %vm73_vm0, %v126_v36 }
   0xf   :  { %144 = vst.msk [vmem:[#allocation1 + $0x28] sm:$0xff] %vm73_vm0, %v140_v37 }
  0x10   :  { %158 = vst.msk [vmem:[#allocation1 + $0x30] sm:$0xff] %vm73_vm0, %v154_v40  ;;  %172 = vst.msk [vmem:[#allocation1 + $0x38] sm:$0xff] %vm73_vm0, %v168_v41 }
  0x13   :  { %v214_v42 = vld [vmem:[#allocation1] sm:$0xff]  ;;  %v216_v43 = vld [vmem:[#allocation1 + $0x8] sm:$0xff] }
  0x14   :  { %v218_v44 = vld [vmem:[#allocation1 + $0x10] sm:$0xff]  ;;  %215 = vst [vmem:[%s330_s1] sm:$0xff] %v214_v42  ;;  %217 = vst [vmem:[%s330_s1 + $0x8] sm:$0xff] %v216_v43 }
  0x15   :  { %219 = vst [vmem:[%s330_s1 + $0x10] sm:$0xff] %v218_v44  ;;  %v220_v45 = vld [vmem:[#allocation1 + $0x18] sm:$0xff]  ;;  %v222_v46 = vld [vmem:[#allocation1 + $0x20] sm:$0xff] }
  0x16   :  { %221 = vst [vmem:[%s330_s1 + $0x18] sm:$0xff] %v220_v45  ;;  %v224_v47 = vld [vmem:[#allocation1 + $0x28] sm:$0xff]  ;;  %223 = vst [vmem:[%s330_s1 + $0x20] sm:$0xff] %v222_v46 }
  0x17   :  { %225 = vst [vmem:[%s330_s1 + $0x28] sm:$0xff] %v224_v47  ;;  %v226_v48 = vld [vmem:[#allocation1 + $0x30] sm:$0xff]  ;;  %v228_v49 = vld [vmem:[#allocation1 + $0x38] sm:$0xff] }
  0x18   :  { %227 = vst [vmem:[%s330_s1 + $0x30] sm:$0xff] %v226_v48  ;;  %229 = vst [vmem:[%s330_s1 + $0x38] sm:$0xff] %v228_v49 }

// kernel: spectral_conv2d_forward.1
= control target key start
LH: loop header
LB: loop body
LE: loop exit
PB: predicated region body
PF: predicated region fallthrough
CT: control target
= control target key end

     0   :  { %vm82_vm0 = vcmask 1043456   ;;  %vm78_vm1 = vcmask 31744   ;;  %v35974_v0 = vmov 0.0   ;;  %vm32634_vm2 = vmmov 0   ;;  %s32635_s4 = smov 124   ;;  %s35968_s2 = inlined_call_operand.vmem [shape: f32[32,4,8], index: 2, kind: input, shape index: {}]   ;;  %s35969_s0 = inlined_call_operand.vmem [shape: f32[32,2,4], index: 0, kind: input, shape index: {}]   ;;  %s35970_s1 = inlined_call_operand.vmem [shape: f32[32,2,4], index: 1, kind: input, shape index: {}]   ;;  %s35971_s3 = inlined_call_operand.vmem [shape: f32[32,2,8], index: 3, kind: output, shape index: {}]  }
   0x1   :  { %30069 = vmatprep.subr.mxu0 %v35974_v0  ;;  %30099 = vmatprep.subr.mxu1 %v35974_v0  ;;  %v46_v1 = vld [vmem:[%s35968_s2] sm:$0xf]  ;;  %v47_v2 = vld [vmem:[%s35968_s2 + $0x4] sm:$0xf]  ;;  %v48_v30 = vld [vmem:[%s35968_s2 + $0x8] sm:$0xf] }
   0x2   :  { %v14_v3 = vld [vmem:[%s35969_s0] sm:$0x3]  ;;  %v84_v4 = vsel %vm82_vm0, %v46_v1, 0  ;;  %v536_v5 = vsel %vm82_vm0, %v47_v2, 0  ;;  %30071 = vmatprep.mubr.msk.f32.mxu0 %vm32634_vm2, %v35974_v0  ;;  %30101 = vmatprep.mubr.msk.f32.mxu1 %vm32634_vm2, %v35974_v0  ;;  %v15_v7 = vld [vmem:[%s35969_s0 + $0x2] sm:$0x3] }
   0x3   :  { %v80_v6 = vsel %vm78_vm1, %v14_v3, 0  ;;  %v32678_v8 = vand.u32 4294901760, %v84_v4  ;;  %v32680_v9 = vand.u32 4294901760, %v536_v5  ;;  %v533_v11 = vsel %vm78_vm1, %v15_v7, 0  ;;  %v16_v29 = vld [vmem:[%s35969_s0 + $0x4] sm:$0x3] }
   0x4   :  { %v32682_v10 = vand.u32 4294901760, %v80_v6  ;;  %v32685_v12 = vand.u32 4294901760, %v533_v11  ;;  %v17_v31 = vld [vmem:[%s35969_s0 + $0x6] sm:$0x3]  ;;  %v49_v32 = vld [vmem:[%s35968_s2 + $0xc] sm:$0xf] }
   0x5   :  { %30070 = vmatpush3.msra.mxu0 %v32678_v8  ;;  %30100 = vmatpush3.msra.mxu1 %v32680_v9  ;;  %v32691_v14 = vsub.f32 %v84_v4, %v32678_v8  ;;  %v32694_v15 = vsub.f32 %v536_v5, %v32680_v9  ;;  %v985_v33 = vsel %vm78_vm1, %v16_v29, 0  ;;  %v988_v34 = vsel %vm82_vm0, %v48_v30, 0  ;;  %v18_v57 = vld [vmem:[%s35969_s0 + $0x8] sm:$0x3]  ;;  %v50_v58 = vld [vmem:[%s35968_s2 + $0x10] sm:$0xf] }
   0x6   :  { %v153_v13 = vsub.f32 %v80_v6, %v32682_v10  ;;  %30074 = vmatprep.subr.mxu0 %v35974_v0  ;;  %30104 = vmatprep.subr.mxu1 %v35974_v0  ;;  %v605_v16 = vsub.f32 %v533_v11, %v32685_v12  ;;  %v1437_v35 = vsel %vm78_vm1, %v17_v31, 0  ;;  %v1440_v36 = vsel %vm82_vm0, %v49_v32, 0  ;;  %v19_v59 = vld [vmem:[%s35969_s0 + $0xa] sm:$0x3]  ;;  %v51_v60 = vld [vmem:[%s35968_s2 + $0x14] sm:$0xf] }
   0x7   :  { %v32700_v18 = vand.u32 4294901760, %v32691_v14  ;;  %v32703_v19 = vand.u32 4294901760, %v32694_v15  ;;  %v32755_v37 = vand.u32 4294901760, %v985_v33  ;;  %v32758_v38 = vand.u32 4294901760, %v988_v34  ;;  %v20_v30 = vld [vmem:[%s35969_s0 + $0xc] sm:$0x3] }
   0x8   :  { %v154_v17 = vand.u32 4294901760, %v153_v13  ;;  %v606_v20 = vand.u32 4294901760, %v605_v16  ;;  %v32760_v39 = vand.u32 4294901760, %v1437_v35  ;;  %v32765_v40 = vand.u32 4294901760, %v1440_v36  ;;  %v52_v31 = vld [vmem:[%s35968_s2 + $0x18] sm:$0xf] }
   0x9   :  { %v166_v22 = vsub.f32 %v32691_v14, %v32700_v18  ;;  %v618_v23 = vsub.f32 %v32694_v15, %v32703_v19  ;;  %v32772_v41 = vsub.f32 %v985_v33, %v32755_v37  ;;  %v32775_v42 = vsub.f32 %v988_v34, %v32758_v38  ;;  %v21_v32 = vld [vmem:[%s35969_s0 + $0xe] sm:$0x3]  ;;  %v53_v33 = vld [vmem:[%s35968_s2 + $0x1c] sm:$0xf] }
   0xa   :  { %v155_v21 = vsub.f32 %v153_v13, %v154_v17  ;;  %v607_v24 = vsub.f32 %v605_v16, %v606_v20  ;;  %v32778_v43 = vsub.f32 %v1437_v35, %v32760_v39  ;;  %v32781_v44 = vsub.f32 %v1440_v36, %v32765_v40 }
   0xb   :  { %v32709_v26 = vand.u32 4294901760, %v166_v22  ;;  %v32711_v27 = vand.u32 4294901760, %v618_v23  ;;  %v1058_v45 = vand.u32 4294901760, %v32772_v41  ;;  %v32788_v46 = vand.u32 4294901760, %v32775_v42 }
   0xc   :  { %v156_v25 = vand.u32 4294901760, %v155_v21  ;;  %v608_v28 = vand.u32 4294901760, %v607_v24  ;;  %v1510_v47 = vand.u32 4294901760, %v32778_v43  ;;  %v32795_v48 = vand.u32 4294901760, %v32781_v44 }
   0xd   :  { %v1059_v49 = vsub.f32 %v32772_v41, %v1058_v45  ;;  %v1070_v50 = vsub.f32 %v32775_v42, %v32788_v46  ;;  %v1889_v61 = vsel %vm78_vm1, %v18_v57, 0  ;;  %v1892_v62 = vsel %vm82_vm0, %v50_v58, 0 }
   0xe   :  { %30072 = vmatmul.mubr.f32.vlgmr.msra.gmra.mrb[0].mxu0 %v156_v25  ;;  %30102 = vmatmul.mubr.f32.vlgmr.msra.gmra.mrb[0].mxu1 %v608_v28  ;;  %v1511_v51 = vsub.f32 %v32778_v43, %v1510_v47  ;;  %v1522_v52 = vsub.f32 %v32781_v44, %v32795_v48  ;;  %v2341_v63 = vsel %vm78_vm1, %v19_v59, 0  ;;  %v2344_v1 = vsel %vm82_vm0, %v51_v60, 0 }
   0xf   :  { %30075 = vmatpush3.msra.mxu0 %v32709_v26  ;;  %30105 = vmatpush3.msra.mxu1 %v32711_v27  ;;  %v1060_v53 = vand.u32 4294901760, %v1059_v49  ;;  %v32810_v54 = vand.u32 4294901760, %v1070_v50  ;;  %v32865_v2 = vand.u32 4294901760, %v1889_v61  ;;  %v32868_v3 = vand.u32 4294901760, %v1892_v62 }
  0x10   :  { %30076 = vmatprep.mubr.msk.f32.mxu0 %vm32634_vm2, %v35974_v0  ;;  %30079 = vmatprep.subr.mxu0 %v35974_v0  ;;  %v1512_v55 = vand.u32 4294901760, %v1511_v51  ;;  %v32815_v56 = vand.u32 4294901760, %v1522_v52  ;;  %v32870_v4 = vand.u32 4294901760, %v2341_v63  ;;  %v32875_v5 = vand.u32 4294901760, %v2344_v1 }
  0x11   :  { %30106 = vmatprep.mubr.msk.f32.mxu1 %vm32634_vm2, %v35974_v0  ;;  %30109 = vmatprep.subr.mxu1 %v35974_v0  ;;  %v32882_v6 = vsub.f32 %v1889_v61, %v32865_v2  ;;  %v32885_v7 = vsub.f32 %v1892_v62, %v32868_v3  ;;  %v2793_v34 = vsel %vm78_vm1, %v20_v30, 0  ;;  %v2796_v35 = vsel %vm82_vm0, %v52_v31, 0 }
  0x12   :  { %v32891_v11 = vsub.f32 %v2344_v1, %v32875_v5  ;;  %v3245_v36 = vsel %vm78_vm1, %v21_v32, 0  ;;  %vm29264_vm3 = vcmask 58368  }
  0x16   :  { %30077 = vmatmul.mubr.f32.vlgmr.msra.gmra.mrb[0].mxu0 %v32682_v10  ;;  %30107 = vmatmul.mubr.f32.vlgmr.msra.gmra.mrb[0].mxu1 %v32685_v12 }
  0x17   :  { %30080 = vmatpush3.msra.mxu0 %v32691_v14  ;;  %30110 = vmatpush3.msra.mxu1 %v32694_v15 }
  0x18   :  { %30081 = vmatprep.mubr.msk.f32.mxu0 %vm32634_vm2, %v35974_v0  ;;  %30084 = vmatprep.subr.mxu0 %v35974_v0 }
  0x19   :  { %30111 = vmatprep.mubr.msk.f32.mxu1 %vm32634_vm2, %v35974_v0  ;;  %30114 = vmatprep.subr.mxu1 %v35974_v0 }
  0x1e   :  { %30082 = vmatmul.mubr.f32.vlgmr.msra.gmra.mrb[0].mxu0 %v153_v13  ;;  %30112 = vmatmul.mubr.f32.vlgmr.msra.gmra.mrb[0].mxu1 %v605_v16  ;;  %v32898_v13 = vand.u32 4294901760, %v32885_v7 }
  0x1f   :  { %30085 = vmatpush3.msra.mxu0 %v32678_v8  ;;  %30115 = vmatpush3.msra.mxu1 %v32680_v9 }
  0x20   :  { %30086 = vmatprep.mubr.msk.f32.mxu0 %vm32634_vm2, %v35974_v0  ;;  %30089 = vmatprep.subr.mxu0 %v35974_v0  ;;  %v1974_v21 = vsub.f32 %v32885_v7, %v32898_v13 }
  0x21   :  { %30116 = vmatprep.mubr.msk.f32.mxu1 %vm32634_vm2, %v35974_v0  ;;  %30119 = vmatprep.subr.mxu1 %v35974_v0 }
  0x22   :  { %v32920_v25 = vand.u32 4294901760, %v1974_v21 }
  0x26   :  { %30087 = vmatmul.mubr.f32.vlgmr.msra.gmra.mrb[0].mxu0 %v154_v17  ;;  %30117 = vmatmul.mubr.f32.vlgmr.msra.gmra.mrb[0].mxu1 %v606_v20  ;;  %v32905_v17 = vand.u32 4294901760, %v32891_v11 }
  0x27   :  { %30090 = vmatpush3.msra.mxu0 %v32700_v18  ;;  %30120 = vmatpush3.msra.mxu1 %v32703_v19 }
  0x28   :  { %30091 = vmatprep.mubr.msk.f32.mxu0 %vm32634_vm2, %v35974_v0  ;;  %30094 = vmatprep.subr.mxu0 %v35974_v0  ;;  %v2426_v23 = vsub.f32 %v32891_v11, %v32905_v17 }
  0x29   :  { %30121 = vmatprep.mubr.msk.f32.mxu1 %vm32634_vm2, %v35974_v0  ;;  %30124 = vmatprep.subr.mxu1 %v35974_v0 }
  0x2a   :  { %v32925_v29 = vand.u32 4294901760, %v2426_v23 }
  0x2e   :  { %30092 = vmatmul.mubr.f32.vlgmr.msra.gmra.mrb[0].mxu0 %v32682_v10  ;;  %30122 = vmatmul.mubr.f32.vlgmr.msra.gmra.mrb[0].mxu1 %v32685_v12 }
  0x2f   :  { %30095 = vmatpush3.msra.mxu0 %v32678_v8  ;;  %30125 = vmatpush3.msra.mxu1 %v32680_v9 }
  0x30   :  { %30096 = vmatprep.mubr.msk.f32.mxu0 %vm32634_vm2, %v35974_v0  ;;  %30126 = vmatprep.mubr.msk.f32.mxu1 %vm32634_vm2, %v35974_v0 }
  0x31   :  { %30129 = vmatprep.subr.mxu0 %v35974_v0  ;;  %30159 = vmatprep.subr.mxu1 %v35974_v0 }
  0x36   :  { %30097 = vmatmul.mubr.f32.vlgmr.msra.gmra.mrb[0].mxu0 %v32682_v10  ;;  %30127 = vmatmul.mubr.f32.vlgmr.msra.gmra.mrb[0].mxu1 %v32685_v12  ;;  %v32888_v10 = vsub.f32 %v2341_v63, %v32870_v4  ;;  %v1962_v12 = vand.u32 4294901760, %v32882_v6 }
  0x37   :  { %30130 = vmatpush3.msra.mxu0 %v32758_v38  ;;  %30160 = vmatpush3.msra.mxu1 %v32765_v40 }
  0x38   :  { %30131 = vmatprep.mubr.msk.f32.mxu0 %vm32634_vm2, %v35974_v0  ;;  %30134 = vmatprep.subr.mxu0 %v35974_v0  ;;  %v2414_v16 = vand.u32 4294901760, %v32888_v10  ;;  %v1963_v20 = vsub.f32 %v32882_v6, %v1962_v12 }
  0x39   :  { %30161 = vmatprep.mubr.msk.f32.mxu1 %vm32634_vm2, %v35974_v0  ;;  %30164 = vmatprep.subr.mxu1 %v35974_v0 }
  0x3a   :  { %30132 = vmatmul.mubr.f32.vlgmr.msra.gmra.mrb[2].mxu0 %v1060_v53  ;;  %30162 = vmatmul.mubr.f32.vlgmr.msra.gmra.mrb[2].mxu1 %v1512_v55  ;;  %v2415_v22 = vsub.f32 %v32888_v10, %v2414_v16  ;;  %v1964_v24 = vand.u32 4294901760, %v1963_v20 }
  0x3b   :  { %30135 = vmatpush3.msra.mxu0 %v32810_v54  ;;  %30165 = vmatpush3.msra.mxu1 %v32815_v56 }
  0x3c   :  { %30136 = vmatprep.mubr.msk.f32.mxu0 %vm32634_vm2, %v35974_v0  ;;  %30139 = vmatprep.subr.mxu0 %v35974_v0  ;;  %v2416_v28 = vand.u32 4294901760, %v2415_v22 }
  0x3d   :  { %30166 = vmatprep.mubr.msk.f32.mxu1 %vm32634_vm2, %v35974_v0  ;;  %30169 = vmatprep.subr.mxu1 %v35974_v0 }
  0x42   :  { %30137 = vmatmul.mubr.f32.vlgmr.msra.gmra.mrb[2].mxu0 %v32755_v37  ;;  %30167 = vmatmul.mubr.f32.vlgmr.msra.gmra.mrb[2].mxu1 %v32760_v39 }
  0x43   :  { %30140 = vmatpush3.msra.mxu0 %v32775_v42  ;;  %30170 = vmatpush3.msra.mxu1 %v32781_v44 }
  0x44   :  { %30141 = vmatprep.mubr.msk.f32.mxu0 %vm32634_vm2, %v35974_v0  ;;  %30144 = vmatprep.subr.mxu0 %v35974_v0 }
  0x45   :  { %30171 = vmatprep.mubr.msk.f32.mxu1 %vm32634_vm2, %v35974_v0  ;;  %30174 = vmatprep.subr.mxu1 %v35974_v0 }
  0x4a   :  { %30142 = vmatmul.mubr.f32.vlgmr.msra.gmra.mrb[2].mxu0 %v32772_v41  ;;  %30172 = vmatmul.mubr.f32.vlgmr.msra.gmra.mrb[2].mxu1 %v32778_v43  ;;  %v32978_v41 = vand.u32 4294901760, %v2796_v35  ;;  %v32980_v43 = vand.u32 4294901760, %v3245_v36 }
  0x4b   :  { %30145 = vmatpush3.msra.mxu0 %v32758_v38  ;;  %30175 = vmatpush3.msra.mxu1 %v32765_v40 }
  0x4c   :  { %30146 = vmatprep.mubr.msk.f32.mxu0 %vm32634_vm2, %v35974_v0  ;;  %30149 = vmatprep.subr.mxu0 %v35974_v0  ;;  %v32995_v49 = vsub.f32 %v2796_v35, %v32978_v41  ;;  %v32998_v50 = vsub.f32 %v3245_v36, %v32980_v43 }
  0x4d   :  { %30176 = vmatprep.mubr.msk.f32.mxu1 %vm32634_vm2, %v35974_v0  ;;  %30179 = vmatprep.subr.mxu1 %v35974_v0 }
  0x4e   :  { %v33008_v53 = vand.u32 4294901760, %v32995_v49  ;;  %v3318_v55 = vand.u32 4294901760, %v32998_v50 }
  0x50   :  { %v2878_v59 = vsub.f32 %v32995_v49, %v33008_v53  ;;  %v3319_v60 = vsub.f32 %v32998_v50, %v3318_v55 }
  0x52   :  { %30147 = vmatmul.mubr.f32.vlgmr.msra.gmra.mrb[2].mxu0 %v1058_v45  ;;  %30177 = vmatmul.mubr.f32.vlgmr.msra.gmra.mrb[2].mxu1 %v1510_v47  ;;  %v33030_v63 = vand.u32 4294901760, %v2878_v59  ;;  %v3320_v1 = vand.u32 4294901760, %v3319_v60 }
  0x53   :  { %30150 = vmatpush3.msra.mxu0 %v32788_v46  ;;  %30180 = vmatpush3.msra.mxu1 %v32795_v48 }
  0x54   :  { %30151 = vmatprep.mubr.msk.f32.mxu0 %vm32634_vm2, %v35974_v0  ;;  %30154 = vmatprep.subr.mxu0 %v35974_v0 }
  0x55   :  { %30181 = vmatprep.mubr.msk.f32.mxu1 %vm32634_vm2, %v35974_v0  ;;  %30184 = vmatprep.subr.mxu1 %v35974_v0 }
  0x5a   :  { %30152 = vmatmul.mubr.f32.vlgmr.msra.gmra.mrb[2].mxu0 %v32755_v37  ;;  %30182 = vmatmul.mubr.f32.vlgmr.msra.gmra.mrb[2].mxu1 %v32760_v39 }
  0x5b   :  { %30155 = vmatpush3.msra.mxu0 %v32758_v38  ;;  %30185 = vmatpush3.msra.mxu1 %v32765_v40 }
  0x5c   :  { %30156 = vmatprep.mubr.msk.f32.mxu0 %vm32634_vm2, %v35974_v0  ;;  %30186 = vmatprep.mubr.msk.f32.mxu1 %vm32634_vm2, %v35974_v0 }
  0x5d   :  { %30189 = vmatprep.subr.mxu0 %v35974_v0  ;;  %30219 = vmatprep.subr.mxu1 %v35974_v0 }
  0x62   :  { %30157 = vmatmul.mubr.f32.vlgmr.msra.gmra.mrb[2].mxu0 %v32755_v37  ;;  %30187 = vmatmul.mubr.f32.vlgmr.msra.gmra.mrb[2].mxu1 %v32760_v39  ;;  %v3248_v37 = vsel %vm82_vm0, %v53_v33, 0  ;;  %v32975_v39 = vand.u32 4294901760, %v2793_v34 }
  0x63   :  { %30190 = vmatpush3.msra.mxu0 %v32868_v3  ;;  %30220 = vmatpush3.msra.mxu1 %v32875_v5  ;;  %v32985_v45 = vand.u32 4294901760, %v3248_v37 }
  0x64   :  { %30191 = vmatprep.mubr.msk.f32.mxu0 %vm32634_vm2, %v35974_v0  ;;  %30194 = vmatprep.subr.mxu0 %v35974_v0  ;;  %v32992_v47 = vsub.f32 %v2793_v34, %v32975_v39 }
  0x65   :  { %30221 = vmatprep.mubr.msk.f32.mxu1 %vm32634_vm2, %v35974_v0  ;;  %30224 = vmatprep.subr.mxu1 %v35974_v0  ;;  %v33001_v51 = vsub.f32 %v3248_v37, %v32985_v45 }
  0x66   :  { %30192 = vmatmul.mubr.f32.vlgmr.msra.gmra.mrb[4].mxu0 %v1964_v24  ;;  %30222 = vmatmul.mubr.f32.vlgmr.msra.gmra.mrb[4].mxu1 %v2416_v28  ;;  %v2866_v52 = vand.u32 4294901760, %v32992_v47 }
  0x67   :  { %30195 = vmatpush3.msra.mxu0 %v32920_v25  ;;  %30225 = vmatpush3.msra.mxu1 %v32925_v29  ;;  %v33015_v57 = vand.u32 4294901760, %v33001_v51 }
  0x68   :  { %30196 = vmatprep.mubr.msk.f32.mxu0 %vm32634_vm2, %v35974_v0  ;;  %30199 = vmatprep.subr.mxu0 %v35974_v0  ;;  %v2867_v58 = vsub.f32 %v32992_v47, %v2866_v52 }
  0x69   :  { %30226 = vmatprep.mubr.msk.f32.mxu1 %vm32634_vm2, %v35974_v0  ;;  %30229 = vmatprep.subr.mxu1 %v35974_v0  ;;  %v3330_v61 = vsub.f32 %v33001_v51, %v33015_v57 }
  0x6a   :  { %v2868_v62 = vand.u32 4294901760, %v2867_v58 }
  0x6e   :  { %30197 = vmatmul.mubr.f32.vlgmr.msra.gmra.mrb[4].mxu0 %v32865_v2  ;;  %30227 = vmatmul.mubr.f32.vlgmr.msra.gmra.mrb[4].mxu1 %v32870_v4 }
  0x6f   :  { %30200 = vmatpush3.msra.mxu0 %v32885_v7  ;;  %30230 = vmatpush3.msra.mxu1 %v32891_v11 }
  0x70   :  { %30201 = vmatprep.mubr.msk.f32.mxu0 %vm32634_vm2, %v35974_v0  ;;  %30204 = vmatprep.subr.mxu0 %v35974_v0 }
  0x71   :  { %30231 = vmatprep.mubr.msk.f32.mxu1 %vm32634_vm2, %v35974_v0  ;;  %30234 = vmatprep.subr.mxu1 %v35974_v0 }
  0x76   :  { %30202 = vmatmul.mubr.f32.vlgmr.msra.gmra.mrb[4].mxu0 %v32882_v6  ;;  %30232 = vmatmul.mubr.f32.vlgmr.msra.gmra.mrb[4].mxu1 %v32888_v10  ;;  %v33035_v6 = vand.u32 4294901760, %v3330_v61  ;;  %v23_v10 = vld [vmem:[%s35969_s0 + $0x12] sm:$0x3] }
  0x77   :  { %30205 = vmatpush3.msra.mxu0 %v32868_v3  ;;  %30235 = vmatpush3.msra.mxu1 %v32875_v5  ;;  %v4149_v21 = vsel %vm78_vm1, %v23_v10, 0 }
  0x78   :  { %30206 = vmatprep.mubr.msk.f32.mxu0 %vm32634_vm2, %v35974_v0  ;;  %30209 = vmatprep.subr.mxu0 %v35974_v0  ;;  %v33090_v28 = vand.u32 4294901760, %v4149_v21 }
  0x79   :  { %30236 = vmatprep.mubr.msk.f32.mxu1 %vm32634_vm2, %v35974_v0  ;;  %30239 = vmatprep.subr.mxu1 %v35974_v0 }
  0x7a   :  { %v33108_v33 = vsub.f32 %v4149_v21, %v33090_v28 }
  0x7c   :  { %v4222_v37 = vand.u32 4294901760, %v33108_v33 }
  0x7e   :  { %30207 = vmatmul.mubr.f32.vlgmr.msra.gmra.mrb[4].mxu0 %v1962_v12  ;;  %30237 = vmatmul.mubr.f32.vlgmr.msra.gmra.mrb[4].mxu1 %v2414_v16  ;;  %v55_v12 = vld [vmem:[%s35968_s2 + $0x24] sm:$0xf] }
  0x7f   :  { %30210 = vmatpush3.msra.mxu0 %v32898_v13  ;;  %30240 = vmatpush3.msra.mxu1 %v32905_v17  ;;  %v4152_v22 = vsel %vm82_vm0, %v55_v12, 0 }
  0x80   :  { %30211 = vmatprep.mubr.msk.f32.mxu0 %vm32634_vm2, %v35974_v0  ;;  %30214 = vmatprep.subr.mxu0 %v35974_v0  ;;  %v33095_v30 = vand.u32 4294901760, %v4152_v22 }
  0x81   :  { %30241 = vmatprep.mubr.msk.f32.mxu1 %vm32634_vm2, %v35974_v0  ;;  %30244 = vmatprep.subr.mxu1 %v35974_v0 }
  0x82   :  { %v33111_v34 = vsub.f32 %v4152_v22, %v33095_v30 }
  0x86   :  { %30212 = vmatmul.mubr.f32.vlgmr.msra.gmra.mrb[4].mxu0 %v32865_v2  ;;  %30242 = vmatmul.mubr.f32.vlgmr.msra.gmra.mrb[4].mxu1 %v32870_v4 }
  0x87   :  { %30215 = vmatpush3.msra.mxu0 %v32868_v3  ;;  %30245 = vmatpush3.msra.mxu1 %v32875_v5 }
  0x88   :  { %30216 = vmatprep.mubr.msk.f32.mxu0 %vm32634_vm2, %v35974_v0  ;;  %30246 = vmatprep.mubr.msk.f32.mxu1 %vm32634_vm2, %v35974_v0 }
  0x89   :  { %30249 = vmatprep.subr.mxu0 %v35974_v0  ;;  %30279 = vmatprep.subr.mxu1 %v35974_v0 }
  0x8e   :  { %30217 = vmatmul.mubr.f32.vlgmr.msra.gmra.mrb[4].mxu0 %v32865_v2  ;;  %30247 = vmatmul.mubr.f32.vlgmr.msra.gmra.mrb[4].mxu1 %v32870_v4  ;;  %v22_v2 = vld [vmem:[%s35969_s0 + $0x10] sm:$0x3]  ;;  %v54_v4 = vld [vmem:[%s35968_s2 + $0x20] sm:$0xf] }
  0x8f   :  { %30250 = vmatpush3.msra.mxu0 %v32978_v41  ;;  %30280 = vmatpush3.msra.mxu1 %v32985_v45  ;;  %v3697_v16 = vsel %vm78_vm1, %v22_v2, 0  ;;  %v3700_v20 = vsel %vm82_vm0, %v54_v4, 0  ;;  %v57_v2 = vld [vmem:[%s35968_s2 + $0x2c] sm:$0xf] }
  0x90   :  { %30251 = vmatprep.mubr.msk.f32.mxu0 %vm32634_vm2, %v35974_v0  ;;  %30254 = vmatprep.subr.mxu0 %v35974_v0  ;;  %v33085_v23 = vand.u32 4294901760, %v3697_v16  ;;  %v33088_v24 = vand.u32 4294901760, %v3700_v20 }
  0x91   :  { %30281 = vmatprep.mubr.msk.f32.mxu1 %vm32634_vm2, %v35974_v0  ;;  %30284 = vmatprep.subr.mxu1 %v35974_v0 }
  0x92   :  { %30252 = vmatmul.mubr.f32.vlgmr.msra.gmra.mrb[6].mxu0 %v2868_v62  ;;  %30282 = vmatmul.mubr.f32.vlgmr.msra.gmra.mrb[6].mxu1 %v3320_v1  ;;  %v33102_v31 = vsub.f32 %v3697_v16, %v33085_v23  ;;  %v33105_v32 = vsub.f32 %v3700_v20, %v33088_v24  ;;  %v25_v1 = vld [vmem:[%s35969_s0 + $0x16] sm:$0x3]  ;;  %v5056_v16 = vsel %vm82_vm0, %v57_v2, 0 }
  0x93   :  { %30255 = vmatpush3.msra.mxu0 %v33030_v63  ;;  %30285 = vmatpush3.msra.mxu1 %v33035_v6  ;;  %v5053_v12 = vsel %vm78_vm1, %v25_v1, 0 }
  0x94   :  { %30256 = vmatprep.mubr.msk.f32.mxu0 %vm32634_vm2, %v35974_v0  ;;  %30259 = vmatprep.subr.mxu0 %v35974_v0  ;;  %v3770_v35 = vand.u32 4294901760, %v33102_v31  ;;  %v33118_v36 = vand.u32 4294901760, %v33105_v32  ;;  %v33200_v22 = vand.u32 4294901760, %v5053_v12 }
  0x95   :  { %30286 = vmatprep.mubr.msk.f32.mxu1 %vm32634_vm2, %v35974_v0  ;;  %30289 = vmatprep.subr.mxu1 %v35974_v0 }
  0x9a   :  { %30257 = vmatmul.mubr.f32.vlgmr.msra.gmra.mrb[6].mxu0 %v32975_v39  ;;  %30287 = vmatmul.mubr.f32.vlgmr.msra.gmra.mrb[6].mxu1 %v32980_v43 }
  0x9b   :  { %30260 = vmatpush3.msra.mxu0 %v32995_v49  ;;  %30290 = vmatpush3.msra.mxu1 %v33001_v51 }
  0x9c   :  { %30261 = vmatprep.mubr.msk.f32.mxu0 %vm32634_vm2, %v35974_v0  ;;  %30264 = vmatprep.subr.mxu0 %v35974_v0 }
  0x9d   :  { %30291 = vmatprep.mubr.msk.f32.mxu1 %vm32634_vm2, %v35974_v0  ;;  %30294 = vmatprep.subr.mxu1 %v35974_v0 }
  0xa2   :  { %30262 = vmatmul.mubr.f32.vlgmr.msra.gmra.mrb[6].mxu0 %v32992_v47  ;;  %30292 = vmatmul.mubr.f32.vlgmr.msra.gmra.mrb[6].mxu1 %v32998_v50  ;;  %v33125_v47 = vand.u32 4294901760, %v33111_v34  ;;  %v3771_v50 = vsub.f32 %v33102_v31, %v3770_v35 }
  0xa3   :  { %30265 = vmatpush3.msra.mxu0 %v32978_v41  ;;  %30295 = vmatpush3.msra.mxu1 %v32985_v45 }
  0xa4   :  { %30266 = vmatprep.mubr.msk.f32.mxu0 %vm32634_vm2, %v35974_v0  ;;  %30269 = vmatprep.subr.mxu0 %v35974_v0  ;;  %v4234_v58 = vsub.f32 %v33111_v34, %v33125_v47  ;;  %v3772_v59 = vand.u32 4294901760, %v3771_v50 }
  0xa5   :  { %30296 = vmatprep.mubr.msk.f32.mxu1 %vm32634_vm2, %v35974_v0  ;;  %30299 = vmatprep.subr.mxu1 %v35974_v0 }
  0xa6   :  { %v33145_v62 = vand.u32 4294901760, %v4234_v58 }
  0xaa   :  { %30267 = vmatmul.mubr.f32.vlgmr.msra.gmra.mrb[6].mxu0 %v2866_v52  ;;  %30297 = vmatmul.mubr.f32.vlgmr.msra.gmra.mrb[6].mxu1 %v3318_v55  ;;  %v3782_v52 = vsub.f32 %v33105_v32, %v33118_v36  ;;  %v4223_v55 = vsub.f32 %v33108_v33, %v4222_v37 }
  0xab   :  { %30270 = vmatpush3.msra.mxu0 %v33008_v53  ;;  %30300 = vmatpush3.msra.mxu1 %v33015_v57 }
  0xac   :  { %30271 = vmatprep.mubr.msk.f32.mxu0 %vm32634_vm2, %v35974_v0  ;;  %30274 = vmatprep.subr.mxu0 %v35974_v0  ;;  %v33140_v60 = vand.u32 4294901760, %v3782_v52  ;;  %v4224_v61 = vand.u32 4294901760, %v4223_v55 }
  0xad   :  { %30301 = vmatprep.mubr.msk.f32.mxu1 %vm32634_vm2, %v35974_v0  ;;  %30304 = vmatprep.subr.mxu1 %v35974_v0 }
  0xb2   :  { %30272 = vmatmul.mubr.f32.vlgmr.msra.gmra.mrb[6].mxu0 %v32975_v39  ;;  %30302 = vmatmul.mubr.f32.vlgmr.msra.gmra.mrb[6].mxu1 %v32980_v43 }
  0xb3   :  { %30275 = vmatpush3.msra.mxu0 %v32978_v41  ;;  %30305 = vmatpush3.msra.mxu1 %v32985_v45 }
  0xb4   :  { %30276 = vmatprep.mubr.msk.f32.mxu0 %vm32634_vm2, %v35974_v0  ;;  %30306 = vmatprep.mubr.msk.f32.mxu1 %vm32634_vm2, %v35974_v0 }
  0xb5   :  { %30309 = vmatprep.subr.mxu0 %v35974_v0  ;;  %30339 = vmatprep.subr.mxu1 %v35974_v0 }
  0xba   :  { %30277 = vmatmul.mubr.f32.vlgmr.msra.gmra.mrb[6].mxu0 %v32975_v39  ;;  %30307 = vmatmul.mubr.f32.vlgmr.msra.gmra.mrb[6].mxu1 %v32980_v43  ;;  %v24_v39 = vld [vmem:[%s35969_s0 + $0x14] sm:$0x3]  ;;  %v56_v43 = vld [vmem:[%s35968_s2 + $0x28] sm:$0xf] }
  0xbb   :  { %30310 = vmatpush3.msra.mxu0 %v33088_v24  ;;  %30340 = vmatpush3.msra.mxu1 %v33095_v30  ;;  %v4601_v4 = vsel %vm78_vm1, %v24_v39, 0  ;;  %v4604_v10 = vsel %vm82_vm0, %v56_v43, 0 }
  0xbc   :  { %30311 = vmatprep.mubr.msk.f32.mxu0 %vm32634_vm2, %v35974_v0  ;;  %30314 = vmatprep.subr.mxu0 %v35974_v0  ;;  %v33195_v20 = vand.u32 4294901760, %v4601_v4  ;;  %v33198_v21 = vand.u32 4294901760, %v4604_v10 }
  0xbd   :  { %30341 = vmatprep.mubr.msk.f32.mxu1 %vm32634_vm2, %v35974_v0  ;;  %30344 = vmatprep.subr.mxu1 %v35974_v0 }
  0xbe   :  { %30312 = vmatmul.mubr.f32.vlgmr.msra.gmra.mrb[8].mxu0 %v3772_v59  ;;  %30342 = vmatmul.mubr.f32.vlgmr.msra.gmra.mrb[8].mxu1 %v4224_v61 }
  0xbf   :  { %30315 = vmatpush3.msra.mxu0 %v33140_v60  ;;  %30345 = vmatpush3.msra.mxu1 %v33145_v62 }
  0xc0   :  { %30316 = vmatprep.mubr.msk.f32.mxu0 %vm32634_vm2, %v35974_v0  ;;  %30319 = vmatprep.subr.mxu0 %v35974_v0 }
  0xc1   :  { %30346 = vmatprep.mubr.msk.f32.mxu1 %vm32634_vm2, %v35974_v0  ;;  %30349 = vmatprep.subr.mxu1 %v35974_v0 }
  0xc6   :  { %30317 = vmatmul.mubr.f32.vlgmr.msra.gmra.mrb[8].mxu0 %v33085_v23  ;;  %30347 = vmatmul.mubr.f32.vlgmr.msra.gmra.mrb[8].mxu1 %v33090_v28 }
  0xc7   :  { %30320 = vmatpush3.msra.mxu0 %v33105_v32  ;;  %30350 = vmatpush3.msra.mxu1 %v33111_v34 }
  0xc8   :  { %30321 = vmatprep.mubr.msk.f32.mxu0 %vm32634_vm2, %v35974_v0  ;;  %30324 = vmatprep.subr.mxu0 %v35974_v0 }
  0xc9   :  { %30351 = vmatprep.mubr.msk.f32.mxu1 %vm32634_vm2, %v35974_v0  ;;  %30354 = vmatprep.subr.mxu1 %v35974_v0 }
  0xce   :  { %30322 = vmatmul.mubr.f32.vlgmr.msra.gmra.mrb[8].mxu0 %v33102_v31  ;;  %30352 = vmatmul.mubr.f32.vlgmr.msra.gmra.mrb[8].mxu1 %v33108_v33  ;;  %v33205_v31 = vand.u32 4294901760, %v5056_v16  ;;  %v33212_v33 = vsub.f32 %v4601_v4, %v33195_v20 }
  0xcf   :  { %30325 = vmatpush3.msra.mxu0 %v33088_v24  ;;  %30355 = vmatpush3.msra.mxu1 %v33095_v30 }
  0xd0   :  { %30326 = vmatprep.mubr.msk.f32.mxu0 %vm32634_vm2, %v35974_v0  ;;  %30329 = vmatprep.subr.mxu0 %v35974_v0  ;;  %36092 = vst [vmem:[#allocation2_spill] sm:$0xff] %v33205_v31  ;;  %v33221_v50 = vsub.f32 %v5056_v16, %v33205_v31  ;;  %v4674_v52 = vand.u32 4294901760, %v33212_v33  ;;  %v27_v16 = vld [vmem:[%s35969_s0 + $0x1a] sm:$0x3] }
  0xd1   :  { %30356 = vmatprep.mubr.msk.f32.mxu1 %vm32634_vm2, %v35974_v0  ;;  %30359 = vmatprep.subr.mxu1 %v35974_v0 }
  0xd2   :  { %36094 = vst [vmem:[#allocation4_spill] sm:$0xff] %v33221_v50  ;;  %v33235_v59 = vand.u32 4294901760, %v33221_v50  ;;  %v4675_v61 = vsub.f32 %v33212_v33, %v4674_v52 }
  0xd4   :  { %36096 = vst [vmem:[#allocation6_spill] sm:$0xff] %v33235_v59  ;;  %v5138_v1 = vsub.f32 %v33221_v50, %v33235_v59  ;;  %v4676_v2 = vand.u32 4294901760, %v4675_v61 }
  0xd6   :  { %30327 = vmatmul.mubr.f32.vlgmr.msra.gmra.mrb[8].mxu0 %v3770_v35  ;;  %30357 = vmatmul.mubr.f32.vlgmr.msra.gmra.mrb[8].mxu1 %v4222_v37  ;;  %v33215_v35 = vsub.f32 %v4604_v10, %v33198_v21  ;;  %v33218_v37 = vsub.f32 %v5053_v12, %v33200_v22  ;;  %v33255_v12 = vand.u32 4294901760, %v5138_v1 }
  0xd7   :  { %30330 = vmatpush3.msra.mxu0 %v33118_v36  ;;  %30360 = vmatpush3.msra.mxu1 %v33125_v47 }
  0xd8   :  { %30331 = vmatprep.mubr.msk.f32.mxu0 %vm32634_vm2, %v35974_v0  ;;  %30334 = vmatprep.subr.mxu0 %v35974_v0  ;;  %36093 = vst [vmem:[#allocation3_spill] sm:$0xff] %v33215_v35  ;;  %v33228_v55 = vand.u32 4294901760, %v33215_v35  ;;  %v5126_v58 = vand.u32 4294901760, %v33218_v37  ;;  %36098 = vst [vmem:[#allocation8_spill] sm:$0xff] %v33255_v12 }
  0xd9   :  { %30361 = vmatprep.mubr.msk.f32.mxu1 %vm32634_vm2, %v35974_v0  ;;  %30364 = vmatprep.subr.mxu1 %v35974_v0 }
  0xda   :  { %36095 = vst [vmem:[#allocation5_spill] sm:$0xff] %v33228_v55  ;;  %v4686_v39 = vsub.f32 %v33215_v35, %v33228_v55  ;;  %v5127_v43 = vsub.f32 %v33218_v37, %v5126_v58 }
  0xdc   :  { %v33250_v4 = vand.u32 4294901760, %v4686_v39  ;;  %v5128_v10 = vand.u32 4294901760, %v5127_v43  ;;  %v5957_v39 = vsel %vm78_vm1, %v27_v16, 0 }
  0xde   :  { %30332 = vmatmul.mubr.f32.vlgmr.msra.gmra.mrb[8].mxu0 %v33085_v23  ;;  %30362 = vmatmul.mubr.f32.vlgmr.msra.gmra.mrb[8].mxu1 %v33090_v28  ;;  %36097 = vst [vmem:[#allocation7_spill] sm:$0xff] %v33250_v4 }
  0xdf   :  { %30335 = vmatpush3.msra.mxu0 %v33088_v24  ;;  %30365 = vmatpush3.msra.mxu1 %v33095_v30 }
  0xe0   :  { %30336 = vmatprep.mubr.msk.f32.mxu0 %vm32634_vm2, %v35974_v0  ;;  %30366 = vmatprep.mubr.msk.f32.mxu1 %vm32634_vm2, %v35974_v0 }
  0xe1   :  { %30369 = vmatprep.subr.mxu0 %v35974_v0  ;;  %30399 = vmatprep.subr.mxu1 %v35974_v0 }
  0xe6   :  { %30337 = vmatmul.mubr.f32.vlgmr.msra.gmra.mrb[8].mxu0 %v33085_v23  ;;  %30367 = vmatmul.mubr.f32.vlgmr.msra.gmra.mrb[8].mxu1 %v33090_v28  ;;  %v26_v23 = vld [vmem:[%s35969_s0 + $0x18] sm:$0x3]  ;;  %v58_v28 = vld [vmem:[%s35968_s2 + $0x30] sm:$0xf] }
  0xe7   :  { %30370 = vmatpush3.msra.mxu0 %v33198_v21  ;;  %30400 = vmatpush3.msra.mxu1 %v33205_v31  ;;  %v5508_v61 = vsel %vm82_vm0, %v58_v28, 0 }
  0xe8   :  { %30371 = vmatprep.mubr.msk.f32.mxu0 %vm32634_vm2, %v35974_v0  ;;  %30374 = vmatprep.subr.mxu0 %v35974_v0 }
  0xe9   :  { %30401 = vmatprep.mubr.msk.f32.mxu1 %vm32634_vm2, %v35974_v0  ;;  %30404 = vmatprep.subr.mxu1 %v35974_v0 }
  0xea   :  { %30372 = vmatmul.mubr.f32.vlgmr.msra.gmra.mrb[10].mxu0 %v4676_v2  ;;  %30402 = vmatmul.mubr.f32.vlgmr.msra.gmra.mrb[10].mxu1 %v5128_v10  ;;  %v33308_v2 = vand.u32 4294901760, %v5508_v61  ;;  %v33310_v10 = vand.u32 4294901760, %v5957_v39 }
  0xeb   :  { %30375 = vmatpush3.msra.mxu0 %v33250_v4  ;;  %30405 = vmatpush3.msra.mxu1 %v33255_v12 }
  0xec   :  { %30376 = vmatprep.mubr.msk.f32.mxu0 %vm32634_vm2, %v35974_v0  ;;  %30379 = vmatprep.subr.mxu0 %v35974_v0  ;;  %36099 = vst [vmem:[#allocation9_spill] sm:$0xff] %v33308_v2  ;;  %v33328_v28 = vsub.f32 %v5957_v39, %v33310_v10 }
  0xed   :  { %30406 = vmatprep.mubr.msk.f32.mxu1 %vm32634_vm2, %v35974_v0  ;;  %30409 = vmatprep.subr.mxu1 %v35974_v0 }
  0xee   :  { %v6030_v39 = vand.u32 4294901760, %v33328_v28 }
  0xf2   :  { %30377 = vmatmul.mubr.f32.vlgmr.msra.gmra.mrb[10].mxu0 %v33195_v20  ;;  %30407 = vmatmul.mubr.f32.vlgmr.msra.gmra.mrb[10].mxu1 %v33200_v22 }
  0xf3   :  { %30380 = vmatpush3.msra.mxu0 %v33215_v35  ;;  %30410 = vmatpush3.msra.mxu1 %v33221_v50 }
  0xf4   :  { %30381 = vmatprep.mubr.msk.f32.mxu0 %vm32634_vm2, %v35974_v0  ;;  %30384 = vmatprep.subr.mxu0 %v35974_v0 }
  0xf5   :  { %30411 = vmatprep.mubr.msk.f32.mxu1 %vm32634_vm2, %v35974_v0  ;;  %30414 = vmatprep.subr.mxu1 %v35974_v0 }
  0xfa   :  { %30382 = vmatmul.mubr.f32.vlgmr.msra.gmra.mrb[10].mxu0 %v33212_v33  ;;  %30412 = vmatmul.mubr.f32.vlgmr.msra.gmra.mrb[10].mxu1 %v33218_v37  ;;  %v59_v33 = vld [vmem:[%s35968_s2 + $0x34] sm:$0xf]  ;;  %v5505_v37 = vsel %vm78_vm1, %v26_v23, 0 }
  0xfb   :  { %30385 = vmatpush3.msra.mxu0 %v33198_v21  ;;  %30415 = vmatpush3.msra.mxu1 %v33205_v31  ;;  %v5960_v43 = vsel %vm82_vm0, %v59_v33, 0  ;;  %v33305_v1 = vand.u32 4294901760, %v5505_v37 }
  0xfc   :  { %30386 = vmatprep.mubr.msk.f32.mxu0 %vm32634_vm2, %v35974_v0  ;;  %30389 = vmatprep.subr.mxu0 %v35974_v0  ;;  %v33315_v23 = vand.u32 4294901760, %v5960_v43 }
  0xfd   :  { %30416 = vmatprep.mubr.msk.f32.mxu1 %vm32634_vm2, %v35974_v0  ;;  %30419 = vmatprep.subr.mxu1 %v35974_v0 }
  0xfe   :  { %36100 = vst [vmem:[#allocation10_spill] sm:$0xff] %v33315_v23  ;;  %v33331_v16 = vsub.f32 %v5960_v43, %v33315_v23  ;;  %v36106_v43 = vmov 0.0  }
 0x100   :  { %36102 = vst [vmem:[#allocation12_spill] sm:$0xff] %v33331_v16 }
 0x102   :  { %30387 = vmatmul.mubr.f32.vlgmr.msra.gmra.mrb[10].mxu0 %v4674_v52  ;;  %30417 = vmatmul.mubr.f32.vlgmr.msra.gmra.mrb[10].mxu1 %v5126_v58  ;;  %v33322_v52 = vsub.f32 %v5505_v37, %v33305_v1  ;;  %v33325_v58 = vsub.f32 %v5508_v61, %v33308_v2 }
 0x103   :  { %30390 = vmatpush3.msra.mxu0 %v33228_v55  ;;  %30420 = vmatpush3.msra.mxu1 %v33235_v59 }
 0x104   :  { %30391 = vmatprep.mubr.msk.f32.mxu0 %vm32634_vm2, %v35974_v0  ;;  %30394 = vmatprep.subr.mxu0 %v35974_v0  ;;  %36101 = vst [vmem:[#allocation11_spill] sm:$0xff] %v33325_v58  ;;  %v33342_v61 = vand.u32 4294901760, %v33325_v58 }
 0x105   :  { %30421 = vmatprep.mubr.msk.f32.mxu1 %vm32634_vm2, %v35974_v0  ;;  %30424 = vmatprep.subr.mxu1 %v35974_v0  ;;  %v5578_v0 = vand.u32 4294901760, %v33322_v52 }
 0x106   :  { %36105 = vst [vmem:[#allocation15_spill] sm:$0xff] %v33342_v61 }
 0x109   :  { %v33333_v33 = vpop.f32.mrb[0].mxu0  ;;  %v33335_v59 = vpop.f32.mrb[0].mxu1 }
 0x10a   :  { %36103 = vst [vmem:[#allocation13_spill] sm:$0xff] %v33333_v33  ;;  %36104 = vst [vmem:[#allocation14_spill] sm:$0xff] %v33335_v59  ;;  %v30098_v55 = vpop.f32.mrb[1].mxu0  ;;  %30392 = vmatmul.mubr.f32.vlgmr.msra.gmra.mrb[10].mxu0 %v33195_v20  ;;  %v30128_v37 = vpop.f32.mrb[1].mxu1  ;;  %30422 = vmatmul.mubr.f32.vlgmr.msra.gmra.mrb[10].mxu1 %v33200_v22  ;;  %v5590_v33 = vsub.f32 %v33325_v58, %v33342_v61  ;;  %v6031_v59 = vsub.f32 %v33328_v28, %v6030_v39 }
 0x10b   :  { %30395 = vmatpush3.msra.mxu0 %v33198_v21  ;;  %30425 = vmatpush3.msra.mxu1 %v33205_v31  ;;  %v33349_v55 = vand.u32 4294901760, %v33331_v16  ;;  %v5579_v37 = vsub.f32 %v33322_v52, %v5578_v0 }
 0x10c   :  { %30396 = vmatprep.mubr.msk.f32.mxu0 %vm32634_vm2, %v36106_v43  ;;  %30426 = vmatprep.mubr.msk.f32.mxu1 %vm32634_vm2, %v36106_v43  ;;  %v33364_v12 = vand.u32 4294901760, %v5590_v33  ;;  %v6032_v4 = vand.u32 4294901760, %v6031_v59 }
 0x10d   :  { %36107 = vst [vmem:[#allocation16_spill] sm:$0xff] %v33349_v55  ;;  %30429 = vmatprep.subr.mxu0 %v36106_v43  ;;  %30459 = vmatprep.subr.mxu1 %v36106_v43  ;;  %v6042_v50 = vsub.f32 %v33331_v16, %v33349_v55  ;;  %v5580_v35 = vand.u32 4294901760, %v5579_v37 }
 0x10e   :  { %36108 = vst [vmem:[#allocation17_spill] sm:$0xff] %v33364_v12 }
 0x10f   :  { %v33369_v31 = vand.u32 4294901760, %v6042_v50  ;;  %v61_v50 = vld [vmem:[%s35968_s2 + $0x3c] sm:$0xf] }
 0x111   :  { %36109 = vst [vmem:[#allocation18_spill] sm:$0xff] %v33369_v31 }
 0x112   :  { %30397 = vmatmul.mubr.f32.vlgmr.msra.gmra.mrb[10].mxu0 %v33195_v20  ;;  %30427 = vmatmul.mubr.f32.vlgmr.msra.gmra.mrb[10].mxu1 %v33200_v22  ;;  %v28_v20 = vld [vmem:[%s35969_s0 + $0x1c] sm:$0x3]  ;;  %v60_v22 = vld [vmem:[%s35968_s2 + $0x38] sm:$0xf] }
 0x113   :  { %30430 = vmatpush3.msra.mxu0 %v33308_v2  ;;  %30460 = vmatpush3.msra.mxu1 %v33315_v23  ;;  %v6409_v59 = vsel %vm78_vm1, %v28_v20, 0 }
 0x114   :  { %30431 = vmatprep.mubr.msk.f32.mxu0 %vm32634_vm2, %v36106_v43  ;;  %30434 = vmatprep.subr.mxu0 %v36106_v43  ;;  %v33419_v33 = vand.u32 4294901760, %v6409_v59 }
 0x115   :  { %30461 = vmatprep.mubr.msk.f32.mxu1 %vm32634_vm2, %v36106_v43  ;;  %30464 = vmatprep.subr.mxu1 %v36106_v43 }
 0x116   :  { %30432 = vmatmul.mubr.f32.vlgmr.msra.gmra.mrb[12].mxu0 %v5580_v35  ;;  %30462 = vmatmul.mubr.f32.vlgmr.msra.gmra.mrb[12].mxu1 %v6032_v4  ;;  %v29_v35 = vld [vmem:[%s35969_s0 + $0x1e] sm:$0x3]  ;;  %v6412_v4 = vsel %vm82_vm0, %v60_v22, 0 }
 0x117   :  { %30435 = vmatpush3.msra.mxu0 %v33364_v12  ;;  %30465 = vmatpush3.msra.mxu1 %v33369_v31  ;;  %v33422_v37 = vand.u32 4294901760, %v6412_v4 }
 0x118   :  { %30436 = vmatprep.mubr.msk.f32.mxu0 %vm32634_vm2, %v36106_v43  ;;  %30439 = vmatprep.subr.mxu0 %v36106_v43 }
 0x119   :  { %30466 = vmatprep.mubr.msk.f32.mxu1 %vm32634_vm2, %v36106_v43  ;;  %30469 = vmatprep.subr.mxu1 %v36106_v43  ;;  %36110 = vst [vmem:[#allocation19_spill] sm:$0xff] %v33422_v37 }
 0x11e   :  { %30437 = vmatmul.mubr.f32.vlgmr.msra.gmra.mrb[12].mxu0 %v33305_v1  ;;  %30467 = vmatmul.mubr.f32.vlgmr.msra.gmra.mrb[12].mxu1 %v33310_v10 }
 0x11f   :  { %30440 = vmatpush3.msra.mxu0 %v33325_v58  ;;  %30470 = vmatpush3.msra.mxu1 %v33331_v16 }
 0x120   :  { %30441 = vmatprep.mubr.msk.f32.mxu0 %vm32634_vm2, %v36106_v43  ;;  %30444 = vmatprep.subr.mxu0 %v36106_v43 }
 0x121   :  { %30471 = vmatprep.mubr.msk.f32.mxu1 %vm32634_vm2, %v36106_v43  ;;  %30474 = vmatprep.subr.mxu1 %v36106_v43 }
 0x126   :  { %30442 = vmatmul.mubr.f32.vlgmr.msra.gmra.mrb[12].mxu0 %v33322_v52  ;;  %30472 = vmatmul.mubr.f32.vlgmr.msra.gmra.mrb[12].mxu1 %v33328_v28  ;;  %v6861_v52 = vsel %vm78_vm1, %v29_v35, 0  ;;  %v6864_v28 = vsel %vm82_vm0, %v61_v50, 0 }
 0x127   :  { %30445 = vmatpush3.msra.mxu0 %v33308_v2  ;;  %30475 = vmatpush3.msra.mxu1 %v33315_v23  ;;  %v33424_v16 = vand.u32 4294901760, %v6861_v52  ;;  %v33429_v20 = vand.u32 4294901760, %v6864_v28 }
 0x128   :  { %30446 = vmatprep.mubr.msk.f32.mxu0 %vm32634_vm2, %v36106_v43  ;;  %30449 = vmatprep.subr.mxu0 %v36106_v43 }
 0x129   :  { %30476 = vmatprep.mubr.msk.f32.mxu1 %vm32634_vm2, %v36106_v43  ;;  %30479 = vmatprep.subr.mxu1 %v36106_v43  ;;  %36111 = vst [vmem:[#allocation20_spill] sm:$0xff] %v33429_v20  ;;  %v33442_v22 = vsub.f32 %v6861_v52, %v33424_v16  ;;  %v33445_v35 = vsub.f32 %v6864_v28, %v33429_v20 }
 0x12b   :  { %36113 = vst [vmem:[#allocation22_spill] sm:$0xff] %v33445_v35  ;;  %v6934_v52 = vand.u32 4294901760, %v33442_v22 }
 0x12e   :  { %30447 = vmatmul.mubr.f32.vlgmr.msra.gmra.mrb[12].mxu0 %v5578_v0  ;;  %30477 = vmatmul.mubr.f32.vlgmr.msra.gmra.mrb[12].mxu1 %v6030_v39  ;;  %v33436_v0 = vsub.f32 %v6409_v59, %v33419_v33  ;;  %v33439_v39 = vsub.f32 %v6412_v4, %v33422_v37 }
 0x12f   :  { %30450 = vmatpush3.msra.mxu0 %v33342_v61  ;;  %30480 = vmatpush3.msra.mxu1 %v33349_v55 }
 0x130   :  { %30451 = vmatprep.mubr.msk.f32.mxu0 %vm32634_vm2, %v36106_v43  ;;  %30454 = vmatprep.subr.mxu0 %v36106_v43  ;;  %36112 = vst [vmem:[#allocation21_spill] sm:$0xff] %v33439_v39  ;;  %v6482_v58 = vand.u32 4294901760, %v33436_v0  ;;  %v33456_v4 = vand.u32 4294901760, %v33439_v39 }
 0x131   :  { %30481 = vmatprep.mubr.msk.f32.mxu1 %vm32634_vm2, %v36106_v43  ;;  %30484 = vmatprep.subr.mxu1 %v36106_v43 }
 0x132   :  { %36116 = vst [vmem:[#allocation25_spill] sm:$0xff] %v33456_v4  ;;  %v6483_v28 = vsub.f32 %v33436_v0, %v6482_v58 }
 0x134   :  { %v6484_v31 = vand.u32 4294901760, %v6483_v28 }
 0x135   :  { %v33447_v50 = vpop.f32.mrb[2].mxu0  ;;  %v33449_v55 = vpop.f32.mrb[2].mxu1 }
 0x136   :  { %36114 = vst [vmem:[#allocation23_spill] sm:$0xff] %v33447_v50  ;;  %36115 = vst [vmem:[#allocation24_spill] sm:$0xff] %v33449_v55  ;;  %v30158_v61 = vpop.f32.mrb[3].mxu0  ;;  %30452 = vmatmul.mubr.f32.vlgmr.msra.gmra.mrb[12].mxu0 %v33305_v1  ;;  %v30188_v59 = vpop.f32.mrb[3].mxu1  ;;  %30482 = vmatmul.mubr.f32.vlgmr.msra.gmra.mrb[12].mxu1 %v33310_v10  ;;  %v6935_v55 = vsub.f32 %v33442_v22, %v6934_v52 }
 0x137   :  { %30455 = vmatpush3.msra.mxu0 %v33308_v2  ;;  %30485 = vmatpush3.msra.mxu1 %v33315_v23  ;;  %v33463_v61 = vand.u32 4294901760, %v33445_v35  ;;  %v6494_v59 = vsub.f32 %v33439_v39, %v33456_v4 }
 0x138   :  { %30456 = vmatprep.mubr.msk.f32.mxu0 %vm32634_vm2, %v36106_v43  ;;  %30486 = vmatprep.mubr.msk.f32.mxu1 %vm32634_vm2, %v36106_v43  ;;  %v6936_v23 = vand.u32 4294901760, %v6935_v55 }
 0x139   :  { %36117 = vst [vmem:[#allocation26_spill] sm:$0xff] %v33463_v61  ;;  %30489 = vmatprep.subr.mxu0 %v36106_v43  ;;  %30519 = vmatprep.subr.mxu1 %v36106_v43  ;;  %v6946_v50 = vsub.f32 %v33445_v35, %v33463_v61  ;;  %v33478_v12 = vand.u32 4294901760, %v6494_v59 }
 0x13b   :  { %36118 = vst [vmem:[#allocation27_spill] sm:$0xff] %v33478_v12  ;;  %v33483_v2 = vand.u32 4294901760, %v6946_v50 }
 0x13d   :  { %36119 = vst [vmem:[#allocation28_spill] sm:$0xff] %v33483_v2 }
 0x13e   :  { %30457 = vmatmul.mubr.f32.vlgmr.msra.gmra.mrb[12].mxu0 %v33305_v1  ;;  %30487 = vmatmul.mubr.f32.vlgmr.msra.gmra.mrb[12].mxu1 %v33310_v10  ;;  %v62_v1 = vld [vmem:[%s35968_s2 + $0x40] sm:$0xf] }
 0x13f   :  { %30490 = vmatpush3.msra.mxu0 %v33422_v37  ;;  %30520 = vmatpush3.msra.mxu1 %v33429_v20  ;;  %v31_v10 = vld [vmem:[%s35969_s0 + $0x22] sm:$0x3] }
 0x140   :  { %30491 = vmatprep.mubr.msk.f32.mxu0 %vm32634_vm2, %v36106_v43  ;;  %30494 = vmatprep.subr.mxu0 %v36106_v43 }
 0x141   :  { %30521 = vmatprep.mubr.msk.f32.mxu1 %vm32634_vm2, %v36106_v43  ;;  %30524 = vmatprep.subr.mxu1 %v36106_v43 }
 0x142   :  { %30492 = vmatmul.mubr.f32.vlgmr.msra.gmra.mrb[14].mxu0 %v6484_v31  ;;  %30522 = vmatmul.mubr.f32.vlgmr.msra.gmra.mrb[14].mxu1 %v6936_v23  ;;  %v30_v31 = vld [vmem:[%s35969_s0 + $0x20] sm:$0x3]  ;;  %v63_v23 = vld [vmem:[%s35968_s2 + $0x44] sm:$0xf] }
 0x143   :  { %30495 = vmatpush3.msra.mxu0 %v33478_v12  ;;  %30525 = vmatpush3.msra.mxu1 %v33483_v2  ;;  %v7313_v55 = vsel %vm78_vm1, %v30_v31, 0  ;;  %v7768_v50 = vsel %vm82_vm0, %v63_v23, 0 }
 0x144   :  { %30496 = vmatprep.mubr.msk.f32.mxu0 %vm32634_vm2, %v36106_v43  ;;  %30499 = vmatprep.subr.mxu0 %v36106_v43  ;;  %v33533_v28 = vand.u32 4294901760, %v7313_v55  ;;  %v33543_v31 = vand.u32 4294901760, %v7768_v50 }
 0x145   :  { %30526 = vmatprep.mubr.msk.f32.mxu1 %vm32634_vm2, %v36106_v43  ;;  %30529 = vmatprep.subr.mxu1 %v36106_v43 }
 0x146   :  { %36121 = vst [vmem:[#allocation30_spill] sm:$0xff] %v33543_v31 }
 0x14a   :  { %30497 = vmatmul.mubr.f32.vlgmr.msra.gmra.mrb[14].mxu0 %v33419_v33  ;;  %30527 = vmatmul.mubr.f32.vlgmr.msra.gmra.mrb[14].mxu1 %v33424_v16 }
 0x14b   :  { %30500 = vmatpush3.msra.mxu0 %v33439_v39  ;;  %30530 = vmatpush3.msra.mxu1 %v33445_v35 }
 0x14c   :  { %30501 = vmatprep.mubr.msk.f32.mxu0 %vm32634_vm2, %v36106_v43  ;;  %30504 = vmatprep.subr.mxu0 %v36106_v43 }
 0x14d   :  { %30531 = vmatprep.mubr.msk.f32.mxu1 %vm32634_vm2, %v36106_v43  ;;  %30534 = vmatprep.subr.mxu1 %v36106_v43 }
 0x152   :  { %30502 = vmatmul.mubr.f32.vlgmr.msra.gmra.mrb[14].mxu0 %v33436_v0  ;;  %30532 = vmatmul.mubr.f32.vlgmr.msra.gmra.mrb[14].mxu1 %v33442_v22  ;;  %v7316_v0 = vsel %vm82_vm0, %v62_v1, 0  ;;  %v7765_v22 = vsel %vm78_vm1, %v31_v10, 0  ;;  %v33559_v10 = vsub.f32 %v7768_v50, %v33543_v31 }
 0x153   :  { %30505 = vmatpush3.msra.mxu0 %v33422_v37  ;;  %30535 = vmatpush3.msra.mxu1 %v33429_v20  ;;  %v33536_v59 = vand.u32 4294901760, %v7316_v0  ;;  %v33538_v35 = vand.u32 4294901760, %v7765_v22 }
 0x154   :  { %30506 = vmatprep.mubr.msk.f32.mxu0 %vm32634_vm2, %v36106_v43  ;;  %30509 = vmatprep.subr.mxu0 %v36106_v43  ;;  %36123 = vst [vmem:[#allocation32_spill] sm:$0xff] %v33559_v10 }
 0x155   :  { %30536 = vmatprep.mubr.msk.f32.mxu1 %vm32634_vm2, %v36106_v43  ;;  %30539 = vmatprep.subr.mxu1 %v36106_v43  ;;  %36120 = vst [vmem:[#allocation29_spill] sm:$0xff] %v33536_v59  ;;  %v33556_v1 = vsub.f32 %v7765_v22, %v33538_v35 }
 0x157   :  { %v7838_v22 = vand.u32 4294901760, %v33556_v1 }
 0x15a   :  { %30507 = vmatmul.mubr.f32.vlgmr.msra.gmra.mrb[14].mxu0 %v6482_v58  ;;  %30537 = vmatmul.mubr.f32.vlgmr.msra.gmra.mrb[14].mxu1 %v6934_v52  ;;  %v33550_v58 = vsub.f32 %v7313_v55, %v33533_v28  ;;  %v33553_v52 = vsub.f32 %v7316_v0, %v33536_v59 }
 0x15b   :  { %30510 = vmatpush3.msra.mxu0 %v33456_v4  ;;  %30540 = vmatpush3.msra.mxu1 %v33463_v61 }
 0x15c   :  { %30511 = vmatprep.mubr.msk.f32.mxu0 %vm32634_vm2, %v36106_v43  ;;  %30514 = vmatprep.subr.mxu0 %v36106_v43  ;;  %36122 = vst [vmem:[#allocation31_spill] sm:$0xff] %v33553_v52  ;;  %v7386_v39 = vand.u32 4294901760, %v33550_v58  ;;  %v33570_v0 = vand.u32 4294901760, %v33553_v52 }
 0x15d   :  { %30541 = vmatprep.mubr.msk.f32.mxu1 %vm32634_vm2, %v36106_v43  ;;  %30544 = vmatprep.subr.mxu1 %v36106_v43 }
 0x15e   :  { %36126 = vst [vmem:[#allocation35_spill] sm:$0xff] %v33570_v0  ;;  %v7387_v50 = vsub.f32 %v33550_v58, %v7386_v39 }
 0x160   :  { %v7388_v2 = vand.u32 4294901760, %v7387_v50 }
 0x161   :  { %v33561_v23 = vpop.f32.mrb[4].mxu0  ;;  %v33563_v61 = vpop.f32.mrb[4].mxu1 }
 0x162   :  { %36124 = vst [vmem:[#allocation33_spill] sm:$0xff] %v33561_v23  ;;  %36125 = vst [vmem:[#allocation34_spill] sm:$0xff] %v33563_v61  ;;  %v30218_v4 = vpop.f32.mrb[5].mxu0  ;;  %30512 = vmatmul.mubr.f32.vlgmr.msra.gmra.mrb[14].mxu0 %v33419_v33  ;;  %v30248_v55 = vpop.f32.mrb[5].mxu1  ;;  %30542 = vmatmul.mubr.f32.vlgmr.msra.gmra.mrb[14].mxu1 %v33424_v16  ;;  %v7839_v61 = vsub.f32 %v33556_v1, %v7838_v22 }
 0x163   :  { %30515 = vmatpush3.msra.mxu0 %v33422_v37  ;;  %30545 = vmatpush3.msra.mxu1 %v33429_v20  ;;  %v33577_v4 = vand.u32 4294901760, %v33559_v10  ;;  %v7398_v55 = vsub.f32 %v33553_v52, %v33570_v0 }
 0x164   :  { %30516 = vmatprep.mubr.msk.f32.mxu0 %vm32634_vm2, %v36106_v43  ;;  %30546 = vmatprep.mubr.msk.f32.mxu1 %vm32634_vm2, %v36106_v43  ;;  %v7840_v20 = vand.u32 4294901760, %v7839_v61 }
 0x165   :  { %36127 = vst [vmem:[#allocation36_spill] sm:$0xff] %v33577_v4  ;;  %30549 = vmatprep.subr.mxu0 %v36106_v43  ;;  %30579 = vmatprep.subr.mxu1 %v36106_v43  ;;  %v7850_v23 = vsub.f32 %v33559_v10, %v33577_v4  ;;  %v33592_v12 = vand.u32 4294901760, %v7398_v55 }
 0x167   :  { %36128 = vst [vmem:[#allocation37_spill] sm:$0xff] %v33592_v12  ;;  %v33597_v37 = vand.u32 4294901760, %v7850_v23 }
 0x169   :  { %36129 = vst [vmem:[#allocation38_spill] sm:$0xff] %v33597_v37 }
 0x16a   :  { %30517 = vmatmul.mubr.f32.vlgmr.msra.gmra.mrb[14].mxu0 %v33419_v33  ;;  %30547 = vmatmul.mubr.f32.vlgmr.msra.gmra.mrb[14].mxu1 %v33424_v16  ;;  %v64_v16 = vld [vmem:[%s35968_s2 + $0x48] sm:$0xf]  ;;  %v33_v33 = vld [vmem:[%s35969_s0 + $0x26] sm:$0x3] }
 0x16b   :  { %30550 = vmatpush3.msra.mxu0 %v33536_v59  ;;  %30580 = vmatpush3.msra.mxu1 %v33543_v31 }
 0x16c   :  { %30551 = vmatprep.mubr.msk.f32.mxu0 %vm32634_vm2, %v36106_v43  ;;  %30554 = vmatprep.subr.mxu0 %v36106_v43 }
 0x16d   :  { %30581 = vmatprep.mubr.msk.f32.mxu1 %vm32634_vm2, %v36106_v43  ;;  %30584 = vmatprep.subr.mxu1 %v36106_v43 }
 0x16e   :  { %30552 = vmatmul.mubr.f32.vlgmr.msra.gmra.mrb[16].mxu0 %v7388_v2  ;;  %30582 = vmatmul.mubr.f32.vlgmr.msra.gmra.mrb[16].mxu1 %v7840_v20  ;;  %v32_v2 = vld [vmem:[%s35969_s0 + $0x24] sm:$0x3]  ;;  %v65_v20 = vld [vmem:[%s35968_s2 + $0x4c] sm:$0xf] }
 0x16f   :  { %30555 = vmatpush3.msra.mxu0 %v33592_v12  ;;  %30585 = vmatpush3.msra.mxu1 %v33597_v37  ;;  %v8217_v61 = vsel %vm78_vm1, %v32_v2, 0  ;;  %v8672_v23 = vsel %vm82_vm0, %v65_v20, 0 }
 0x170   :  { %30556 = vmatprep.mubr.msk.f32.mxu0 %vm32634_vm2, %v36106_v43  ;;  %30559 = vmatprep.subr.mxu0 %v36106_v43  ;;  %v33647_v50 = vand.u32 4294901760, %v8217_v61  ;;  %v33657_v2 = vand.u32 4294901760, %v8672_v23 }
 0x171   :  { %30586 = vmatprep.mubr.msk.f32.mxu1 %vm32634_vm2, %v36106_v43  ;;  %30589 = vmatprep.subr.mxu1 %v36106_v43 }
 0x172   :  { %36131 = vst [vmem:[#allocation40_spill] sm:$0xff] %v33657_v2 }
 0x176   :  { %30557 = vmatmul.mubr.f32.vlgmr.msra.gmra.mrb[16].mxu0 %v33533_v28  ;;  %30587 = vmatmul.mubr.f32.vlgmr.msra.gmra.mrb[16].mxu1 %v33538_v35 }
 0x177   :  { %30560 = vmatpush3.msra.mxu0 %v33553_v52  ;;  %30590 = vmatpush3.msra.mxu1 %v33559_v10 }
 0x178   :  { %30561 = vmatprep.mubr.msk.f32.mxu0 %vm32634_vm2, %v36106_v43  ;;  %30564 = vmatprep.subr.mxu0 %v36106_v43 }
 0x179   :  { %30591 = vmatprep.mubr.msk.f32.mxu1 %vm32634_vm2, %v36106_v43  ;;  %30594 = vmatprep.subr.mxu1 %v36106_v43 }
 0x17e   :  { %30562 = vmatmul.mubr.f32.vlgmr.msra.gmra.mrb[16].mxu0 %v33550_v58  ;;  %30592 = vmatmul.mubr.f32.vlgmr.msra.gmra.mrb[16].mxu1 %v33556_v1  ;;  %v8220_v58 = vsel %vm82_vm0, %v64_v16, 0  ;;  %v8669_v1 = vsel %vm78_vm1, %v33_v33, 0  ;;  %v33673_v33 = vsub.f32 %v8672_v23, %v33657_v2 }
 0x17f   :  { %30565 = vmatpush3.msra.mxu0 %v33536_v59  ;;  %30595 = vmatpush3.msra.mxu1 %v33543_v31  ;;  %v33650_v55 = vand.u32 4294901760, %v8220_v58  ;;  %v33652_v10 = vand.u32 4294901760, %v8669_v1 }
 0x180   :  { %30566 = vmatprep.mubr.msk.f32.mxu0 %vm32634_vm2, %v36106_v43  ;;  %30569 = vmatprep.subr.mxu0 %v36106_v43  ;;  %36133 = vst [vmem:[#allocation42_spill] sm:$0xff] %v33673_v33 }
 0x181   :  { %30596 = vmatprep.mubr.msk.f32.mxu1 %vm32634_vm2, %v36106_v43  ;;  %30599 = vmatprep.subr.mxu1 %v36106_v43  ;;  %36130 = vst [vmem:[#allocation39_spill] sm:$0xff] %v33650_v55  ;;  %v33670_v16 = vsub.f32 %v8669_v1, %v33652_v10 }
 0x183   :  { %v8742_v1 = vand.u32 4294901760, %v33670_v16 }
 0x186   :  { %30567 = vmatmul.mubr.f32.vlgmr.msra.gmra.mrb[16].mxu0 %v7386_v39  ;;  %30597 = vmatmul.mubr.f32.vlgmr.msra.gmra.mrb[16].mxu1 %v7838_v22  ;;  %v33664_v39 = vsub.f32 %v8217_v61, %v33647_v50  ;;  %v33667_v22 = vsub.f32 %v8220_v58, %v33650_v55 }
 0x187   :  { %30570 = vmatpush3.msra.mxu0 %v33570_v0  ;;  %30600 = vmatpush3.msra.mxu1 %v33577_v4 }
 0x188   :  { %30571 = vmatprep.mubr.msk.f32.mxu0 %vm32634_vm2, %v36106_v43  ;;  %30574 = vmatprep.subr.mxu0 %v36106_v43  ;;  %36132 = vst [vmem:[#allocation41_spill] sm:$0xff] %v33667_v22  ;;  %v8290_v52 = vand.u32 4294901760, %v33664_v39  ;;  %v33684_v58 = vand.u32 4294901760, %v33667_v22 }
 0x189   :  { %30601 = vmatprep.mubr.msk.f32.mxu1 %vm32634_vm2, %v36106_v43  ;;  %30604 = vmatprep.subr.mxu1 %v36106_v43 }
 0x18a   :  { %36136 = vst [vmem:[#allocation45_spill] sm:$0xff] %v33684_v58  ;;  %v8291_v23 = vsub.f32 %v33664_v39, %v8290_v52 }
 0x18c   :  { %v8292_v37 = vand.u32 4294901760, %v8291_v23 }
 0x18d   :  { %v33675_v20 = vpop.f32.mrb[6].mxu0  ;;  %v33677_v4 = vpop.f32.mrb[6].mxu1 }
 0x18e   :  { %36134 = vst [vmem:[#allocation43_spill] sm:$0xff] %v33675_v20  ;;  %36135 = vst [vmem:[#allocation44_spill] sm:$0xff] %v33677_v4  ;;  %v30278_v0 = vpop.f32.mrb[7].mxu0  ;;  %30572 = vmatmul.mubr.f32.vlgmr.msra.gmra.mrb[16].mxu0 %v33533_v28  ;;  %v30308_v61 = vpop.f32.mrb[7].mxu1  ;;  %30602 = vmatmul.mubr.f32.vlgmr.msra.gmra.mrb[16].mxu1 %v33538_v35  ;;  %v8743_v4 = vsub.f32 %v33670_v16, %v8742_v1 }
 0x18f   :  { %30575 = vmatpush3.msra.mxu0 %v33536_v59  ;;  %30605 = vmatpush3.msra.mxu1 %v33543_v31  ;;  %v33691_v0 = vand.u32 4294901760, %v33673_v33  ;;  %v8302_v61 = vsub.f32 %v33667_v22, %v33684_v58 }
 0x190   :  { %30576 = vmatprep.mubr.msk.f32.mxu0 %vm32634_vm2, %v36106_v43  ;;  %30606 = vmatprep.mubr.msk.f32.mxu1 %vm32634_vm2, %v36106_v43  ;;  %v8744_v31 = vand.u32 4294901760, %v8743_v4 }
 0x191   :  { %36137 = vst [vmem:[#allocation46_spill] sm:$0xff] %v33691_v0  ;;  %30609 = vmatprep.subr.mxu0 %v36106_v43  ;;  %30639 = vmatprep.subr.mxu1 %v36106_v43  ;;  %v8754_v20 = vsub.f32 %v33673_v33, %v33691_v0  ;;  %v33706_v12 = vand.u32 4294901760, %v8302_v61 }
 0x193   :  { %36138 = vst [vmem:[#allocation47_spill] sm:$0xff] %v33706_v12  ;;  %v33711_v59 = vand.u32 4294901760, %v8754_v20 }
 0x195   :  { %36139 = vst [vmem:[#allocation48_spill] sm:$0xff] %v33711_v59 }
 0x196   :  { %30577 = vmatmul.mubr.f32.vlgmr.msra.gmra.mrb[16].mxu0 %v33533_v28  ;;  %30607 = vmatmul.mubr.f32.vlgmr.msra.gmra.mrb[16].mxu1 %v33538_v35  ;;  %v66_v35 = vld [vmem:[%s35968_s2 + $0x50] sm:$0xf]  ;;  %v35_v28 = vld [vmem:[%s35969_s0 + $0x2a] sm:$0x3] }
 0x197   :  { %30610 = vmatpush3.msra.mxu0 %v33650_v55  ;;  %30640 = vmatpush3.msra.mxu1 %v33657_v2 }
 0x198   :  { %30611 = vmatprep.mubr.msk.f32.mxu0 %vm32634_vm2, %v36106_v43  ;;  %30614 = vmatprep.subr.mxu0 %v36106_v43 }
 0x199   :  { %30641 = vmatprep.mubr.msk.f32.mxu1 %vm32634_vm2, %v36106_v43  ;;  %30644 = vmatprep.subr.mxu1 %v36106_v43 }
 0x19a   :  { %30612 = vmatmul.mubr.f32.vlgmr.msra.gmra.mrb[18].mxu0 %v8292_v37  ;;  %30642 = vmatmul.mubr.f32.vlgmr.msra.gmra.mrb[18].mxu1 %v8744_v31  ;;  %v34_v37 = vld [vmem:[%s35969_s0 + $0x28] sm:$0x3]  ;;  %v67_v31 = vld [vmem:[%s35968_s2 + $0x54] sm:$0xf] }
 0x19b   :  { %30615 = vmatpush3.msra.mxu0 %v33706_v12  ;;  %30645 = vmatpush3.msra.mxu1 %v33711_v59  ;;  %v9121_v4 = vsel %vm78_vm1, %v34_v37, 0  ;;  %v9576_v20 = vsel %vm82_vm0, %v67_v31, 0 }
 0x19c   :  { %30616 = vmatprep.mubr.msk.f32.mxu0 %vm32634_vm2, %v36106_v43  ;;  %30619 = vmatprep.subr.mxu0 %v36106_v43  ;;  %v33761_v23 = vand.u32 4294901760, %v9121_v4  ;;  %v33771_v37 = vand.u32 4294901760, %v9576_v20 }
 0x19d   :  { %30646 = vmatprep.mubr.msk.f32.mxu1 %vm32634_vm2, %v36106_v43  ;;  %30649 = vmatprep.subr.mxu1 %v36106_v43 }
 0x19e   :  { %36141 = vst [vmem:[#allocation50_spill] sm:$0xff] %v33771_v37 }
 0x1a2   :  { %30617 = vmatmul.mubr.f32.vlgmr.msra.gmra.mrb[18].mxu0 %v33647_v50  ;;  %30647 = vmatmul.mubr.f32.vlgmr.msra.gmra.mrb[18].mxu1 %v33652_v10 }
 0x1a3   :  { %30620 = vmatpush3.msra.mxu0 %v33667_v22  ;;  %30650 = vmatpush3.msra.mxu1 %v33673_v33 }
 0x1a4   :  { %30621 = vmatprep.mubr.msk.f32.mxu0 %vm32634_vm2, %v36106_v43  ;;  %30624 = vmatprep.subr.mxu0 %v36106_v43 }
 0x1a5   :  { %30651 = vmatprep.mubr.msk.f32.mxu1 %vm32634_vm2, %v36106_v43  ;;  %30654 = vmatprep.subr.mxu1 %v36106_v43 }
 0x1aa   :  { %30622 = vmatmul.mubr.f32.vlgmr.msra.gmra.mrb[18].mxu0 %v33664_v39  ;;  %30652 = vmatmul.mubr.f32.vlgmr.msra.gmra.mrb[18].mxu1 %v33670_v16  ;;  %v9124_v39 = vsel %vm82_vm0, %v66_v35, 0  ;;  %v9573_v16 = vsel %vm78_vm1, %v35_v28, 0  ;;  %v33787_v28 = vsub.f32 %v9576_v20, %v33771_v37 }
 0x1ab   :  { %30625 = vmatpush3.msra.mxu0 %v33650_v55  ;;  %30655 = vmatpush3.msra.mxu1 %v33657_v2  ;;  %v33764_v61 = vand.u32 4294901760, %v9124_v39  ;;  %v33766_v33 = vand.u32 4294901760, %v9573_v16 }
 0x1ac   :  { %30626 = vmatprep.mubr.msk.f32.mxu0 %vm32634_vm2, %v36106_v43  ;;  %30629 = vmatprep.subr.mxu0 %v36106_v43  ;;  %36143 = vst [vmem:[#allocation52_spill] sm:$0xff] %v33787_v28 }
 0x1ad   :  { %30656 = vmatprep.mubr.msk.f32.mxu1 %vm32634_vm2, %v36106_v43  ;;  %30659 = vmatprep.subr.mxu1 %v36106_v43  ;;  %36140 = vst [vmem:[#allocation49_spill] sm:$0xff] %v33764_v61  ;;  %v33784_v35 = vsub.f32 %v9573_v16, %v33766_v33 }
 0x1af   :  { %v9646_v16 = vand.u32 4294901760, %v33784_v35 }
 0x1b2   :  { %30627 = vmatmul.mubr.f32.vlgmr.msra.gmra.mrb[18].mxu0 %v8290_v52  ;;  %30657 = vmatmul.mubr.f32.vlgmr.msra.gmra.mrb[18].mxu1 %v8742_v1  ;;  %v33778_v52 = vsub.f32 %v9121_v4, %v33761_v23  ;;  %v33781_v1 = vsub.f32 %v9124_v39, %v33764_v61 }
 0x1b3   :  { %30630 = vmatpush3.msra.mxu0 %v33684_v58  ;;  %30660 = vmatpush3.msra.mxu1 %v33691_v0 }
 0x1b4   :  { %30631 = vmatprep.mubr.msk.f32.mxu0 %vm32634_vm2, %v36106_v43  ;;  %30634 = vmatprep.subr.mxu0 %v36106_v43  ;;  %36142 = vst [vmem:[#allocation51_spill] sm:$0xff] %v33781_v1  ;;  %v9194_v22 = vand.u32 4294901760, %v33778_v52  ;;  %v33798_v39 = vand.u32 4294901760, %v33781_v1 }
 0x1b5   :  { %30661 = vmatprep.mubr.msk.f32.mxu1 %vm32634_vm2, %v36106_v43  ;;  %30664 = vmatprep.subr.mxu1 %v36106_v43 }
 0x1b6   :  { %36146 = vst [vmem:[#allocation55_spill] sm:$0xff] %v33798_v39  ;;  %v9195_v20 = vsub.f32 %v33778_v52, %v9194_v22 }
 0x1b8   :  { %v9196_v59 = vand.u32 4294901760, %v9195_v20 }
 0x1b9   :  { %v33789_v31 = vpop.f32.mrb[8].mxu0  ;;  %v33791_v0 = vpop.f32.mrb[8].mxu1 }
 0x1ba   :  { %36144 = vst [vmem:[#allocation53_spill] sm:$0xff] %v33789_v31  ;;  %36145 = vst [vmem:[#allocation54_spill] sm:$0xff] %v33791_v0  ;;  %v30338_v58 = vpop.f32.mrb[9].mxu0  ;;  %30632 = vmatmul.mubr.f32.vlgmr.msra.gmra.mrb[18].mxu0 %v33647_v50  ;;  %v30368_v4 = vpop.f32.mrb[9].mxu1  ;;  %30662 = vmatmul.mubr.f32.vlgmr.msra.gmra.mrb[18].mxu1 %v33652_v10  ;;  %v9647_v0 = vsub.f32 %v33784_v35, %v9646_v16 }
 0x1bb   :  { %30635 = vmatpush3.msra.mxu0 %v33650_v55  ;;  %30665 = vmatpush3.msra.mxu1 %v33657_v2  ;;  %v33805_v58 = vand.u32 4294901760, %v33787_v28  ;;  %v9206_v4 = vsub.f32 %v33781_v1, %v33798_v39 }
 0x1bc   :  { %30636 = vmatprep.mubr.msk.f32.mxu0 %vm32634_vm2, %v36106_v43  ;;  %30666 = vmatprep.mubr.msk.f32.mxu1 %vm32634_vm2, %v36106_v43  ;;  %v9648_v2 = vand.u32 4294901760, %v9647_v0 }
 0x1bd   :  { %36147 = vst [vmem:[#allocation56_spill] sm:$0xff] %v33805_v58  ;;  %30669 = vmatprep.subr.mxu0 %v36106_v43  ;;  %30699 = vmatprep.subr.mxu1 %v36106_v43  ;;  %v9658_v31 = vsub.f32 %v33787_v28, %v33805_v58  ;;  %v33820_v12 = vand.u32 4294901760, %v9206_v4 }
 0x1bf   :  { %36148 = vst [vmem:[#allocation57_spill] sm:$0xff] %v33820_v12  ;;  %v33825_v55 = vand.u32 4294901760, %v9658_v31 }
 0x1c1   :  { %36149 = vst [vmem:[#allocation58_spill] sm:$0xff] %v33825_v55 }
 0x1c2   :  { %30637 = vmatmul.mubr.f32.vlgmr.msra.gmra.mrb[18].mxu0 %v33647_v50  ;;  %30667 = vmatmul.mubr.f32.vlgmr.msra.gmra.mrb[18].mxu1 %v33652_v10  ;;  %v68_v10 = vld [vmem:[%s35968_s2 + $0x58] sm:$0xf]  ;;  %v37_v50 = vld [vmem:[%s35969_s0 + $0x2e] sm:$0x3] }
 0x1c3   :  { %30670 = vmatpush3.msra.mxu0 %v33764_v61  ;;  %30700 = vmatpush3.msra.mxu1 %v33771_v37 }
 0x1c4   :  { %30671 = vmatprep.mubr.msk.f32.mxu0 %vm32634_vm2, %v36106_v43  ;;  %30674 = vmatprep.subr.mxu0 %v36106_v43 }
 0x1c5   :  { %30701 = vmatprep.mubr.msk.f32.mxu1 %vm32634_vm2, %v36106_v43  ;;  %30704 = vmatprep.subr.mxu1 %v36106_v43 }
 0x1c6   :  { %30672 = vmatmul.mubr.f32.vlgmr.msra.gmra.mrb[20].mxu0 %v9196_v59  ;;  %30702 = vmatmul.mubr.f32.vlgmr.msra.gmra.mrb[20].mxu1 %v9648_v2  ;;  %v36_v59 = vld [vmem:[%s35969_s0 + $0x2c] sm:$0x3]  ;;  %v69_v2 = vld [vmem:[%s35968_s2 + $0x5c] sm:$0xf] }
 0x1c7   :  { %30675 = vmatpush3.msra.mxu0 %v33820_v12  ;;  %30705 = vmatpush3.msra.mxu1 %v33825_v55  ;;  %v10025_v0 = vsel %vm78_vm1, %v36_v59, 0  ;;  %v10480_v31 = vsel %vm82_vm0, %v69_v2, 0 }
 0x1c8   :  { %30676 = vmatprep.mubr.msk.f32.mxu0 %vm32634_vm2, %v36106_v43  ;;  %30679 = vmatprep.subr.mxu0 %v36106_v43  ;;  %v33875_v20 = vand.u32 4294901760, %v10025_v0  ;;  %v33885_v59 = vand.u32 4294901760, %v10480_v31 }
 0x1c9   :  { %30706 = vmatprep.mubr.msk.f32.mxu1 %vm32634_vm2, %v36106_v43  ;;  %30709 = vmatprep.subr.mxu1 %v36106_v43 }
 0x1ca   :  { %36151 = vst [vmem:[#allocation60_spill] sm:$0xff] %v33885_v59 }
 0x1ce   :  { %30677 = vmatmul.mubr.f32.vlgmr.msra.gmra.mrb[20].mxu0 %v33761_v23  ;;  %30707 = vmatmul.mubr.f32.vlgmr.msra.gmra.mrb[20].mxu1 %v33766_v33 }
 0x1cf   :  { %30680 = vmatpush3.msra.mxu0 %v33781_v1  ;;  %30710 = vmatpush3.msra.mxu1 %v33787_v28 }
 0x1d0   :  { %30681 = vmatprep.mubr.msk.f32.mxu0 %vm32634_vm2, %v36106_v43  ;;  %30684 = vmatprep.subr.mxu0 %v36106_v43 }
 0x1d1   :  { %30711 = vmatprep.mubr.msk.f32.mxu1 %vm32634_vm2, %v36106_v43  ;;  %30714 = vmatprep.subr.mxu1 %v36106_v43 }
 0x1d6   :  { %30682 = vmatmul.mubr.f32.vlgmr.msra.gmra.mrb[20].mxu0 %v33778_v52  ;;  %30712 = vmatmul.mubr.f32.vlgmr.msra.gmra.mrb[20].mxu1 %v33784_v35  ;;  %v10028_v52 = vsel %vm82_vm0, %v68_v10, 0  ;;  %v10477_v35 = vsel %vm78_vm1, %v37_v50, 0  ;;  %v33901_v50 = vsub.f32 %v10480_v31, %v33885_v59 }
 0x1d7   :  { %30685 = vmatpush3.msra.mxu0 %v33764_v61  ;;  %30715 = vmatpush3.msra.mxu1 %v33771_v37  ;;  %v33878_v4 = vand.u32 4294901760, %v10028_v52  ;;  %v33880_v28 = vand.u32 4294901760, %v10477_v35 }
 0x1d8   :  { %30686 = vmatprep.mubr.msk.f32.mxu0 %vm32634_vm2, %v36106_v43  ;;  %30689 = vmatprep.subr.mxu0 %v36106_v43  ;;  %36153 = vst [vmem:[#allocation62_spill] sm:$0xff] %v33901_v50 }
 0x1d9   :  { %30716 = vmatprep.mubr.msk.f32.mxu1 %vm32634_vm2, %v36106_v43  ;;  %30719 = vmatprep.subr.mxu1 %v36106_v43  ;;  %36150 = vst [vmem:[#allocation59_spill] sm:$0xff] %v33878_v4  ;;  %v33898_v10 = vsub.f32 %v10477_v35, %v33880_v28 }
 0x1db   :  { %v10550_v35 = vand.u32 4294901760, %v33898_v10 }
 0x1de   :  { %30687 = vmatmul.mubr.f32.vlgmr.msra.gmra.mrb[20].mxu0 %v9194_v22  ;;  %30717 = vmatmul.mubr.f32.vlgmr.msra.gmra.mrb[20].mxu1 %v9646_v16  ;;  %v33892_v22 = vsub.f32 %v10025_v0, %v33875_v20  ;;  %v33895_v16 = vsub.f32 %v10028_v52, %v33878_v4 }
 0x1df   :  { %30690 = vmatpush3.msra.mxu0 %v33798_v39  ;;  %30720 = vmatpush3.msra.mxu1 %v33805_v58 }
 0x1e0   :  { %30691 = vmatprep.mubr.msk.f32.mxu0 %vm32634_vm2, %v36106_v43  ;;  %30694 = vmatprep.subr.mxu0 %v36106_v43  ;;  %36152 = vst [vmem:[#allocation61_spill] sm:$0xff] %v33895_v16  ;;  %v10098_v1 = vand.u32 4294901760, %v33892_v22  ;;  %v33912_v52 = vand.u32 4294901760, %v33895_v16 }
 0x1e1   :  { %30721 = vmatprep.mubr.msk.f32.mxu1 %vm32634_vm2, %v36106_v43  ;;  %30724 = vmatprep.subr.mxu1 %v36106_v43 }
 0x1e2   :  { %36156 = vst [vmem:[#allocation65_spill] sm:$0xff] %v33912_v52  ;;  %v10099_v31 = vsub.f32 %v33892_v22, %v10098_v1 }
 0x1e4   :  { %v10100_v55 = vand.u32 4294901760, %v10099_v31 }
 0x1e5   :  { %v33903_v2 = vpop.f32.mrb[10].mxu0  ;;  %v33905_v58 = vpop.f32.mrb[10].mxu1 }
 0x1e6   :  { %36154 = vst [vmem:[#allocation63_spill] sm:$0xff] %v33903_v2  ;;  %36155 = vst [vmem:[#allocation64_spill] sm:$0xff] %v33905_v58  ;;  %v30398_v39 = vpop.f32.mrb[11].mxu0  ;;  %30692 = vmatmul.mubr.f32.vlgmr.msra.gmra.mrb[20].mxu0 %v33761_v23  ;;  %v30428_v0 = vpop.f32.mrb[11].mxu1  ;;  %30722 = vmatmul.mubr.f32.vlgmr.msra.gmra.mrb[20].mxu1 %v33766_v33  ;;  %v10551_v58 = vsub.f32 %v33898_v10, %v10550_v35 }
 0x1e7   :  { %30695 = vmatpush3.msra.mxu0 %v33764_v61  ;;  %30725 = vmatpush3.msra.mxu1 %v33771_v37  ;;  %v33919_v39 = vand.u32 4294901760, %v33901_v50  ;;  %v10110_v0 = vsub.f32 %v33895_v16, %v33912_v52 }
 0x1e8   :  { %30696 = vmatprep.mubr.msk.f32.mxu0 %vm32634_vm2, %v36106_v43  ;;  %30726 = vmatprep.mubr.msk.f32.mxu1 %vm32634_vm2, %v36106_v43  ;;  %v10552_v37 = vand.u32 4294901760, %v10551_v58 }
 0x1e9   :  { %36157 = vst [vmem:[#allocation66_spill] sm:$0xff] %v33919_v39  ;;  %30729 = vmatprep.subr.mxu0 %v36106_v43  ;;  %30759 = vmatprep.subr.mxu1 %v36106_v43  ;;  %v10562_v2 = vsub.f32 %v33901_v50, %v33919_v39  ;;  %v33934_v12 = vand.u32 4294901760, %v10110_v0 }
 0x1eb   :  { %36158 = vst [vmem:[#allocation67_spill] sm:$0xff] %v33934_v12  ;;  %v33939_v61 = vand.u32 4294901760, %v10562_v2 }
 0x1ed   :  { %36159 = vst [vmem:[#allocation68_spill] sm:$0xff] %v33939_v61 }
 0x1ee   :  { %30697 = vmatmul.mubr.f32.vlgmr.msra.gmra.mrb[20].mxu0 %v33761_v23  ;;  %30727 = vmatmul.mubr.f32.vlgmr.msra.gmra.mrb[20].mxu1 %v33766_v33  ;;  %v70_v33 = vld [vmem:[%s35968_s2 + $0x60] sm:$0xf]  ;;  %v39_v23 = vld [vmem:[%s35969_s0 + $0x32] sm:$0x3] }
 0x1ef   :  { %30730 = vmatpush3.msra.mxu0 %v33878_v4  ;;  %30760 = vmatpush3.msra.mxu1 %v33885_v59 }
 0x1f0   :  { %30731 = vmatprep.mubr.msk.f32.mxu0 %vm32634_vm2, %v36106_v43  ;;  %30734 = vmatprep.subr.mxu0 %v36106_v43 }
 0x1f1   :  { %30761 = vmatprep.mubr.msk.f32.mxu1 %vm32634_vm2, %v36106_v43  ;;  %30764 = vmatprep.subr.mxu1 %v36106_v43 }
 0x1f2   :  { %30732 = vmatmul.mubr.f32.vlgmr.msra.gmra.mrb[22].mxu0 %v10100_v55  ;;  %30762 = vmatmul.mubr.f32.vlgmr.msra.gmra.mrb[22].mxu1 %v10552_v37  ;;  %v38_v55 = vld [vmem:[%s35969_s0 + $0x30] sm:$0x3]  ;;  %v71_v37 = vld [vmem:[%s35968_s2 + $0x64] sm:$0xf] }
 0x1f3   :  { %30735 = vmatpush3.msra.mxu0 %v33934_v12  ;;  %30765 = vmatpush3.msra.mxu1 %v33939_v61  ;;  %v10929_v58 = vsel %vm78_vm1, %v38_v55, 0  ;;  %v11384_v2 = vsel %vm82_vm0, %v71_v37, 0 }
 0x1f4   :  { %30736 = vmatprep.mubr.msk.f32.mxu0 %vm32634_vm2, %v36106_v43  ;;  %30739 = vmatprep.subr.mxu0 %v36106_v43  ;;  %v33989_v31 = vand.u32 4294901760, %v10929_v58  ;;  %v33999_v55 = vand.u32 4294901760, %v11384_v2 }
 0x1f5   :  { %30766 = vmatprep.mubr.msk.f32.mxu1 %vm32634_vm2, %v36106_v43  ;;  %30769 = vmatprep.subr.mxu1 %v36106_v43 }
 0x1f6   :  { %36161 = vst [vmem:[#allocation70_spill] sm:$0xff] %v33999_v55 }
 0x1fa   :  { %30737 = vmatmul.mubr.f32.vlgmr.msra.gmra.mrb[22].mxu0 %v33875_v20  ;;  %30767 = vmatmul.mubr.f32.vlgmr.msra.gmra.mrb[22].mxu1 %v33880_v28 }
 0x1fb   :  { %30740 = vmatpush3.msra.mxu0 %v33895_v16  ;;  %30770 = vmatpush3.msra.mxu1 %v33901_v50 }
 0x1fc   :  { %30741 = vmatprep.mubr.msk.f32.mxu0 %vm32634_vm2, %v36106_v43  ;;  %30744 = vmatprep.subr.mxu0 %v36106_v43 }
 0x1fd   :  { %30771 = vmatprep.mubr.msk.f32.mxu1 %vm32634_vm2, %v36106_v43  ;;  %30774 = vmatprep.subr.mxu1 %v36106_v43 }
 0x202   :  { %30742 = vmatmul.mubr.f32.vlgmr.msra.gmra.mrb[22].mxu0 %v33892_v22  ;;  %30772 = vmatmul.mubr.f32.vlgmr.msra.gmra.mrb[22].mxu1 %v33898_v10  ;;  %v10932_v22 = vsel %vm82_vm0, %v70_v33, 0  ;;  %v11381_v10 = vsel %vm78_vm1, %v39_v23, 0  ;;  %v34015_v23 = vsub.f32 %v11384_v2, %v33999_v55 }
 0x203   :  { %30745 = vmatpush3.msra.mxu0 %v33878_v4  ;;  %30775 = vmatpush3.msra.mxu1 %v33885_v59  ;;  %v33992_v0 = vand.u32 4294901760, %v10932_v22  ;;  %v33994_v50 = vand.u32 4294901760, %v11381_v10 }
 0x204   :  { %30746 = vmatprep.mubr.msk.f32.mxu0 %vm32634_vm2, %v36106_v43  ;;  %30749 = vmatprep.subr.mxu0 %v36106_v43  ;;  %36163 = vst [vmem:[#allocation72_spill] sm:$0xff] %v34015_v23 }
 0x205   :  { %30776 = vmatprep.mubr.msk.f32.mxu1 %vm32634_vm2, %v36106_v43  ;;  %30779 = vmatprep.subr.mxu1 %v36106_v43  ;;  %36160 = vst [vmem:[#allocation69_spill] sm:$0xff] %v33992_v0  ;;  %v34012_v33 = vsub.f32 %v11381_v10, %v33994_v50 }
 0x207   :  { %v11454_v10 = vand.u32 4294901760, %v34012_v33 }
 0x20a   :  { %30747 = vmatmul.mubr.f32.vlgmr.msra.gmra.mrb[22].mxu0 %v10098_v1  ;;  %30777 = vmatmul.mubr.f32.vlgmr.msra.gmra.mrb[22].mxu1 %v10550_v35  ;;  %v34006_v1 = vsub.f32 %v10929_v58, %v33989_v31  ;;  %v34009_v35 = vsub.f32 %v10932_v22, %v33992_v0 }
 0x20b   :  { %30750 = vmatpush3.msra.mxu0 %v33912_v52  ;;  %30780 = vmatpush3.msra.mxu1 %v33919_v39 }
 0x20c   :  { %30751 = vmatprep.mubr.msk.f32.mxu0 %vm32634_vm2, %v36106_v43  ;;  %30754 = vmatprep.subr.mxu0 %v36106_v43  ;;  %36162 = vst [vmem:[#allocation71_spill] sm:$0xff] %v34009_v35  ;;  %v11002_v16 = vand.u32 4294901760, %v34006_v1  ;;  %v34026_v22 = vand.u32 4294901760, %v34009_v35 }
 0x20d   :  { %30781 = vmatprep.mubr.msk.f32.mxu1 %vm32634_vm2, %v36106_v43  ;;  %30784 = vmatprep.subr.mxu1 %v36106_v43 }
 0x20e   :  { %36166 = vst [vmem:[#allocation75_spill] sm:$0xff] %v34026_v22  ;;  %v11003_v2 = vsub.f32 %v34006_v1, %v11002_v16 }
 0x210   :  { %v11004_v61 = vand.u32 4294901760, %v11003_v2 }
 0x211   :  { %v34017_v37 = vpop.f32.mrb[12].mxu0  ;;  %v34019_v39 = vpop.f32.mrb[12].mxu1 }
 0x212   :  { %36164 = vst [vmem:[#allocation73_spill] sm:$0xff] %v34017_v37  ;;  %36165 = vst [vmem:[#allocation74_spill] sm:$0xff] %v34019_v39  ;;  %v30458_v52 = vpop.f32.mrb[13].mxu0  ;;  %30752 = vmatmul.mubr.f32.vlgmr.msra.gmra.mrb[22].mxu0 %v33875_v20  ;;  %v30488_v58 = vpop.f32.mrb[13].mxu1  ;;  %30782 = vmatmul.mubr.f32.vlgmr.msra.gmra.mrb[22].mxu1 %v33880_v28  ;;  %v11455_v39 = vsub.f32 %v34012_v33, %v11454_v10 }
 0x213   :  { %30755 = vmatpush3.msra.mxu0 %v33878_v4  ;;  %30785 = vmatpush3.msra.mxu1 %v33885_v59  ;;  %v34033_v52 = vand.u32 4294901760, %v34015_v23  ;;  %v11014_v58 = vsub.f32 %v34009_v35, %v34026_v22 }
 0x214   :  { %30756 = vmatprep.mubr.msk.f32.mxu0 %vm32634_vm2, %v36106_v43  ;;  %30786 = vmatprep.mubr.msk.f32.mxu1 %vm32634_vm2, %v36106_v43  ;;  %v11456_v59 = vand.u32 4294901760, %v11455_v39 }
 0x215   :  { %36167 = vst [vmem:[#allocation76_spill] sm:$0xff] %v34033_v52  ;;  %30789 = vmatprep.subr.mxu0 %v36106_v43  ;;  %30819 = vmatprep.subr.mxu1 %v36106_v43  ;;  %v11466_v37 = vsub.f32 %v34015_v23, %v34033_v52  ;;  %v34048_v12 = vand.u32 4294901760, %v11014_v58 }
 0x217   :  { %36168 = vst [vmem:[#allocation77_spill] sm:$0xff] %v34048_v12  ;;  %v34053_v4 = vand.u32 4294901760, %v11466_v37 }
 0x219   :  { %36169 = vst [vmem:[#allocation78_spill] sm:$0xff] %v34053_v4 }
 0x21a   :  { %30757 = vmatmul.mubr.f32.vlgmr.msra.gmra.mrb[22].mxu0 %v33875_v20  ;;  %30787 = vmatmul.mubr.f32.vlgmr.msra.gmra.mrb[22].mxu1 %v33880_v28  ;;  %v72_v28 = vld [vmem:[%s35968_s2 + $0x68] sm:$0xf]  ;;  %v41_v20 = vld [vmem:[%s35969_s0 + $0x36] sm:$0x3] }
 0x21b   :  { %30790 = vmatpush3.msra.mxu0 %v33992_v0  ;;  %30820 = vmatpush3.msra.mxu1 %v33999_v55 }
 0x21c   :  { %30791 = vmatprep.mubr.msk.f32.mxu0 %vm32634_vm2, %v36106_v43  ;;  %30794 = vmatprep.subr.mxu0 %v36106_v43 }
 0x21d   :  { %30821 = vmatprep.mubr.msk.f32.mxu1 %vm32634_vm2, %v36106_v43  ;;  %30824 = vmatprep.subr.mxu1 %v36106_v43 }
 0x21e   :  { %30792 = vmatmul.mubr.f32.vlgmr.msra.gmra.mrb[24].mxu0 %v11004_v61  ;;  %30822 = vmatmul.mubr.f32.vlgmr.msra.gmra.mrb[24].mxu1 %v11456_v59  ;;  %v40_v61 = vld [vmem:[%s35969_s0 + $0x34] sm:$0x3]  ;;  %v73_v59 = vld [vmem:[%s35968_s2 + $0x6c] sm:$0xf] }
 0x21f   :  { %30795 = vmatpush3.msra.mxu0 %v34048_v12  ;;  %30825 = vmatpush3.msra.mxu1 %v34053_v4  ;;  %v11833_v39 = vsel %vm78_vm1, %v40_v61, 0  ;;  %v12288_v37 = vsel %vm82_vm0, %v73_v59, 0 }
 0x220   :  { %30796 = vmatprep.mubr.msk.f32.mxu0 %vm32634_vm2, %v36106_v43  ;;  %30799 = vmatprep.subr.mxu0 %v36106_v43  ;;  %v34103_v2 = vand.u32 4294901760, %v11833_v39  ;;  %v34113_v61 = vand.u32 4294901760, %v12288_v37 }
 0x221   :  { %30826 = vmatprep.mubr.msk.f32.mxu1 %vm32634_vm2, %v36106_v43  ;;  %30829 = vmatprep.subr.mxu1 %v36106_v43 }
 0x222   :  { %36171 = vst [vmem:[#allocation80_spill] sm:$0xff] %v34113_v61 }
 0x226   :  { %30797 = vmatmul.mubr.f32.vlgmr.msra.gmra.mrb[24].mxu0 %v33989_v31  ;;  %30827 = vmatmul.mubr.f32.vlgmr.msra.gmra.mrb[24].mxu1 %v33994_v50 }
 0x227   :  { %30800 = vmatpush3.msra.mxu0 %v34009_v35  ;;  %30830 = vmatpush3.msra.mxu1 %v34015_v23 }
 0x228   :  { %30801 = vmatprep.mubr.msk.f32.mxu0 %vm32634_vm2, %v36106_v43  ;;  %30804 = vmatprep.subr.mxu0 %v36106_v43 }
 0x229   :  { %30831 = vmatprep.mubr.msk.f32.mxu1 %vm32634_vm2, %v36106_v43  ;;  %30834 = vmatprep.subr.mxu1 %v36106_v43 }
 0x22e   :  { %30802 = vmatmul.mubr.f32.vlgmr.msra.gmra.mrb[24].mxu0 %v34006_v1  ;;  %30832 = vmatmul.mubr.f32.vlgmr.msra.gmra.mrb[24].mxu1 %v34012_v33  ;;  %v11836_v1 = vsel %vm82_vm0, %v72_v28, 0  ;;  %v12285_v33 = vsel %vm78_vm1, %v41_v20, 0  ;;  %v34129_v20 = vsub.f32 %v12288_v37, %v34113_v61 }
 0x22f   :  { %30805 = vmatpush3.msra.mxu0 %v33992_v0  ;;  %30835 = vmatpush3.msra.mxu1 %v33999_v55  ;;  %v34106_v58 = vand.u32 4294901760, %v11836_v1  ;;  %v34108_v23 = vand.u32 4294901760, %v12285_v33 }
 0x230   :  { %30806 = vmatprep.mubr.msk.f32.mxu0 %vm32634_vm2, %v36106_v43  ;;  %30809 = vmatprep.subr.mxu0 %v36106_v43  ;;  %36173 = vst [vmem:[#allocation82_spill] sm:$0xff] %v34129_v20 }
 0x231   :  { %30836 = vmatprep.mubr.msk.f32.mxu1 %vm32634_vm2, %v36106_v43  ;;  %30839 = vmatprep.subr.mxu1 %v36106_v43  ;;  %36170 = vst [vmem:[#allocation79_spill] sm:$0xff] %v34106_v58  ;;  %v34126_v28 = vsub.f32 %v12285_v33, %v34108_v23 }
 0x233   :  { %v12358_v33 = vand.u32 4294901760, %v34126_v28 }
 0x236   :  { %30807 = vmatmul.mubr.f32.vlgmr.msra.gmra.mrb[24].mxu0 %v11002_v16  ;;  %30837 = vmatmul.mubr.f32.vlgmr.msra.gmra.mrb[24].mxu1 %v11454_v10  ;;  %v34120_v16 = vsub.f32 %v11833_v39, %v34103_v2  ;;  %v34123_v10 = vsub.f32 %v11836_v1, %v34106_v58 }
 0x237   :  { %30810 = vmatpush3.msra.mxu0 %v34026_v22  ;;  %30840 = vmatpush3.msra.mxu1 %v34033_v52 }
 0x238   :  { %30811 = vmatprep.mubr.msk.f32.mxu0 %vm32634_vm2, %v36106_v43  ;;  %30814 = vmatprep.subr.mxu0 %v36106_v43  ;;  %36172 = vst [vmem:[#allocation81_spill] sm:$0xff] %v34123_v10  ;;  %v11906_v35 = vand.u32 4294901760, %v34120_v16  ;;  %v34140_v1 = vand.u32 4294901760, %v34123_v10 }
 0x239   :  { %30841 = vmatprep.mubr.msk.f32.mxu1 %vm32634_vm2, %v36106_v43  ;;  %30844 = vmatprep.subr.mxu1 %v36106_v43 }
 0x23a   :  { %36176 = vst [vmem:[#allocation85_spill] sm:$0xff] %v34140_v1  ;;  %v11907_v37 = vsub.f32 %v34120_v16, %v11906_v35 }
 0x23c   :  { %v11908_v4 = vand.u32 4294901760, %v11907_v37 }
 0x23d   :  { %v34131_v59 = vpop.f32.mrb[14].mxu0  ;;  %v34133_v52 = vpop.f32.mrb[14].mxu1 }
 0x23e   :  { %36174 = vst [vmem:[#allocation83_spill] sm:$0xff] %v34131_v59  ;;  %36175 = vst [vmem:[#allocation84_spill] sm:$0xff] %v34133_v52  ;;  %v30518_v22 = vpop.f32.mrb[15].mxu0  ;;  %30812 = vmatmul.mubr.f32.vlgmr.msra.gmra.mrb[24].mxu0 %v33989_v31  ;;  %v30548_v39 = vpop.f32.mrb[15].mxu1  ;;  %30842 = vmatmul.mubr.f32.vlgmr.msra.gmra.mrb[24].mxu1 %v33994_v50  ;;  %v12359_v59 = vsub.f32 %v34126_v28, %v12358_v33 }
 0x23f   :  { %30815 = vmatpush3.msra.mxu0 %v33992_v0  ;;  %30845 = vmatpush3.msra.mxu1 %v33999_v55  ;;  %v34147_v22 = vand.u32 4294901760, %v34129_v20  ;;  %v11918_v39 = vsub.f32 %v34123_v10, %v34140_v1 }
 0x240   :  { %30816 = vmatprep.mubr.msk.f32.mxu0 %vm32634_vm2, %v36106_v43  ;;  %30846 = vmatprep.mubr.msk.f32.mxu1 %vm32634_vm2, %v36106_v43  ;;  %v12360_v55 = vand.u32 4294901760, %v12359_v59 }
 0x241   :  { %36177 = vst [vmem:[#allocation86_spill] sm:$0xff] %v34147_v22  ;;  %30849 = vmatprep.subr.mxu0 %v36106_v43  ;;  %30879 = vmatprep.subr.mxu1 %v36106_v43  ;;  %v12370_v52 = vsub.f32 %v34129_v20, %v34147_v22  ;;  %v34162_v12 = vand.u32 4294901760, %v11918_v39 }
 0x243   :  { %36178 = vst [vmem:[#allocation87_spill] sm:$0xff] %v34162_v12  ;;  %v34167_v0 = vand.u32 4294901760, %v12370_v52 }
 0x245   :  { %36179 = vst [vmem:[#allocation88_spill] sm:$0xff] %v34167_v0 }
 0x246   :  { %30817 = vmatmul.mubr.f32.vlgmr.msra.gmra.mrb[24].mxu0 %v33989_v31  ;;  %30847 = vmatmul.mubr.f32.vlgmr.msra.gmra.mrb[24].mxu1 %v33994_v50  ;;  %v74_v50 = vld [vmem:[%s35968_s2 + $0x70] sm:$0xf]  ;;  %v43_v31 = vld [vmem:[%s35969_s0 + $0x3a] sm:$0x3] }
 0x247   :  { %30850 = vmatpush3.msra.mxu0 %v34106_v58  ;;  %30880 = vmatpush3.msra.mxu1 %v34113_v61 }
 0x248   :  { %30851 = vmatprep.mubr.msk.f32.mxu0 %vm32634_vm2, %v36106_v43  ;;  %30854 = vmatprep.subr.mxu0 %v36106_v43 }
 0x249   :  { %30881 = vmatprep.mubr.msk.f32.mxu1 %vm32634_vm2, %v36106_v43  ;;  %30884 = vmatprep.subr.mxu1 %v36106_v43 }
 0x24a   :  { %30852 = vmatmul.mubr.f32.vlgmr.msra.gmra.mrb[26].mxu0 %v11908_v4  ;;  %30882 = vmatmul.mubr.f32.vlgmr.msra.gmra.mrb[26].mxu1 %v12360_v55  ;;  %v42_v4 = vld [vmem:[%s35969_s0 + $0x38] sm:$0x3]  ;;  %v75_v55 = vld [vmem:[%s35968_s2 + $0x74] sm:$0xf] }
 0x24b   :  { %30855 = vmatpush3.msra.mxu0 %v34162_v12  ;;  %30885 = vmatpush3.msra.mxu1 %v34167_v0  ;;  %v12737_v52 = vsel %vm78_vm1, %v42_v4, 0  ;;  %v13192_v59 = vsel %vm82_vm0, %v75_v55, 0 }
 0x24c   :  { %30856 = vmatprep.mubr.msk.f32.mxu0 %vm32634_vm2, %v36106_v43  ;;  %30859 = vmatprep.subr.mxu0 %v36106_v43  ;;  %v34217_v37 = vand.u32 4294901760, %v12737_v52  ;;  %v34227_v4 = vand.u32 4294901760, %v13192_v59 }
 0x24d   :  { %30886 = vmatprep.mubr.msk.f32.mxu1 %vm32634_vm2, %v36106_v43  ;;  %30889 = vmatprep.subr.mxu1 %v36106_v43 }
 0x24e   :  { %36181 = vst [vmem:[#allocation90_spill] sm:$0xff] %v34227_v4 }
 0x252   :  { %30857 = vmatmul.mubr.f32.vlgmr.msra.gmra.mrb[26].mxu0 %v34103_v2  ;;  %30887 = vmatmul.mubr.f32.vlgmr.msra.gmra.mrb[26].mxu1 %v34108_v23 }
 0x253   :  { %30860 = vmatpush3.msra.mxu0 %v34123_v10  ;;  %30890 = vmatpush3.msra.mxu1 %v34129_v20 }
 0x254   :  { %30861 = vmatprep.mubr.msk.f32.mxu0 %vm32634_vm2, %v36106_v43  ;;  %30864 = vmatprep.subr.mxu0 %v36106_v43 }
 0x255   :  { %30891 = vmatprep.mubr.msk.f32.mxu1 %vm32634_vm2, %v36106_v43  ;;  %30894 = vmatprep.subr.mxu1 %v36106_v43 }
 0x25a   :  { %30862 = vmatmul.mubr.f32.vlgmr.msra.gmra.mrb[26].mxu0 %v34120_v16  ;;  %30892 = vmatmul.mubr.f32.vlgmr.msra.gmra.mrb[26].mxu1 %v34126_v28  ;;  %v12740_v16 = vsel %vm82_vm0, %v74_v50, 0  ;;  %v13189_v28 = vsel %vm78_vm1, %v43_v31, 0  ;;  %v34243_v31 = vsub.f32 %v13192_v59, %v34227_v4 }
 0x25b   :  { %30865 = vmatpush3.msra.mxu0 %v34106_v58  ;;  %30895 = vmatpush3.msra.mxu1 %v34113_v61  ;;  %v34220_v39 = vand.u32 4294901760, %v12740_v16  ;;  %v34222_v20 = vand.u32 4294901760, %v13189_v28 }
 0x25c   :  { %30866 = vmatprep.mubr.msk.f32.mxu0 %vm32634_vm2, %v36106_v43  ;;  %30869 = vmatprep.subr.mxu0 %v36106_v43  ;;  %36183 = vst [vmem:[#allocation92_spill] sm:$0xff] %v34243_v31 }
 0x25d   :  { %30896 = vmatprep.mubr.msk.f32.mxu1 %vm32634_vm2, %v36106_v43  ;;  %30899 = vmatprep.subr.mxu1 %v36106_v43  ;;  %36180 = vst [vmem:[#allocation89_spill] sm:$0xff] %v34220_v39  ;;  %v34240_v50 = vsub.f32 %v13189_v28, %v34222_v20 }
 0x25f   :  { %v13262_v28 = vand.u32 4294901760, %v34240_v50 }
 0x262   :  { %30867 = vmatmul.mubr.f32.vlgmr.msra.gmra.mrb[26].mxu0 %v11906_v35  ;;  %30897 = vmatmul.mubr.f32.vlgmr.msra.gmra.mrb[26].mxu1 %v12358_v33  ;;  %v34234_v35 = vsub.f32 %v12737_v52, %v34217_v37  ;;  %v34237_v33 = vsub.f32 %v12740_v16, %v34220_v39 }
 0x263   :  { %30870 = vmatpush3.msra.mxu0 %v34140_v1  ;;  %30900 = vmatpush3.msra.mxu1 %v34147_v22 }
 0x264   :  { %30871 = vmatprep.mubr.msk.f32.mxu0 %vm32634_vm2, %v36106_v43  ;;  %30874 = vmatprep.subr.mxu0 %v36106_v43  ;;  %36182 = vst [vmem:[#allocation91_spill] sm:$0xff] %v34237_v33  ;;  %v12810_v10 = vand.u32 4294901760, %v34234_v35  ;;  %v34254_v16 = vand.u32 4294901760, %v34237_v33 }
 0x265   :  { %30901 = vmatprep.mubr.msk.f32.mxu1 %vm32634_vm2, %v36106_v43  ;;  %30904 = vmatprep.subr.mxu1 %v36106_v43 }
 0x266   :  { %36186 = vst [vmem:[#allocation95_spill] sm:$0xff] %v34254_v16  ;;  %v12811_v59 = vsub.f32 %v34234_v35, %v12810_v10 }
 0x268   :  { %v12812_v0 = vand.u32 4294901760, %v12811_v59 }
 0x269   :  { %v34245_v55 = vpop.f32.mrb[16].mxu0  ;;  %v34247_v22 = vpop.f32.mrb[16].mxu1 }
 0x26a   :  { %36184 = vst [vmem:[#allocation93_spill] sm:$0xff] %v34245_v55  ;;  %36185 = vst [vmem:[#allocation94_spill] sm:$0xff] %v34247_v22  ;;  %v30578_v1 = vpop.f32.mrb[17].mxu0  ;;  %30872 = vmatmul.mubr.f32.vlgmr.msra.gmra.mrb[26].mxu0 %v34103_v2  ;;  %v30608_v52 = vpop.f32.mrb[17].mxu1  ;;  %30902 = vmatmul.mubr.f32.vlgmr.msra.gmra.mrb[26].mxu1 %v34108_v23  ;;  %v13263_v55 = vsub.f32 %v34240_v50, %v13262_v28 }
 0x26b   :  { %30875 = vmatpush3.msra.mxu0 %v34106_v58  ;;  %30905 = vmatpush3.msra.mxu1 %v34113_v61  ;;  %v34261_v1 = vand.u32 4294901760, %v34243_v31  ;;  %v12822_v52 = vsub.f32 %v34237_v33, %v34254_v16 }
 0x26c   :  { %30876 = vmatprep.mubr.msk.f32.mxu0 %vm32634_vm2, %v36106_v43  ;;  %30906 = vmatprep.mubr.msk.f32.mxu1 %vm32634_vm2, %v36106_v43  ;;  %v13264_v61 = vand.u32 4294901760, %v13263_v55 }
 0x26d   :  { %36187 = vst [vmem:[#allocation96_spill] sm:$0xff] %v34261_v1  ;;  %30909 = vmatprep.subr.mxu0 %v36106_v43  ;;  %30939 = vmatprep.subr.mxu1 %v36106_v43  ;;  %v13274_v22 = vsub.f32 %v34243_v31, %v34261_v1  ;;  %v34276_v12 = vand.u32 4294901760, %v12822_v52 }
 0x26f   :  { %36188 = vst [vmem:[#allocation97_spill] sm:$0xff] %v34276_v12  ;;  %v34281_v58 = vand.u32 4294901760, %v13274_v22 }
 0x271   :  { %36189 = vst [vmem:[#allocation98_spill] sm:$0xff] %v34281_v58 }
 0x272   :  { %30877 = vmatmul.mubr.f32.vlgmr.msra.gmra.mrb[26].mxu0 %v34103_v2  ;;  %30907 = vmatmul.mubr.f32.vlgmr.msra.gmra.mrb[26].mxu1 %v34108_v23  ;;  %v76_v23 = vld [vmem:[%s35968_s2 + $0x78] sm:$0xf]  ;;  %v45_v2 = vld [vmem:[%s35969_s0 + $0x3e] sm:$0x3] }
 0x273   :  { %30910 = vmatpush3.msra.mxu0 %v34220_v39  ;;  %30940 = vmatpush3.msra.mxu1 %v34227_v4 }
 0x274   :  { %30911 = vmatprep.mubr.msk.f32.mxu0 %vm32634_vm2, %v36106_v43  ;;  %30914 = vmatprep.subr.mxu0 %v36106_v43 }
 0x275   :  { %30941 = vmatprep.mubr.msk.f32.mxu1 %vm32634_vm2, %v36106_v43  ;;  %30944 = vmatprep.subr.mxu1 %v36106_v43 }
 0x276   :  { %30912 = vmatmul.mubr.f32.vlgmr.msra.gmra.mrb[28].mxu0 %v12812_v0  ;;  %30942 = vmatmul.mubr.f32.vlgmr.msra.gmra.mrb[28].mxu1 %v13264_v61  ;;  %v44_v0 = vld [vmem:[%s35969_s0 + $0x3c] sm:$0x3]  ;;  %s32636_s0 = smov 4  }
 0x277   :  { %30915 = vmatpush3.msra.mxu0 %v34276_v12  ;;  %30945 = vmatpush3.msra.mxu1 %v34281_v58  ;;  %v77_v61 = vld [vmem:[%s35968_s2 + $0x7c] sm:$0xf]  ;;  %v13641_v22 = vsel %vm78_vm1, %v44_v0, 0 }
 0x278   :  { %30916 = vmatprep.mubr.msk.f32.mxu0 %vm32634_vm2, %v36106_v43  ;;  %30919 = vmatprep.subr.mxu0 %v36106_v43  ;;  %v14096_v55 = vsel %vm82_vm0, %v77_v61, 0  ;;  %v34331_v59 = vand.u32 4294901760, %v13641_v22 }
 0x279   :  { %30946 = vmatprep.mubr.msk.f32.mxu1 %vm32634_vm2, %v36106_v43  ;;  %30949 = vmatprep.subr.mxu1 %v36106_v43  ;;  %v34341_v0 = vand.u32 4294901760, %v14096_v55 }
 0x27e   :  { %30917 = vmatmul.mubr.f32.vlgmr.msra.gmra.mrb[28].mxu0 %v34217_v37  ;;  %30947 = vmatmul.mubr.f32.vlgmr.msra.gmra.mrb[28].mxu1 %v34222_v20 }
 0x27f   :  { %30920 = vmatpush3.msra.mxu0 %v34237_v33  ;;  %30950 = vmatpush3.msra.mxu1 %v34243_v31 }
 0x280   :  { %30921 = vmatprep.mubr.msk.f32.mxu0 %vm32634_vm2, %v36106_v43  ;;  %30924 = vmatprep.subr.mxu0 %v36106_v43 }
 0x281   :  { %30951 = vmatprep.mubr.msk.f32.mxu1 %vm32634_vm2, %v36106_v43  ;;  %30954 = vmatprep.subr.mxu1 %v36106_v43 }
 0x286   :  { %30922 = vmatmul.mubr.f32.vlgmr.msra.gmra.mrb[28].mxu0 %v34234_v35  ;;  %30952 = vmatmul.mubr.f32.vlgmr.msra.gmra.mrb[28].mxu1 %v34240_v50  ;;  %v13644_v35 = vsel %vm82_vm0, %v76_v23, 0  ;;  %v14093_v50 = vsel %vm78_vm1, %v45_v2, 0  ;;  %v34357_v2 = vsub.f32 %v14096_v55, %v34341_v0 }
 0x287   :  { %30925 = vmatpush3.msra.mxu0 %v34220_v39  ;;  %30955 = vmatpush3.msra.mxu1 %v34227_v4  ;;  %v34334_v52 = vand.u32 4294901760, %v13644_v35  ;;  %v34336_v31 = vand.u32 4294901760, %v14093_v50 }
 0x288   :  { %30926 = vmatprep.mubr.msk.f32.mxu0 %vm32634_vm2, %v36106_v43  ;;  %30929 = vmatprep.subr.mxu0 %v36106_v43 }
 0x289   :  { %30956 = vmatprep.mubr.msk.f32.mxu1 %vm32634_vm2, %v36106_v43  ;;  %30959 = vmatprep.subr.mxu1 %v36106_v43  ;;  %v34354_v23 = vsub.f32 %v14093_v50, %v34336_v31 }
 0x28b   :  { %v14166_v50 = vand.u32 4294901760, %v34354_v23 }
 0x28e   :  { %30927 = vmatmul.mubr.f32.vlgmr.msra.gmra.mrb[28].mxu0 %v12810_v10  ;;  %30957 = vmatmul.mubr.f32.vlgmr.msra.gmra.mrb[28].mxu1 %v13262_v28  ;;  %v34348_v10 = vsub.f32 %v13641_v22, %v34331_v59  ;;  %v34351_v28 = vsub.f32 %v13644_v35, %v34334_v52 }
 0x28f   :  { %30930 = vmatpush3.msra.mxu0 %v34254_v16  ;;  %30960 = vmatpush3.msra.mxu1 %v34261_v1 }
 0x290   :  { %30931 = vmatprep.mubr.msk.f32.mxu0 %vm32634_vm2, %v36106_v43  ;;  %30934 = vmatprep.subr.mxu0 %v36106_v43  ;;  %v13714_v33 = vand.u32 4294901760, %v34348_v10  ;;  %v34368_v35 = vand.u32 4294901760, %v34351_v28 }
 0x291   :  { %30961 = vmatprep.mubr.msk.f32.mxu1 %vm32634_vm2, %v36106_v43  ;;  %30964 = vmatprep.subr.mxu1 %v36106_v43 }
 0x292   :  { %v13715_v55 = vsub.f32 %v34348_v10, %v13714_v33 }
 0x294   :  { %v13716_v58 = vand.u32 4294901760, %v13715_v55 }
 0x295   :  { %v34359_v61 = vpop.f32.mrb[18].mxu0  ;;  %v34361_v1 = vpop.f32.mrb[18].mxu1 }
 0x296   :  { %36190 = vst [vmem:[#allocation99_spill] sm:$0xff] %v34359_v61  ;;  %36191 = vst [vmem:[#allocation100_spill] sm:$0xff] %v34361_v1  ;;  %v30638_v16 = vpop.f32.mrb[19].mxu0  ;;  %30932 = vmatmul.mubr.f32.vlgmr.msra.gmra.mrb[28].mxu0 %v34217_v37  ;;  %v30668_v22 = vpop.f32.mrb[19].mxu1  ;;  %30962 = vmatmul.mubr.f32.vlgmr.msra.gmra.mrb[28].mxu1 %v34222_v20  ;;  %v14167_v61 = vsub.f32 %v34354_v23, %v14166_v50 }
 0x297   :  { %30935 = vmatpush3.msra.mxu0 %v34220_v39  ;;  %30965 = vmatpush3.msra.mxu1 %v34227_v4  ;;  %v34375_v16 = vand.u32 4294901760, %v34357_v2  ;;  %v13726_v22 = vsub.f32 %v34351_v28, %v34368_v35 }
 0x298   :  { %30936 = vmatprep.mubr.msk.f32.mxu0 %vm32634_vm2, %v36106_v43  ;;  %30966 = vmatprep.mubr.msk.f32.mxu1 %vm32634_vm2, %v36106_v43  ;;  %v14168_v4 = vand.u32 4294901760, %v14167_v61 }
 0x299   :  { %30969 = vmatprep.subr.mxu0 %v36106_v43  ;;  %30999 = vmatprep.subr.mxu1 %v36106_v43  ;;  %v14178_v1 = vsub.f32 %v34357_v2, %v34375_v16  ;;  %v34390_v12 = vand.u32 4294901760, %v13726_v22 }
 0x29b   :  { %v34395_v39 = vand.u32 4294901760, %v14178_v1 }
 0x29e   :  { %30937 = vmatmul.mubr.f32.vlgmr.msra.gmra.mrb[28].mxu0 %v34217_v37  ;;  %30967 = vmatmul.mubr.f32.vlgmr.msra.gmra.mrb[28].mxu1 %v34222_v20  ;;  %v14545_v20 = vld [vmem:[%s35970_s1 + $0x2] sm:$0x3] }
 0x29f   :  { %30970 = vmatpush3.msra.mxu0 %v34334_v52  ;;  %31000 = vmatpush3.msra.mxu1 %v34341_v0 }
 0x2a0   :  { %30971 = vmatprep.mubr.msk.f32.mxu0 %vm32634_vm2, %v36106_v43  ;;  %30974 = vmatprep.subr.mxu0 %v36106_v43 }
 0x2a1   :  { %31001 = vmatprep.mubr.msk.f32.mxu1 %vm32634_vm2, %v36106_v43  ;;  %31004 = vmatprep.subr.mxu1 %v36106_v43 }
 0x2a2   :  { %30972 = vmatmul.mubr.f32.vlgmr.msra.gmra.mrb[30].mxu0 %v13716_v58  ;;  %31002 = vmatmul.mubr.f32.vlgmr.msra.gmra.mrb[30].mxu1 %v14168_v4  ;;  %v14544_v58 = vld [vmem:[%s35970_s1] sm:$0x3]  ;;  %v15026_v4 = vsel %vm78_vm1, %v14545_v20, 0 }
 0x2a3   :  { %30975 = vmatpush3.msra.mxu0 %v34390_v12  ;;  %31005 = vmatpush3.msra.mxu1 %v34395_v39  ;;  %v14577_v37 = vsel %vm78_vm1, %v14544_v58, 0 }
 0x2a4   :  { %30976 = vmatprep.mubr.msk.f32.mxu0 %vm32634_vm2, %v36106_v43  ;;  %30979 = vmatprep.subr.mxu0 %v36106_v43  ;;  %v34437_v1 = vand.u32 4294901760, %v14577_v37 }
 0x2a5   :  { %31006 = vmatprep.mubr.msk.f32.mxu1 %vm32634_vm2, %v36106_v43  ;;  %31009 = vmatprep.subr.mxu1 %v36106_v43 }
 0x2aa   :  { %30977 = vmatmul.mubr.f32.vlgmr.msra.gmra.mrb[30].mxu0 %v34331_v59  ;;  %31007 = vmatmul.mubr.f32.vlgmr.msra.gmra.mrb[30].mxu1 %v34336_v31 }
 0x2ab   :  { %30980 = vmatpush3.msra.mxu0 %v34351_v28  ;;  %31010 = vmatpush3.msra.mxu1 %v34357_v2 }
 0x2ac   :  { %30981 = vmatprep.mubr.msk.f32.mxu0 %vm32634_vm2, %v36106_v43  ;;  %30984 = vmatprep.subr.mxu0 %v36106_v43 }
 0x2ad   :  { %31011 = vmatprep.mubr.msk.f32.mxu1 %vm32634_vm2, %v36106_v43  ;;  %31014 = vmatprep.subr.mxu1 %v36106_v43 }
 0x2b2   :  { %30982 = vmatmul.mubr.f32.vlgmr.msra.gmra.mrb[30].mxu0 %v34348_v10  ;;  %31012 = vmatmul.mubr.f32.vlgmr.msra.gmra.mrb[30].mxu1 %v34354_v23  ;;  %v34440_v10 = vand.u32 4294901760, %v15026_v4 }
 0x2b3   :  { %30985 = vmatpush3.msra.mxu0 %v34334_v52  ;;  %31015 = vmatpush3.msra.mxu1 %v34341_v0 }
 0x2b4   :  { %30986 = vmatprep.mubr.msk.f32.mxu0 %vm32634_vm2, %v36106_v43  ;;  %30989 = vmatprep.subr.mxu0 %v36106_v43  ;;  %v15095_v23 = vsub.f32 %v15026_v4, %v34440_v10 }
 0x2b5   :  { %31016 = vmatprep.mubr.msk.f32.mxu1 %vm32634_vm2, %v36106_v43  ;;  %31019 = vmatprep.subr.mxu1 %v36106_v43 }
 0x2b6   :  { %v15096_v20 = vand.u32 4294901760, %v15095_v23 }
 0x2b8   :  { %v15097_v4 = vsub.f32 %v15095_v23, %v15096_v20 }
 0x2ba   :  { %30987 = vmatmul.mubr.f32.vlgmr.msra.gmra.mrb[30].mxu0 %v13714_v33  ;;  %31017 = vmatmul.mubr.f32.vlgmr.msra.gmra.mrb[30].mxu1 %v14166_v50  ;;  %v14646_v33 = vsub.f32 %v14577_v37, %v34437_v1 }
 0x2bb   :  { %30990 = vmatpush3.msra.mxu0 %v34368_v35  ;;  %31020 = vmatpush3.msra.mxu1 %v34375_v16 }
 0x2bc   :  { %30991 = vmatprep.mubr.msk.f32.mxu0 %vm32634_vm2, %v36106_v43  ;;  %30994 = vmatprep.subr.mxu0 %v36106_v43  ;;  %v14647_v22 = vand.u32 4294901760, %v14646_v33 }
 0x2bd   :  { %31021 = vmatprep.mubr.msk.f32.mxu1 %vm32634_vm2, %v36106_v43  ;;  %31024 = vmatprep.subr.mxu1 %v36106_v43 }
 0x2be   :  { %v14648_v37 = vsub.f32 %v14646_v33, %v14647_v22 }
 0x2c1   :  { %v34451_v61 = vpop.f32.mrb[20].mxu0  ;;  %v34453_v50 = vpop.f32.mrb[20].mxu1 }
 0x2c2   :  { %v30698_v55 = vpop.f32.mrb[21].mxu0  ;;  %30992 = vmatmul.mubr.f32.vlgmr.msra.gmra.mrb[30].mxu0 %v34331_v59  ;;  %v30728_v58 = vpop.f32.mrb[21].mxu1  ;;  %31022 = vmatmul.mubr.f32.vlgmr.msra.gmra.mrb[30].mxu1 %v34336_v31 }
 0x2c3   :  { %30995 = vmatpush3.msra.mxu0 %v34334_v52  ;;  %31025 = vmatpush3.msra.mxu1 %v34341_v0  ;;  %v14649_v55 = vand.u32 4294901760, %v14648_v37  ;;  %v15098_v58 = vand.u32 4294901760, %v15097_v4 }
 0x2c4   :  { %30996 = vmatprep.mubr.msk.f32.mxu0 %vm32634_vm2, %v36106_v43  ;;  %31026 = vmatprep.mubr.msk.f32.mxu1 %vm32634_vm2, %v36106_v43 }
 0x2c5   :  { %31029 = vmatprep.subr.mxu0 %v36106_v43  ;;  %31059 = vmatprep.subr.mxu1 %v36106_v43 }
 0x2ca   :  { %30997 = vmatmul.mubr.f32.vlgmr.msra.gmra.mrb[30].mxu0 %v34331_v59  ;;  %31027 = vmatmul.mubr.f32.vlgmr.msra.gmra.mrb[30].mxu1 %v34336_v31 }
 0x2cb   :  { %31030 = vmatpush3.msra.mxu0 %v32678_v8  ;;  %31060 = vmatpush3.msra.mxu1 %v32680_v9 }
 0x2cc   :  { %31031 = vmatprep.mubr.msk.f32.mxu0 %vm32634_vm2, %v36106_v43  ;;  %31034 = vmatprep.subr.mxu0 %v36106_v43 }
 0x2cd   :  { %31061 = vmatprep.mubr.msk.f32.mxu1 %vm32634_vm2, %v36106_v43  ;;  %31064 = vmatprep.subr.mxu1 %v36106_v43 }
 0x2ce   :  { %31032 = vmatmul.mubr.f32.vlgmr.msra.gmra.mrb[32].mxu0 %v14649_v55  ;;  %31062 = vmatmul.mubr.f32.vlgmr.msra.gmra.mrb[32].mxu1 %v15098_v58 }
 0x2cf   :  { %31035 = vmatpush3.msra.mxu0 %v32709_v26  ;;  %31065 = vmatpush3.msra.mxu1 %v32711_v27 }
 0x2d0   :  { %31036 = vmatprep.mubr.msk.f32.mxu0 %vm32634_vm2, %v36106_v43  ;;  %31039 = vmatprep.subr.mxu0 %v36106_v43 }
 0x2d1   :  { %31066 = vmatprep.mubr.msk.f32.mxu1 %vm32634_vm2, %v36106_v43  ;;  %31069 = vmatprep.subr.mxu1 %v36106_v43 }
 0x2d6   :  { %31037 = vmatmul.mubr.f32.vlgmr.msra.gmra.mrb[32].mxu0 %v34437_v1  ;;  %31067 = vmatmul.mubr.f32.vlgmr.msra.gmra.mrb[32].mxu1 %v34440_v10 }
 0x2d7   :  { %31040 = vmatpush3.msra.mxu0 %v32691_v14  ;;  %31070 = vmatpush3.msra.mxu1 %v32694_v15  ;;  %v14546_v14 = vld [vmem:[%s35970_s1 + $0x4] sm:$0x3]  ;;  %v14547_v15 = vld [vmem:[%s35970_s1 + $0x6] sm:$0x3] }
 0x2d8   :  { %31041 = vmatprep.mubr.msk.f32.mxu0 %vm32634_vm2, %v36106_v43  ;;  %31044 = vmatprep.subr.mxu0 %v36106_v43  ;;  %v15475_v26 = vsel %vm78_vm1, %v14546_v14, 0  ;;  %v15924_v27 = vsel %vm78_vm1, %v14547_v15, 0 }
 0x2d9   :  { %31071 = vmatprep.mubr.msk.f32.mxu1 %vm32634_vm2, %v36106_v43  ;;  %31074 = vmatprep.subr.mxu1 %v36106_v43  ;;  %v34509_v31 = vand.u32 4294901760, %v15475_v26  ;;  %v34512_v59 = vand.u32 4294901760, %v15924_v27 }
 0x2de   :  { %31042 = vmatmul.mubr.f32.vlgmr.msra.gmra.mrb[32].mxu0 %v14646_v33  ;;  %31072 = vmatmul.mubr.f32.vlgmr.msra.gmra.mrb[32].mxu1 %v15095_v23  ;;  %v15544_v33 = vsub.f32 %v15475_v26, %v34509_v31  ;;  %v15993_v23 = vsub.f32 %v15924_v27, %v34512_v59 }
 0x2df   :  { %31045 = vmatpush3.msra.mxu0 %v32678_v8  ;;  %31075 = vmatpush3.msra.mxu1 %v32680_v9 }
 0x2e0   :  { %31046 = vmatprep.mubr.msk.f32.mxu0 %vm32634_vm2, %v36106_v43  ;;  %31049 = vmatprep.subr.mxu0 %v36106_v43  ;;  %v15994_v4 = vand.u32 4294901760, %v15993_v23 }
 0x2e1   :  { %31076 = vmatprep.mubr.msk.f32.mxu1 %vm32634_vm2, %v36106_v43  ;;  %31079 = vmatprep.subr.mxu1 %v36106_v43 }
 0x2e2   :  { %v15995_v58 = vsub.f32 %v15993_v23, %v15994_v4 }
 0x2e6   :  { %31047 = vmatmul.mubr.f32.vlgmr.msra.gmra.mrb[32].mxu0 %v14647_v22  ;;  %31077 = vmatmul.mubr.f32.vlgmr.msra.gmra.mrb[32].mxu1 %v15096_v20 }
 0x2e7   :  { %31050 = vmatpush3.msra.mxu0 %v32700_v18  ;;  %31080 = vmatpush3.msra.mxu1 %v32703_v19  ;;  %v15545_v19 = vand.u32 4294901760, %v15544_v33 }
 0x2e8   :  { %31051 = vmatprep.mubr.msk.f32.mxu0 %vm32634_vm2, %v36106_v43  ;;  %31054 = vmatprep.subr.mxu0 %v36106_v43 }
 0x2e9   :  { %31081 = vmatprep.mubr.msk.f32.mxu1 %vm32634_vm2, %v36106_v43  ;;  %31084 = vmatprep.subr.mxu1 %v36106_v43  ;;  %v15546_v55 = vsub.f32 %v15544_v33, %v15545_v19 }
 0x2ed   :  { %v34523_v18 = vpop.f32.mrb[22].mxu0  ;;  %v34525_v22 = vpop.f32.mrb[22].mxu1 }
 0x2ee   :  { %v30758_v20 = vpop.f32.mrb[23].mxu0  ;;  %31052 = vmatmul.mubr.f32.vlgmr.msra.gmra.mrb[32].mxu0 %v34437_v1  ;;  %v30788_v37 = vpop.f32.mrb[23].mxu1  ;;  %31082 = vmatmul.mubr.f32.vlgmr.msra.gmra.mrb[32].mxu1 %v34440_v10 }
 0x2ef   :  { %31055 = vmatpush3.msra.mxu0 %v32678_v8  ;;  %31085 = vmatpush3.msra.mxu1 %v32680_v9  ;;  %v15547_v8 = vand.u32 4294901760, %v15546_v55  ;;  %v15996_v9 = vand.u32 4294901760, %v15995_v58 }
 0x2f0   :  { %31056 = vmatprep.mubr.msk.f32.mxu0 %vm32634_vm2, %v36106_v43  ;;  %31086 = vmatprep.mubr.msk.f32.mxu1 %vm32634_vm2, %v36106_v43 }
 0x2f1   :  { %31089 = vmatprep.subr.mxu0 %v36106_v43  ;;  %31119 = vmatprep.subr.mxu1 %v36106_v43 }
 0x2f6   :  { %31057 = vmatmul.mubr.f32.vlgmr.msra.gmra.mrb[32].mxu0 %v34437_v1  ;;  %31087 = vmatmul.mubr.f32.vlgmr.msra.gmra.mrb[32].mxu1 %v34440_v10 }
 0x2f7   :  { %31090 = vmatpush3.msra.mxu0 %v32758_v38  ;;  %31120 = vmatpush3.msra.mxu1 %v32765_v40 }
 0x2f8   :  { %31091 = vmatprep.mubr.msk.f32.mxu0 %vm32634_vm2, %v36106_v43  ;;  %31094 = vmatprep.subr.mxu0 %v36106_v43 }
 0x2f9   :  { %31121 = vmatprep.mubr.msk.f32.mxu1 %vm32634_vm2, %v36106_v43  ;;  %31124 = vmatprep.subr.mxu1 %v36106_v43 }
 0x2fa   :  { %31092 = vmatmul.mubr.f32.vlgmr.msra.gmra.mrb[34].mxu0 %v15547_v8  ;;  %31122 = vmatmul.mubr.f32.vlgmr.msra.gmra.mrb[34].mxu1 %v15996_v9 }
 0x2fb   :  { %31095 = vmatpush3.msra.mxu0 %v32810_v54  ;;  %31125 = vmatpush3.msra.mxu1 %v32815_v56 }
 0x2fc   :  { %31096 = vmatprep.mubr.msk.f32.mxu0 %vm32634_vm2, %v36106_v43  ;;  %31099 = vmatprep.subr.mxu0 %v36106_v43 }
 0x2fd   :  { %31126 = vmatprep.mubr.msk.f32.mxu1 %vm32634_vm2, %v36106_v43  ;;  %31129 = vmatprep.subr.mxu1 %v36106_v43 }
 0x302   :  { %31097 = vmatmul.mubr.f32.vlgmr.msra.gmra.mrb[34].mxu0 %v34509_v31  ;;  %31127 = vmatmul.mubr.f32.vlgmr.msra.gmra.mrb[34].mxu1 %v34512_v59 }
 0x303   :  { %31100 = vmatpush3.msra.mxu0 %v32775_v42  ;;  %31130 = vmatpush3.msra.mxu1 %v32781_v44  ;;  %v14548_v42 = vld [vmem:[%s35970_s1 + $0x8] sm:$0x3]  ;;  %v14549_v44 = vld [vmem:[%s35970_s1 + $0xa] sm:$0x3] }
 0x304   :  { %31101 = vmatprep.mubr.msk.f32.mxu0 %vm32634_vm2, %v36106_v43  ;;  %31104 = vmatprep.subr.mxu0 %v36106_v43  ;;  %v16373_v54 = vsel %vm78_vm1, %v14548_v42, 0  ;;  %v16822_v56 = vsel %vm78_vm1, %v14549_v44, 0 }
 0x305   :  { %31131 = vmatprep.mubr.msk.f32.mxu1 %vm32634_vm2, %v36106_v43  ;;  %31134 = vmatprep.subr.mxu1 %v36106_v43  ;;  %v34581_v1 = vand.u32 4294901760, %v16373_v54  ;;  %v34584_v10 = vand.u32 4294901760, %v16822_v56 }
 0x307   :  { %v16442_v14 = vsub.f32 %v16373_v54, %v34581_v1  ;;  %v16891_v15 = vsub.f32 %v16822_v56, %v34584_v10 }
 0x30a   :  { %31102 = vmatmul.mubr.f32.vlgmr.msra.gmra.mrb[34].mxu0 %v15544_v33  ;;  %31132 = vmatmul.mubr.f32.vlgmr.msra.gmra.mrb[34].mxu1 %v15993_v23  ;;  %v16892_v23 = vand.u32 4294901760, %v16891_v15 }
 0x30b   :  { %31105 = vmatpush3.msra.mxu0 %v32758_v38  ;;  %31135 = vmatpush3.msra.mxu1 %v32765_v40 }
 0x30c   :  { %31106 = vmatprep.mubr.msk.f32.mxu0 %vm32634_vm2, %v36106_v43  ;;  %31109 = vmatprep.subr.mxu0 %v36106_v43 }
 0x30d   :  { %31136 = vmatprep.mubr.msk.f32.mxu1 %vm32634_vm2, %v36106_v43  ;;  %31139 = vmatprep.subr.mxu1 %v36106_v43 }
 0x312   :  { %31107 = vmatmul.mubr.f32.vlgmr.msra.gmra.mrb[34].mxu0 %v15545_v19  ;;  %31137 = vmatmul.mubr.f32.vlgmr.msra.gmra.mrb[34].mxu1 %v15994_v4  ;;  %v16893_v19 = vsub.f32 %v16891_v15, %v16892_v23 }
 0x313   :  { %31110 = vmatpush3.msra.mxu0 %v32788_v46  ;;  %31140 = vmatpush3.msra.mxu1 %v32795_v48  ;;  %v16443_v48 = vand.u32 4294901760, %v16442_v14 }
 0x314   :  { %31111 = vmatprep.mubr.msk.f32.mxu0 %vm32634_vm2, %v36106_v43  ;;  %31114 = vmatprep.subr.mxu0 %v36106_v43 }
 0x315   :  { %31141 = vmatprep.mubr.msk.f32.mxu1 %vm32634_vm2, %v36106_v43  ;;  %31144 = vmatprep.subr.mxu1 %v36106_v43  ;;  %v16444_v20 = vsub.f32 %v16442_v14, %v16443_v48 }
 0x319   :  { %v34595_v46 = vpop.f32.mrb[24].mxu0  ;;  %v34597_v26 = vpop.f32.mrb[24].mxu1 }
 0x31a   :  { %v30818_v27 = vpop.f32.mrb[25].mxu0  ;;  %31112 = vmatmul.mubr.f32.vlgmr.msra.gmra.mrb[34].mxu0 %v34509_v31  ;;  %v30848_v33 = vpop.f32.mrb[25].mxu1  ;;  %31142 = vmatmul.mubr.f32.vlgmr.msra.gmra.mrb[34].mxu1 %v34512_v59 }
 0x31b   :  { %31115 = vmatpush3.msra.mxu0 %v32758_v38  ;;  %31145 = vmatpush3.msra.mxu1 %v32765_v40  ;;  %v16445_v38 = vand.u32 4294901760, %v16444_v20  ;;  %v16894_v40 = vand.u32 4294901760, %v16893_v19 }
 0x31c   :  { %31116 = vmatprep.mubr.msk.f32.mxu0 %vm32634_vm2, %v36106_v43  ;;  %31146 = vmatprep.mubr.msk.f32.mxu1 %vm32634_vm2, %v36106_v43 }
 0x31d   :  { %31149 = vmatprep.subr.mxu0 %v36106_v43  ;;  %31179 = vmatprep.subr.mxu1 %v36106_v43 }
 0x322   :  { %31117 = vmatmul.mubr.f32.vlgmr.msra.gmra.mrb[34].mxu0 %v34509_v31  ;;  %31147 = vmatmul.mubr.f32.vlgmr.msra.gmra.mrb[34].mxu1 %v34512_v59 }
 0x323   :  { %31150 = vmatpush3.msra.mxu0 %v32868_v3  ;;  %31180 = vmatpush3.msra.mxu1 %v32875_v5 }
 0x324   :  { %31151 = vmatprep.mubr.msk.f32.mxu0 %vm32634_vm2, %v36106_v43  ;;  %31154 = vmatprep.subr.mxu0 %v36106_v43 }
 0x325   :  { %31181 = vmatprep.mubr.msk.f32.mxu1 %vm32634_vm2, %v36106_v43  ;;  %31184 = vmatprep.subr.mxu1 %v36106_v43 }
 0x326   :  { %31152 = vmatmul.mubr.f32.vlgmr.msra.gmra.mrb[36].mxu0 %v16445_v38  ;;  %31182 = vmatmul.mubr.f32.vlgmr.msra.gmra.mrb[36].mxu1 %v16894_v40 }
 0x327   :  { %31155 = vmatpush3.msra.mxu0 %v32920_v25  ;;  %31185 = vmatpush3.msra.mxu1 %v32925_v29 }
 0x328   :  { %31156 = vmatprep.mubr.msk.f32.mxu0 %vm32634_vm2, %v36106_v43  ;;  %31159 = vmatprep.subr.mxu0 %v36106_v43 }
 0x329   :  { %31186 = vmatprep.mubr.msk.f32.mxu1 %vm32634_vm2, %v36106_v43  ;;  %31189 = vmatprep.subr.mxu1 %v36106_v43 }
 0x32e   :  { %31157 = vmatmul.mubr.f32.vlgmr.msra.gmra.mrb[36].mxu0 %v34581_v1  ;;  %31187 = vmatmul.mubr.f32.vlgmr.msra.gmra.mrb[36].mxu1 %v34584_v10 }
 0x32f   :  { %31160 = vmatpush3.msra.mxu0 %v32885_v7  ;;  %31190 = vmatpush3.msra.mxu1 %v32891_v11  ;;  %v14550_v7 = vld [vmem:[%s35970_s1 + $0xc] sm:$0x3]  ;;  %v14551_v11 = vld [vmem:[%s35970_s1 + $0xe] sm:$0x3] }
 0x330   :  { %31161 = vmatprep.mubr.msk.f32.mxu0 %vm32634_vm2, %v36106_v43  ;;  %31164 = vmatprep.subr.mxu0 %v36106_v43  ;;  %v17271_v25 = vsel %vm78_vm1, %v14550_v7, 0  ;;  %v17720_v29 = vsel %vm78_vm1, %v14551_v11, 0 }
 0x331   :  { %31191 = vmatprep.mubr.msk.f32.mxu1 %vm32634_vm2, %v36106_v43  ;;  %31194 = vmatprep.subr.mxu1 %v36106_v43  ;;  %v34653_v31 = vand.u32 4294901760, %v17271_v25  ;;  %v34656_v59 = vand.u32 4294901760, %v17720_v29 }
 0x333   :  { %v17340_v37 = vsub.f32 %v17271_v25, %v34653_v31  ;;  %v17789_v4 = vsub.f32 %v17720_v29, %v34656_v59 }
 0x335   :  { %v17790_v9 = vand.u32 4294901760, %v17789_v4 }
 0x336   :  { %31162 = vmatmul.mubr.f32.vlgmr.msra.gmra.mrb[36].mxu0 %v16442_v14  ;;  %31192 = vmatmul.mubr.f32.vlgmr.msra.gmra.mrb[36].mxu1 %v16891_v15 }
 0x337   :  { %31165 = vmatpush3.msra.mxu0 %v32868_v3  ;;  %31195 = vmatpush3.msra.mxu1 %v32875_v5  ;;  %v17791_v44 = vsub.f32 %v17789_v4, %v17790_v9 }
 0x338   :  { %31166 = vmatprep.mubr.msk.f32.mxu0 %vm32634_vm2, %v36106_v43  ;;  %31169 = vmatprep.subr.mxu0 %v36106_v43 }
 0x339   :  { %31196 = vmatprep.mubr.msk.f32.mxu1 %vm32634_vm2, %v36106_v43  ;;  %31199 = vmatprep.subr.mxu1 %v36106_v43 }
 0x33e   :  { %31167 = vmatmul.mubr.f32.vlgmr.msra.gmra.mrb[36].mxu0 %v16443_v48  ;;  %31197 = vmatmul.mubr.f32.vlgmr.msra.gmra.mrb[36].mxu1 %v16892_v23 }
 0x33f   :  { %31170 = vmatpush3.msra.mxu0 %v32898_v13  ;;  %31200 = vmatpush3.msra.mxu1 %v32905_v17  ;;  %v17341_v17 = vand.u32 4294901760, %v17340_v37 }
 0x340   :  { %31171 = vmatprep.mubr.msk.f32.mxu0 %vm32634_vm2, %v36106_v43  ;;  %31174 = vmatprep.subr.mxu0 %v36106_v43 }
 0x341   :  { %31201 = vmatprep.mubr.msk.f32.mxu1 %vm32634_vm2, %v36106_v43  ;;  %31204 = vmatprep.subr.mxu1 %v36106_v43  ;;  %v17342_v42 = vsub.f32 %v17340_v37, %v17341_v17 }
 0x345   :  { %v34667_v13 = vpop.f32.mrb[26].mxu0  ;;  %v34669_v55 = vpop.f32.mrb[26].mxu1 }
 0x346   :  { %v30878_v58 = vpop.f32.mrb[27].mxu0  ;;  %31172 = vmatmul.mubr.f32.vlgmr.msra.gmra.mrb[36].mxu0 %v34581_v1  ;;  %v30908_v8 = vpop.f32.mrb[27].mxu1  ;;  %31202 = vmatmul.mubr.f32.vlgmr.msra.gmra.mrb[36].mxu1 %v34584_v10 }
 0x347   :  { %31175 = vmatpush3.msra.mxu0 %v32868_v3  ;;  %31205 = vmatpush3.msra.mxu1 %v32875_v5  ;;  %v17343_v3 = vand.u32 4294901760, %v17342_v42  ;;  %v17792_v5 = vand.u32 4294901760, %v17791_v44  ;;  %v36194_v58 = vld [vmem:[#allocation8_spill] sm:$0xff]  ;;  %v14557_v42 = vld [vmem:[%s35970_s1 + $0x1a] sm:$0x3] }
 0x348   :  { %31176 = vmatprep.mubr.msk.f32.mxu0 %vm32634_vm2, %v36106_v43  ;;  %31206 = vmatprep.mubr.msk.f32.mxu1 %vm32634_vm2, %v36106_v43  ;;  %v36196_v8 = vld [vmem:[#allocation4_spill] sm:$0xff] }
 0x349   :  { %31209 = vmatprep.subr.mxu0 %v36106_v43  ;;  %31239 = vmatprep.subr.mxu1 %v36106_v43 }
 0x34e   :  { %31177 = vmatmul.mubr.f32.vlgmr.msra.gmra.mrb[36].mxu0 %v34581_v1  ;;  %31207 = vmatmul.mubr.f32.vlgmr.msra.gmra.mrb[36].mxu1 %v34584_v10 }
 0x34f   :  { %31210 = vmatpush3.msra.mxu0 %v32978_v41  ;;  %31240 = vmatpush3.msra.mxu1 %v32985_v45 }
 0x350   :  { %31211 = vmatprep.mubr.msk.f32.mxu0 %vm32634_vm2, %v36106_v43  ;;  %31214 = vmatprep.subr.mxu0 %v36106_v43 }
 0x351   :  { %31241 = vmatprep.mubr.msk.f32.mxu1 %vm32634_vm2, %v36106_v43  ;;  %31244 = vmatprep.subr.mxu1 %v36106_v43 }
 0x352   :  { %31212 = vmatmul.mubr.f32.vlgmr.msra.gmra.mrb[38].mxu0 %v17343_v3  ;;  %31242 = vmatmul.mubr.f32.vlgmr.msra.gmra.mrb[38].mxu1 %v17792_v5  ;;  %v20414_v3 = vsel %vm78_vm1, %v14557_v42, 0  ;;  %v36207_v42 = vld [vmem:[#allocation19_spill] sm:$0xff] }
 0x353   :  { %31215 = vmatpush3.msra.mxu0 %v33030_v63  ;;  %31245 = vmatpush3.msra.mxu1 %v33035_v6 }
 0x354   :  { %31216 = vmatprep.mubr.msk.f32.mxu0 %vm32634_vm2, %v36106_v43  ;;  %31219 = vmatprep.subr.mxu0 %v36106_v43 }
 0x355   :  { %31246 = vmatprep.mubr.msk.f32.mxu1 %vm32634_vm2, %v36106_v43  ;;  %31249 = vmatprep.subr.mxu1 %v36106_v43 }
 0x35a   :  { %31217 = vmatmul.mubr.f32.vlgmr.msra.gmra.mrb[38].mxu0 %v34653_v31  ;;  %31247 = vmatmul.mubr.f32.vlgmr.msra.gmra.mrb[38].mxu1 %v34656_v59 }
 0x35b   :  { %31220 = vmatpush3.msra.mxu0 %v32995_v49  ;;  %31250 = vmatpush3.msra.mxu1 %v33001_v51  ;;  %v14552_v49 = vld [vmem:[%s35970_s1 + $0x10] sm:$0x3]  ;;  %v14553_v51 = vld [vmem:[%s35970_s1 + $0x12] sm:$0x3] }
 0x35c   :  { %31221 = vmatprep.mubr.msk.f32.mxu0 %vm32634_vm2, %v36106_v43  ;;  %31224 = vmatprep.subr.mxu0 %v36106_v43  ;;  %v18169_v63 = vsel %vm78_vm1, %v14552_v49, 0  ;;  %v18618_v6 = vsel %vm78_vm1, %v14553_v51, 0  ;;  %v36197_v49 = vld [vmem:[#allocation5_spill] sm:$0xff]  ;;  %v34872_v51 = vand.u32 4294901760, %v20414_v3 }
 0x35d   :  { %31251 = vmatprep.mubr.msk.f32.mxu1 %vm32634_vm2, %v36106_v43  ;;  %31254 = vmatprep.subr.mxu1 %v36106_v43  ;;  %v34725_v54 = vand.u32 4294901760, %v18169_v63  ;;  %v34728_v56 = vand.u32 4294901760, %v18618_v6 }
 0x35f   :  { %v18238_v1 = vsub.f32 %v18169_v63, %v34725_v54  ;;  %v18687_v10 = vsub.f32 %v18618_v6, %v34728_v56  ;;  %v36198_v63 = vld [vmem:[#allocation6_spill] sm:$0xff] }
 0x361   :  { %v18688_v48 = vand.u32 4294901760, %v18687_v10 }
 0x362   :  { %31222 = vmatmul.mubr.f32.vlgmr.msra.gmra.mrb[38].mxu0 %v17340_v37  ;;  %31252 = vmatmul.mubr.f32.vlgmr.msra.gmra.mrb[38].mxu1 %v17789_v4  ;;  %v36192_v37 = vld [vmem:[#allocation2_spill] sm:$0xff]  ;;  %v36193_v4 = vld [vmem:[#allocation7_spill] sm:$0xff] }
 0x363   :  { %31225 = vmatpush3.msra.mxu0 %v32978_v41  ;;  %31255 = vmatpush3.msra.mxu1 %v32985_v45  ;;  %v18689_v23 = vsub.f32 %v18687_v10, %v18688_v48 }
 0x364   :  { %31226 = vmatprep.mubr.msk.f32.mxu0 %vm32634_vm2, %v36106_v43  ;;  %31229 = vmatprep.subr.mxu0 %v36106_v43 }
 0x365   :  { %31256 = vmatprep.mubr.msk.f32.mxu1 %vm32634_vm2, %v36106_v43  ;;  %31259 = vmatprep.subr.mxu1 %v36106_v43 }
 0x36a   :  { %31227 = vmatmul.mubr.f32.vlgmr.msra.gmra.mrb[38].mxu0 %v17341_v17  ;;  %31257 = vmatmul.mubr.f32.vlgmr.msra.gmra.mrb[38].mxu1 %v17790_v9  ;;  %v36195_v17 = vld [vmem:[#allocation3_spill] sm:$0xff]  ;;  %v14556_v9 = vld [vmem:[%s35970_s1 + $0x18] sm:$0x3] }
 0x36b   :  { %31230 = vmatpush3.msra.mxu0 %v33008_v53  ;;  %31260 = vmatpush3.msra.mxu1 %v33015_v57  ;;  %v18239_v57 = vand.u32 4294901760, %v18238_v1  ;;  %v19965_v44 = vsel %vm78_vm1, %v14556_v9, 0 }
 0x36c   :  { %31231 = vmatprep.mubr.msk.f32.mxu0 %vm32634_vm2, %v36106_v43  ;;  %31234 = vmatprep.subr.mxu0 %v36106_v43  ;;  %v34869_v5 = vand.u32 4294901760, %v19965_v44 }
 0x36d   :  { %31261 = vmatprep.mubr.msk.f32.mxu1 %vm32634_vm2, %v36106_v43  ;;  %31264 = vmatprep.subr.mxu1 %v36106_v43  ;;  %v18240_v33 = vsub.f32 %v18238_v1, %v18239_v57 }
 0x36e   :  { %v20034_v6 = vsub.f32 %v19965_v44, %v34869_v5 }
 0x371   :  { %v34739_v53 = vpop.f32.mrb[28].mxu0  ;;  %v34741_v14 = vpop.f32.mrb[28].mxu1 }
 0x372   :  { %v30938_v15 = vpop.f32.mrb[29].mxu0  ;;  %31232 = vmatmul.mubr.f32.vlgmr.msra.gmra.mrb[38].mxu0 %v34653_v31  ;;  %v30968_v27 = vpop.f32.mrb[29].mxu1  ;;  %31262 = vmatmul.mubr.f32.vlgmr.msra.gmra.mrb[38].mxu1 %v34656_v59 }
 0x373   :  { %31235 = vmatpush3.msra.mxu0 %v32978_v41  ;;  %31265 = vmatpush3.msra.mxu1 %v32985_v45  ;;  %v18241_v41 = vand.u32 4294901760, %v18240_v33  ;;  %v18690_v45 = vand.u32 4294901760, %v18689_v23  ;;  %v20035_v15 = vand.u32 4294901760, %v20034_v6  ;;  %v36199_v23 = vld [vmem:[#allocation9_spill] sm:$0xff] }
 0x374   :  { %31236 = vmatprep.mubr.msk.f32.mxu0 %vm32634_vm2, %v36106_v43  ;;  %31266 = vmatprep.mubr.msk.f32.mxu1 %vm32634_vm2, %v36106_v43 }
 0x375   :  { %31269 = vmatprep.subr.mxu0 %v36106_v43  ;;  %31299 = vmatprep.subr.mxu1 %v36106_v43 }
 0x37a   :  { %31237 = vmatmul.mubr.f32.vlgmr.msra.gmra.mrb[38].mxu0 %v34653_v31  ;;  %31267 = vmatmul.mubr.f32.vlgmr.msra.gmra.mrb[38].mxu1 %v34656_v59 }
 0x37b   :  { %31270 = vmatpush3.msra.mxu0 %v33088_v24  ;;  %31300 = vmatpush3.msra.mxu1 %v33095_v30 }
 0x37c   :  { %31271 = vmatprep.mubr.msk.f32.mxu0 %vm32634_vm2, %v36106_v43  ;;  %31274 = vmatprep.subr.mxu0 %v36106_v43 }
 0x37d   :  { %31301 = vmatprep.mubr.msk.f32.mxu1 %vm32634_vm2, %v36106_v43  ;;  %31304 = vmatprep.subr.mxu1 %v36106_v43 }
 0x37e   :  { %31272 = vmatmul.mubr.f32.vlgmr.msra.gmra.mrb[40].mxu0 %v18241_v41  ;;  %31302 = vmatmul.mubr.f32.vlgmr.msra.gmra.mrb[40].mxu1 %v18690_v45  ;;  %v36200_v45 = vld [vmem:[#allocation10_spill] sm:$0xff] }
 0x37f   :  { %31275 = vmatpush3.msra.mxu0 %v33140_v60  ;;  %31305 = vmatpush3.msra.mxu1 %v33145_v62 }
 0x380   :  { %31276 = vmatprep.mubr.msk.f32.mxu0 %vm32634_vm2, %v36106_v43  ;;  %31279 = vmatprep.subr.mxu0 %v36106_v43 }
 0x381   :  { %31306 = vmatprep.mubr.msk.f32.mxu1 %vm32634_vm2, %v36106_v43  ;;  %31309 = vmatprep.subr.mxu1 %v36106_v43 }
 0x386   :  { %31277 = vmatmul.mubr.f32.vlgmr.msra.gmra.mrb[40].mxu0 %v34725_v54  ;;  %31307 = vmatmul.mubr.f32.vlgmr.msra.gmra.mrb[40].mxu1 %v34728_v56 }
 0x387   :  { %31280 = vmatpush3.msra.mxu0 %v33105_v32  ;;  %31310 = vmatpush3.msra.mxu1 %v33111_v34  ;;  %v14554_v32 = vld [vmem:[%s35970_s1 + $0x14] sm:$0x3]  ;;  %v14555_v34 = vld [vmem:[%s35970_s1 + $0x16] sm:$0x3] }
 0x388   :  { %31281 = vmatprep.mubr.msk.f32.mxu0 %vm32634_vm2, %v36106_v43  ;;  %31284 = vmatprep.subr.mxu0 %v36106_v43  ;;  %v19067_v60 = vsel %vm78_vm1, %v14554_v32, 0  ;;  %v19516_v62 = vsel %vm78_vm1, %v14555_v34, 0  ;;  %v36201_v32 = vld [vmem:[#allocation17_spill] sm:$0xff]  ;;  %v36202_v34 = vld [vmem:[#allocation18_spill] sm:$0xff] }
 0x389   :  { %31311 = vmatprep.mubr.msk.f32.mxu1 %vm32634_vm2, %v36106_v43  ;;  %31314 = vmatprep.subr.mxu1 %v36106_v43  ;;  %v34797_v20 = vand.u32 4294901760, %v19067_v60  ;;  %v34800_v19 = vand.u32 4294901760, %v19516_v62 }
 0x38b   :  { %v19136_v38 = vsub.f32 %v19067_v60, %v34797_v20  ;;  %v19585_v40 = vsub.f32 %v19516_v62, %v34800_v19  ;;  %v36203_v60 = vld [vmem:[#allocation11_spill] sm:$0xff]  ;;  %v36204_v62 = vld [vmem:[#allocation12_spill] sm:$0xff] }
 0x38d   :  { %v19586_v29 = vand.u32 4294901760, %v19585_v40 }
 0x38e   :  { %31282 = vmatmul.mubr.f32.vlgmr.msra.gmra.mrb[40].mxu0 %v18238_v1  ;;  %31312 = vmatmul.mubr.f32.vlgmr.msra.gmra.mrb[40].mxu1 %v18687_v10 }
 0x38f   :  { %31285 = vmatpush3.msra.mxu0 %v33088_v24  ;;  %31315 = vmatpush3.msra.mxu1 %v33095_v30  ;;  %v19587_v59 = vsub.f32 %v19585_v40, %v19586_v29 }
 0x390   :  { %31286 = vmatprep.mubr.msk.f32.mxu0 %vm32634_vm2, %v36106_v43  ;;  %31289 = vmatprep.subr.mxu0 %v36106_v43 }
 0x391   :  { %31316 = vmatprep.mubr.msk.f32.mxu1 %vm32634_vm2, %v36106_v43  ;;  %31319 = vmatprep.subr.mxu1 %v36106_v43 }
 0x396   :  { %31287 = vmatmul.mubr.f32.vlgmr.msra.gmra.mrb[40].mxu0 %v18239_v57  ;;  %31317 = vmatmul.mubr.f32.vlgmr.msra.gmra.mrb[40].mxu1 %v18688_v48  ;;  %v20036_v48 = vsub.f32 %v20034_v6, %v20035_v15 }
 0x397   :  { %31290 = vmatpush3.msra.mxu0 %v33118_v36  ;;  %31320 = vmatpush3.msra.mxu1 %v33125_v47  ;;  %v19137_v47 = vand.u32 4294901760, %v19136_v38 }
 0x398   :  { %31291 = vmatprep.mubr.msk.f32.mxu0 %vm32634_vm2, %v36106_v43  ;;  %31294 = vmatprep.subr.mxu0 %v36106_v43 }
 0x399   :  { %31321 = vmatprep.mubr.msk.f32.mxu1 %vm32634_vm2, %v36106_v43  ;;  %31324 = vmatprep.subr.mxu1 %v36106_v43  ;;  %v19138_v31 = vsub.f32 %v19136_v38, %v19137_v47 }
 0x39d   :  { %v34811_v36 = vpop.f32.mrb[30].mxu0  ;;  %v34813_v7 = vpop.f32.mrb[30].mxu1 }
 0x39e   :  { %v30998_v11 = vpop.f32.mrb[31].mxu0  ;;  %31292 = vmatmul.mubr.f32.vlgmr.msra.gmra.mrb[40].mxu0 %v34725_v54  ;;  %v31028_v25 = vpop.f32.mrb[31].mxu1  ;;  %31322 = vmatmul.mubr.f32.vlgmr.msra.gmra.mrb[40].mxu1 %v34728_v56 }
 0x39f   :  { %31295 = vmatpush3.msra.mxu0 %v33088_v24  ;;  %31325 = vmatpush3.msra.mxu1 %v33095_v30  ;;  %v19139_v24 = vand.u32 4294901760, %v19138_v31  ;;  %v19588_v30 = vand.u32 4294901760, %v19587_v59  ;;  %v36205_v11 = vld [vmem:[#allocation15_spill] sm:$0xff] }
 0x3a0   :  { %31296 = vmatprep.mubr.msk.f32.mxu0 %vm32634_vm2, %v36106_v43  ;;  %31326 = vmatprep.mubr.msk.f32.mxu1 %vm32634_vm2, %v36106_v43 }
 0x3a1   :  { %31329 = vmatprep.subr.mxu0 %v36106_v43  ;;  %31359 = vmatprep.subr.mxu1 %v36106_v43 }
 0x3a6   :  { %31297 = vmatmul.mubr.f32.vlgmr.msra.gmra.mrb[40].mxu0 %v34725_v54  ;;  %31327 = vmatmul.mubr.f32.vlgmr.msra.gmra.mrb[40].mxu1 %v34728_v56  ;;  %v34883_v54 = vsub.f32 %v20414_v3, %v34872_v51 }
 0x3a7   :  { %31330 = vmatpush3.msra.mxu0 %v33198_v21  ;;  %31360 = vmatpush3.msra.mxu1 %v36192_v37 }
 0x3a8   :  { %31331 = vmatprep.mubr.msk.f32.mxu0 %vm32634_vm2, %v36106_v43  ;;  %31334 = vmatprep.subr.mxu0 %v36106_v43  ;;  %v20484_v27 = vand.u32 4294901760, %v34883_v54 }
 0x3a9   :  { %31361 = vmatprep.mubr.msk.f32.mxu1 %vm32634_vm2, %v36106_v43  ;;  %31364 = vmatprep.subr.mxu1 %v36106_v43 }
 0x3aa   :  { %31332 = vmatmul.mubr.f32.vlgmr.msra.gmra.mrb[42].mxu0 %v19139_v24  ;;  %31362 = vmatmul.mubr.f32.vlgmr.msra.gmra.mrb[42].mxu1 %v19588_v30  ;;  %v20485_v33 = vsub.f32 %v34883_v54, %v20484_v27 }
 0x3ab   :  { %31335 = vmatpush3.msra.mxu0 %v36193_v4  ;;  %31365 = vmatpush3.msra.mxu1 %v36194_v58 }
 0x3ac   :  { %31336 = vmatprep.mubr.msk.f32.mxu0 %vm32634_vm2, %v36106_v43  ;;  %31339 = vmatprep.subr.mxu0 %v36106_v43  ;;  %v20486_v41 = vand.u32 4294901760, %v20485_v33 }
 0x3ad   :  { %31366 = vmatprep.mubr.msk.f32.mxu1 %vm32634_vm2, %v36106_v43  ;;  %31369 = vmatprep.subr.mxu1 %v36106_v43 }
 0x3b2   :  { %31337 = vmatmul.mubr.f32.vlgmr.msra.gmra.mrb[42].mxu0 %v34797_v20  ;;  %31367 = vmatmul.mubr.f32.vlgmr.msra.gmra.mrb[42].mxu1 %v34800_v19 }
 0x3b3   :  { %31340 = vmatpush3.msra.mxu0 %v36195_v17  ;;  %31370 = vmatpush3.msra.mxu1 %v36196_v8 }
 0x3b4   :  { %31341 = vmatprep.mubr.msk.f32.mxu0 %vm32634_vm2, %v36106_v43  ;;  %31344 = vmatprep.subr.mxu0 %v36106_v43 }
 0x3b5   :  { %31371 = vmatprep.mubr.msk.f32.mxu1 %vm32634_vm2, %v36106_v43  ;;  %31374 = vmatprep.subr.mxu1 %v36106_v43 }
 0x3ba   :  { %31342 = vmatmul.mubr.f32.vlgmr.msra.gmra.mrb[42].mxu0 %v19136_v38  ;;  %31372 = vmatmul.mubr.f32.vlgmr.msra.gmra.mrb[42].mxu1 %v19585_v40 }
 0x3bb   :  { %31345 = vmatpush3.msra.mxu0 %v33198_v21  ;;  %31375 = vmatpush3.msra.mxu1 %v36192_v37 }
 0x3bc   :  { %31346 = vmatprep.mubr.msk.f32.mxu0 %vm32634_vm2, %v36106_v43  ;;  %31349 = vmatprep.subr.mxu0 %v36106_v43 }
 0x3bd   :  { %31376 = vmatprep.mubr.msk.f32.mxu1 %vm32634_vm2, %v36106_v43  ;;  %31379 = vmatprep.subr.mxu1 %v36106_v43 }
 0x3c2   :  { %31347 = vmatmul.mubr.f32.vlgmr.msra.gmra.mrb[42].mxu0 %v19137_v47  ;;  %31377 = vmatmul.mubr.f32.vlgmr.msra.gmra.mrb[42].mxu1 %v19586_v29  ;;  %v36206_v29 = vld [vmem:[#allocation16_spill] sm:$0xff] }
 0x3c3   :  { %31350 = vmatpush3.msra.mxu0 %v36197_v49  ;;  %31380 = vmatpush3.msra.mxu1 %v36198_v63  ;;  %v36208_v49 = vld [vmem:[#allocation20_spill] sm:$0xff]  ;;  %v36211_v63 = vld [vmem:[#allocation21_spill] sm:$0xff] }
 0x3c4   :  { %31351 = vmatprep.mubr.msk.f32.mxu0 %vm32634_vm2, %v36106_v43  ;;  %31354 = vmatprep.subr.mxu0 %v36106_v43 }
 0x3c5   :  { %31381 = vmatprep.mubr.msk.f32.mxu1 %vm32634_vm2, %v36106_v43  ;;  %31384 = vmatprep.subr.mxu1 %v36106_v43 }
 0x3c9   :  { %v15021_v56 = vpop.f32.mrb[32].mxu0  ;;  %v15470_v1 = vpop.f32.mrb[32].mxu1 }
 0x3ca   :  { %31352 = vmatmul.mubr.f32.vlgmr.msra.gmra.mrb[42].mxu0 %v34797_v20  ;;  %28976 = vrot.lane.b32.xlu0 %v15021_v56, %s32635_s4  ;;  %v31058_v10 = vpop.f32.mrb[33].mxu0  ;;  %v31088_v57 = vpop.f32.mrb[33].mxu1 }
 0x3cb   :  { %31382 = vmatmul.mubr.f32.vlgmr.msra.gmra.mrb[42].mxu1 %v34800_v19  ;;  %29106 = vrot.lane.b32.xlu1 %v15470_v1, %s32636_s0 }
 0x3cc   :  { %31385 = vmatpush3.msra.mxu1 %v36192_v37  ;;  %31355 = vmatpush3.msra.mxu0 %v33198_v21  ;;  %v20037_v21 = vand.u32 4294901760, %v20036_v48  ;;  %v36214_v48 = vld [vmem:[#allocation26_spill] sm:$0xff] }
 0x3cd   :  { %31356 = vmatprep.mubr.msk.f32.mxu0 %vm32634_vm2, %v36106_v43  ;;  %31386 = vmatprep.mubr.msk.f32.mxu1 %vm32634_vm2, %v36106_v43 }
 0x3ce   :  { %28978 = vrot.lane.b32.xlu0 %v15470_v1, %s32635_s4  ;;  %31389 = vmatprep.subr.mxu0 %v36106_v43 }
 0x3cf   :  { %31419 = vmatprep.subr.mxu1 %v36106_v43 }
 0x3d2   :  { %31357 = vmatmul.mubr.f32.vlgmr.msra.gmra.mrb[42].mxu0 %v34797_v20  ;;  %29104 = vrot.lane.b32.xlu0 %v15021_v56, %s32636_s0  ;;  %v14558_v20 = vld [vmem:[%s35970_s1 + $0x1c] sm:$0x3]  ;;  %v14561_v56 = vld [vmem:[%s35970_s1 + $0x22] sm:$0x3] }
 0x3d3   :  { %31387 = vmatmul.mubr.f32.vlgmr.msra.gmra.mrb[42].mxu1 %v34800_v19  ;;  %31390 = vmatpush3.msra.mxu0 %v36199_v23  ;;  %v14559_v19 = vld [vmem:[%s35970_s1 + $0x1e] sm:$0x3]  ;;  %v20863_v38 = vsel %vm78_vm1, %v14558_v20, 0  ;;  %v22210_v10 = vsel %vm78_vm1, %v14561_v56, 0  ;;  %v36223_v56 = vld [vmem:[#allocation35_spill] sm:$0xff] }
 0x3d4   :  { %31420 = vmatpush3.msra.mxu1 %v36200_v45  ;;  %31391 = vmatprep.mubr.msk.f32.mxu0 %vm32634_vm2, %v36106_v43  ;;  %v21312_v40 = vsel %vm78_vm1, %v14559_v19, 0  ;;  %v34947_v47 = vand.u32 4294901760, %v20863_v38  ;;  %v35020_v57 = vand.u32 4294901760, %v22210_v10 }
 0x3d5   :  { %31394 = vmatprep.subr.mxu0 %v36106_v43  ;;  %31421 = vmatprep.mubr.msk.f32.mxu1 %vm32634_vm2, %v36106_v43  ;;  %v34949_v25 = vand.u32 4294901760, %v21312_v40 }
 0x3d6   :  { %31424 = vmatprep.subr.mxu1 %v36106_v43  ;;  %31392 = vmatmul.mubr.f32.vlgmr.msra.gmra.mrb[44].mxu0 %v20037_v21  ;;  %v20932_v31 = vsub.f32 %v20863_v38, %v34947_v47  ;;  %v35034_v21 = vsub.f32 %v22210_v10, %v35020_v57 }
 0x3d7   :  { %31395 = vmatpush3.msra.mxu0 %v36201_v32  ;;  %31422 = vmatmul.mubr.f32.vlgmr.msra.gmra.mrb[44].mxu1 %v20486_v41  ;;  %v21381_v59 = vsub.f32 %v21312_v40, %v34949_v25  ;;  %v36215_v40 = vld [vmem:[#allocation29_spill] sm:$0xff] }
 0x3d8   :  { %31425 = vmatpush3.msra.mxu1 %v36202_v34  ;;  %31396 = vmatprep.mubr.msk.f32.mxu0 %vm32634_vm2, %v36106_v43  ;;  %v20933_v58 = vand.u32 4294901760, %v20932_v31 }
 0x3d9   :  { %31399 = vmatprep.subr.mxu0 %v36106_v43  ;;  %31426 = vmatprep.mubr.msk.f32.mxu1 %vm32634_vm2, %v36106_v43  ;;  %v21382_v17 = vand.u32 4294901760, %v21381_v59 }
 0x3da   :  { %31429 = vmatprep.subr.mxu1 %v36106_v43  ;;  %v20934_v8 = vsub.f32 %v20932_v31, %v20933_v58 }
 0x3db   :  { %v21383_v9 = vsub.f32 %v21381_v59, %v21382_v17 }
 0x3dc   :  { %v20935_v44 = vand.u32 4294901760, %v20934_v8  ;;  %v14563_v8 = vld [vmem:[%s35970_s1 + $0x26] sm:$0x3] }
 0x3dd   :  { %v21384_v3 = vand.u32 4294901760, %v21383_v9 }
 0x3de   :  { %31397 = vmatmul.mubr.f32.vlgmr.msra.gmra.mrb[44].mxu0 %v34869_v5 }
 0x3df   :  { %31400 = vmatpush3.msra.mxu0 %v36203_v60  ;;  %31427 = vmatmul.mubr.f32.vlgmr.msra.gmra.mrb[44].mxu1 %v34872_v51  ;;  %v22280_v60 = vand.u32 4294901760, %v35034_v21 }
 0x3e0   :  { %31430 = vmatpush3.msra.mxu1 %v36204_v62  ;;  %31401 = vmatprep.mubr.msk.f32.mxu0 %vm32634_vm2, %v36106_v43 }
 0x3e1   :  { %31404 = vmatprep.subr.mxu0 %v36106_v43  ;;  %31431 = vmatprep.mubr.msk.f32.mxu1 %vm32634_vm2, %v36106_v43  ;;  %v22281_v20 = vsub.f32 %v35034_v21, %v22280_v60 }
 0x3e2   :  { %31434 = vmatprep.subr.mxu1 %v36106_v43 }
 0x3e3   :  { %v22282_v38 = vand.u32 4294901760, %v22281_v20  ;;  %v36225_v20 = vld [vmem:[#allocation39_spill] sm:$0xff] }
 0x3e6   :  { %31402 = vmatmul.mubr.f32.vlgmr.msra.gmra.mrb[44].mxu0 %v20034_v6  ;;  %v36212_v6 = vld [vmem:[#allocation22_spill] sm:$0xff] }
 0x3e7   :  { %31405 = vmatpush3.msra.mxu0 %v36199_v23  ;;  %31432 = vmatmul.mubr.f32.vlgmr.msra.gmra.mrb[44].mxu1 %v34883_v54  ;;  %v14560_v54 = vld [vmem:[%s35970_s1 + $0x20] sm:$0x3] }
 0x3e8   :  { %31435 = vmatpush3.msra.mxu1 %v36200_v45  ;;  %31406 = vmatprep.mubr.msk.f32.mxu0 %vm32634_vm2, %v36106_v43  ;;  %v21761_v1 = vsel %vm78_vm1, %v14560_v54, 0 }
 0x3e9   :  { %31409 = vmatprep.subr.mxu0 %v36106_v43  ;;  %31436 = vmatprep.mubr.msk.f32.mxu1 %vm32634_vm2, %v36106_v43 }
 0x3ea   :  { %31439 = vmatprep.subr.mxu1 %v36106_v43 }
 0x3ee   :  { %31407 = vmatmul.mubr.f32.vlgmr.msra.gmra.mrb[44].mxu0 %v20035_v15  ;;  %v35018_v15 = vand.u32 4294901760, %v21761_v1 }
 0x3ef   :  { %31410 = vmatpush3.msra.mxu0 %v36205_v11  ;;  %31437 = vmatmul.mubr.f32.vlgmr.msra.gmra.mrb[44].mxu1 %v20484_v27  ;;  %v36213_v27 = vld [vmem:[#allocation25_spill] sm:$0xff]  ;;  %v36216_v11 = vld [vmem:[#allocation30_spill] sm:$0xff] }
 0x3f0   :  { %31440 = vmatpush3.msra.mxu1 %v36206_v29  ;;  %31411 = vmatprep.mubr.msk.f32.mxu0 %vm32634_vm2, %v36106_v43  ;;  %v35031_v33 = vsub.f32 %v21761_v1, %v35018_v15  ;;  %v36219_v29 = vld [vmem:[#allocation31_spill] sm:$0xff]  ;;  %v36224_v1 = vld [vmem:[#allocation36_spill] sm:$0xff] }
 0x3f1   :  { %31414 = vmatprep.subr.mxu0 %v36106_v43  ;;  %31441 = vmatprep.mubr.msk.f32.mxu1 %vm32634_vm2, %v36106_v43 }
 0x3f2   :  { %31444 = vmatprep.subr.mxu1 %v36106_v43  ;;  %v21831_v34 = vand.u32 4294901760, %v35031_v33 }
 0x3f4   :  { %v21832_v62 = vsub.f32 %v35031_v33, %v21831_v34 }
 0x3f5   :  { %v15919_v24 = vpop.f32.mrb[34].mxu0  ;;  %v16368_v30 = vpop.f32.mrb[34].mxu1 }
 0x3f6   :  { %31412 = vmatmul.mubr.f32.vlgmr.msra.gmra.mrb[44].mxu0 %v34869_v5  ;;  %29108 = vrot.lane.b32.xlu0 %v15919_v24, %s32636_s0  ;;  %v31118_v37 = vpop.f32.mrb[35].mxu0  ;;  %v31148_v4 = vpop.f32.mrb[35].mxu1  ;;  %v21833_v19 = vand.u32 4294901760, %v21832_v62 }
 0x3f7   :  { %31415 = vmatpush3.msra.mxu0 %v36199_v23  ;;  %31442 = vmatmul.mubr.f32.vlgmr.msra.gmra.mrb[44].mxu1 %v34872_v51  ;;  %v36221_v37 = vld [vmem:[#allocation14_spill] sm:$0xff] }
 0x3f8   :  { %31445 = vmatpush3.msra.mxu1 %v36200_v45  ;;  %28980 = vrot.lane.b32.xlu1 %v15919_v24, %s32635_s4 }
 0x3f9   :  { %31416 = vmatprep.mubr.msk.f32.mxu0 %vm32634_vm2, %v36106_v43  ;;  %31446 = vmatprep.mubr.msk.f32.mxu1 %vm32634_vm2, %v36106_v43 }
 0x3fa   :  { %31449 = vmatprep.subr.mxu0 %v36106_v43  ;;  %31479 = vmatprep.subr.mxu1 %v36106_v43 }
 0x3fc   :  { %28982 = vrot.lane.b32.xlu1 %v16368_v30, %s32635_s4 }
 0x3fe   :  { %31417 = vmatmul.mubr.f32.vlgmr.msra.gmra.mrb[44].mxu0 %v34869_v5  ;;  %v36209_v5 = vld [vmem:[#allocation27_spill] sm:$0xff] }
 0x3ff   :  { %31447 = vmatmul.mubr.f32.vlgmr.msra.gmra.mrb[44].mxu1 %v34872_v51  ;;  %31450 = vmatpush3.msra.mxu0 %v36207_v42  ;;  %v36210_v51 = vld [vmem:[#allocation28_spill] sm:$0xff] }
 0x400   :  { %31480 = vmatpush3.msra.mxu1 %v36208_v49  ;;  %29110 = vrot.lane.b32.xlu1 %v16368_v30, %s32636_s0 }
 0x401   :  { %31451 = vmatprep.mubr.msk.f32.mxu0 %vm32634_vm2, %v36106_v43  ;;  %31454 = vmatprep.subr.mxu0 %v36106_v43 }
 0x402   :  { %31481 = vmatprep.mubr.msk.f32.mxu1 %vm32634_vm2, %v36106_v43  ;;  %31484 = vmatprep.subr.mxu1 %v36106_v43 }
 0x403   :  { %31452 = vmatmul.mubr.f32.vlgmr.msra.gmra.mrb[46].mxu0 %v20935_v44  ;;  %31482 = vmatmul.mubr.f32.vlgmr.msra.gmra.mrb[46].mxu1 %v21384_v3  ;;  %v23108_v3 = vsel %vm78_vm1, %v14563_v8, 0  ;;  %v36232_v8 = vld [vmem:[#allocation24_spill] sm:$0xff] }
 0x404   :  { %31455 = vmatpush3.msra.mxu0 %v36209_v5  ;;  %31485 = vmatpush3.msra.mxu1 %v36210_v51  ;;  %v35120_v54 = vand.u32 4294901760, %v23108_v3 }
 0x405   :  { %31456 = vmatprep.mubr.msk.f32.mxu0 %vm32634_vm2, %v36106_v43  ;;  %31459 = vmatprep.subr.mxu0 %v36106_v43 }
 0x406   :  { %31486 = vmatprep.mubr.msk.f32.mxu1 %vm32634_vm2, %v36106_v43  ;;  %31489 = vmatprep.subr.mxu1 %v36106_v43 }
 0x40b   :  { %31457 = vmatmul.mubr.f32.vlgmr.msra.gmra.mrb[46].mxu0 %v34947_v47  ;;  %31487 = vmatmul.mubr.f32.vlgmr.msra.gmra.mrb[46].mxu1 %v34949_v25 }
 0x40c   :  { %31460 = vmatpush3.msra.mxu0 %v36211_v63  ;;  %31490 = vmatpush3.msra.mxu1 %v36212_v6 }
 0x40d   :  { %31461 = vmatprep.mubr.msk.f32.mxu0 %vm32634_vm2, %v36106_v43  ;;  %31464 = vmatprep.subr.mxu0 %v36106_v43 }
 0x40e   :  { %31491 = vmatprep.mubr.msk.f32.mxu1 %vm32634_vm2, %v36106_v43  ;;  %31494 = vmatprep.subr.mxu1 %v36106_v43 }
 0x413   :  { %31462 = vmatmul.mubr.f32.vlgmr.msra.gmra.mrb[46].mxu0 %v20932_v31  ;;  %31492 = vmatmul.mubr.f32.vlgmr.msra.gmra.mrb[46].mxu1 %v21381_v59  ;;  %v36220_v31 = vld [vmem:[#allocation32_spill] sm:$0xff] }
 0x414   :  { %31465 = vmatpush3.msra.mxu0 %v36207_v42  ;;  %31495 = vmatpush3.msra.mxu1 %v36208_v49 }
 0x415   :  { %31466 = vmatprep.mubr.msk.f32.mxu0 %vm32634_vm2, %v36106_v43  ;;  %31469 = vmatprep.subr.mxu0 %v36106_v43 }
 0x416   :  { %31496 = vmatprep.mubr.msk.f32.mxu1 %vm32634_vm2, %v36106_v43  ;;  %31499 = vmatprep.subr.mxu1 %v36106_v43 }
 0x41b   :  { %31467 = vmatmul.mubr.f32.vlgmr.msra.gmra.mrb[46].mxu0 %v20933_v58  ;;  %31497 = vmatmul.mubr.f32.vlgmr.msra.gmra.mrb[46].mxu1 %v21382_v17  ;;  %v14562_v17 = vld [vmem:[%s35970_s1 + $0x24] sm:$0x3] }
 0x41c   :  { %31470 = vmatpush3.msra.mxu0 %v36213_v27  ;;  %31500 = vmatpush3.msra.mxu1 %v36214_v48  ;;  %v22659_v44 = vsel %vm78_vm1, %v14562_v17, 0  ;;  %v35138_v27 = vsub.f32 %v23108_v3, %v35120_v54 }
 0x41d   :  { %31471 = vmatprep.mubr.msk.f32.mxu0 %vm32634_vm2, %v36106_v43  ;;  %31474 = vmatprep.subr.mxu0 %v36106_v43  ;;  %v35118_v6 = vand.u32 4294901760, %v22659_v44 }
 0x41e   :  { %31501 = vmatprep.mubr.msk.f32.mxu1 %vm32634_vm2, %v36106_v43  ;;  %31504 = vmatprep.subr.mxu1 %v36106_v43 }
 0x41f   :  { %v35135_v10 = vsub.f32 %v22659_v44, %v35118_v6 }
 0x421   :  { %v16817_v23 = vpop.f32.mrb[36].mxu0  ;;  %v17266_v41 = vpop.f32.mrb[36].mxu1 }
 0x422   :  { %28984 = vrot.lane.b32.xlu0 %v16817_v23, %s32635_s4  ;;  %v31178_v45 = vpop.f32.mrb[37].mxu0  ;;  %v31208_v32 = vpop.f32.mrb[37].mxu1  ;;  %28986 = vrot.lane.b32.xlu1 %v17266_v41, %s32635_s4 }
 0x423   :  { %31472 = vmatmul.mubr.f32.vlgmr.msra.gmra.mrb[46].mxu0 %v34947_v47  ;;  %31502 = vmatmul.mubr.f32.vlgmr.msra.gmra.mrb[46].mxu1 %v34949_v25  ;;  %v23178_v45 = vand.u32 4294901760, %v35138_v27 }
 0x424   :  { %31475 = vmatpush3.msra.mxu0 %v36207_v42  ;;  %31505 = vmatpush3.msra.mxu1 %v36208_v49  ;;  %v36222_v49 = vld [vmem:[#allocation13_spill] sm:$0xff] }
 0x425   :  { %31476 = vmatprep.mubr.msk.f32.mxu0 %vm32634_vm2, %v36106_v43  ;;  %31506 = vmatprep.mubr.msk.f32.mxu1 %vm32634_vm2, %v36106_v43 }
 0x426   :  { %29112 = vrot.lane.b32.xlu0 %v16817_v23, %s32636_s0  ;;  %31509 = vmatprep.subr.mxu0 %v36106_v43 }
 0x427   :  { %31539 = vmatprep.subr.mxu1 %v36106_v43  ;;  %29114 = vrot.lane.b32.xlu1 %v17266_v41, %s32636_s0  ;;  %v22729_v41 = vand.u32 4294901760, %v35135_v10 }
 0x429   :  { %v22730_v32 = vsub.f32 %v35135_v10, %v22729_v41 }
 0x42b   :  { %31477 = vmatmul.mubr.f32.vlgmr.msra.gmra.mrb[46].mxu0 %v34947_v47  ;;  %31507 = vmatmul.mubr.f32.vlgmr.msra.gmra.mrb[46].mxu1 %v34949_v25  ;;  %v36217_v47 = vld [vmem:[#allocation37_spill] sm:$0xff]  ;;  %v36218_v25 = vld [vmem:[#allocation38_spill] sm:$0xff] }
 0x42c   :  { %31510 = vmatpush3.msra.mxu0 %v36215_v40  ;;  %31540 = vmatpush3.msra.mxu1 %v36216_v11 }
 0x42d   :  { %31511 = vmatprep.mubr.msk.f32.mxu0 %vm32634_vm2, %v36106_v43  ;;  %31514 = vmatprep.subr.mxu0 %v36106_v43 }
 0x42e   :  { %31541 = vmatprep.mubr.msk.f32.mxu1 %vm32634_vm2, %v36106_v43  ;;  %31544 = vmatprep.subr.mxu1 %v36106_v43 }
 0x42f   :  { %31512 = vmatmul.mubr.f32.vlgmr.msra.gmra.mrb[48].mxu0 %v21833_v19  ;;  %31542 = vmatmul.mubr.f32.vlgmr.msra.gmra.mrb[48].mxu1 %v22282_v38  ;;  %v36226_v19 = vld [vmem:[#allocation40_spill] sm:$0xff]  ;;  %v36229_v38 = vld [vmem:[#allocation41_spill] sm:$0xff] }
 0x430   :  { %31515 = vmatpush3.msra.mxu0 %v36217_v47  ;;  %31545 = vmatpush3.msra.mxu1 %v36218_v25  ;;  %v36231_v47 = vld [vmem:[#allocation23_spill] sm:$0xff] }
 0x431   :  { %31516 = vmatprep.mubr.msk.f32.mxu0 %vm32634_vm2, %v36106_v43  ;;  %31519 = vmatprep.subr.mxu0 %v36106_v43 }
 0x432   :  { %31546 = vmatprep.mubr.msk.f32.mxu1 %vm32634_vm2, %v36106_v43  ;;  %31549 = vmatprep.subr.mxu1 %v36106_v43 }
 0x437   :  { %31517 = vmatmul.mubr.f32.vlgmr.msra.gmra.mrb[48].mxu0 %v35018_v15  ;;  %31547 = vmatmul.mubr.f32.vlgmr.msra.gmra.mrb[48].mxu1 %v35020_v57 }
 0x438   :  { %31520 = vmatpush3.msra.mxu0 %v36219_v29  ;;  %31550 = vmatpush3.msra.mxu1 %v36220_v31 }
 0x439   :  { %31521 = vmatprep.mubr.msk.f32.mxu0 %vm32634_vm2, %v36106_v43  ;;  %31524 = vmatprep.subr.mxu0 %v36106_v43 }
 0x43a   :  { %31551 = vmatprep.mubr.msk.f32.mxu1 %vm32634_vm2, %v36106_v43  ;;  %31554 = vmatprep.subr.mxu1 %v36106_v43 }
 0x43c   :  { %v28977_v59 = vpop.permute.xlu0 %28976 }
 0x43d   :  { %v29107_v24 = vpop.permute.xlu1 %29106  ;;  %v29072_v5 = vsub.f32 %v36222_v49, %v28977_v59 }
 0x43e   :  { %v29201_v4 = vadd.f32 %v29107_v24, %v36221_v37  ;;  %v14564_v24 = vld [vmem:[%s35970_s1 + $0x28] sm:$0x3] }
 0x43f   :  { %31522 = vmatmul.mubr.f32.vlgmr.msra.gmra.mrb[48].mxu0 %v35031_v33  ;;  %31552 = vmatmul.mubr.f32.vlgmr.msra.gmra.mrb[48].mxu1 %v35034_v21 }
 0x440   :  { %31525 = vmatpush3.msra.mxu0 %v36215_v40  ;;  %31555 = vmatpush3.msra.mxu1 %v36216_v11  ;;  %v28979_v30 = vpop.permute.xlu0 %28978 }
 0x441   :  { %v29073_v58 = vsub.f32 %v36221_v37, %v28979_v30  ;;  %31526 = vmatprep.mubr.msk.f32.mxu0 %vm32634_vm2, %v36106_v43  ;;  %31529 = vmatprep.subr.mxu0 %v36106_v43  ;;  %v14565_v30 = vld [vmem:[%s35970_s1 + $0x2a] sm:$0x3] }
 0x442   :  { %31556 = vmatprep.mubr.msk.f32.mxu1 %vm32634_vm2, %v36106_v43  ;;  %31559 = vmatprep.subr.mxu1 %v36106_v43 }
 0x443   :  { %v29233_v9 = vsel %vm78_vm1, %v29073_v58, %v29201_v4  ;;  %v23557_v4 = vsel %vm78_vm1, %v14564_v24, 0  ;;  %v24006_v58 = vsel %vm78_vm1, %v14565_v30, 0 }
 0x444   :  { %29266 = vst.msk [vmem:[%s35971_s3 + $0x2] sm:$0x3] %vm29264_vm3, %v29233_v9  ;;  %v29105_v42 = vpop.permute.xlu0 %29104  ;;  %v35213_v44 = vand.u32 4294901760, %v23557_v4  ;;  %v35215_v3 = vand.u32 4294901760, %v24006_v58 }
 0x445   :  { %v29200_v51 = vadd.f32 %v29105_v42, %v36222_v49  ;;  %v36233_v49 = vld [vmem:[#allocation45_spill] sm:$0xff] }
 0x447   :  { %v29232_v63 = vsel %vm78_vm1, %v29072_v5, %v29200_v51  ;;  %31527 = vmatmul.mubr.f32.vlgmr.msra.gmra.mrb[48].mxu0 %v21831_v34  ;;  %31557 = vmatmul.mubr.f32.vlgmr.msra.gmra.mrb[48].mxu1 %v22280_v60  ;;  %v23179_v34 = vsub.f32 %v35138_v27, %v23178_v45  ;;  %v22731_v60 = vand.u32 4294901760, %v22730_v32  ;;  %v36234_v5 = vld [vmem:[#allocation46_spill] sm:$0xff] }
 0x448   :  { %29265 = vst.msk [vmem:[%s35971_s3] sm:$0x3] %vm29264_vm3, %v29232_v63  ;;  %31530 = vmatpush3.msra.mxu0 %v36223_v56  ;;  %31560 = vmatpush3.msra.mxu1 %v36224_v1  ;;  %v35231_v63 = vsub.f32 %v23557_v4, %v35213_v44  ;;  %v35234_v56 = vsub.f32 %v24006_v58, %v35215_v3 }
 0x449   :  { %31531 = vmatprep.mubr.msk.f32.mxu0 %vm32634_vm2, %v36106_v43  ;;  %31534 = vmatprep.subr.mxu0 %v36106_v43  ;;  %v23180_v62 = vand.u32 4294901760, %v23179_v34  ;;  %v36235_v34 = vld [vmem:[#allocation49_spill] sm:$0xff] }
 0x44a   :  { %31561 = vmatprep.mubr.msk.f32.mxu1 %vm32634_vm2, %v36106_v43  ;;  %31564 = vmatprep.subr.mxu1 %v36106_v43 }
 0x44d   :  { %v17715_v48 = vpop.f32.mrb[38].mxu0  ;;  %v18164_v33 = vpop.f32.mrb[38].mxu1 }
 0x44e   :  { %28988 = vrot.lane.b32.xlu0 %v17715_v48, %s32635_s4  ;;  %v31238_v21 = vpop.f32.mrb[39].mxu0  ;;  %v31268_v23 = vpop.f32.mrb[39].mxu1  ;;  %28990 = vrot.lane.b32.xlu1 %v18164_v33, %s32635_s4 }
 0x44f   :  { %31532 = vmatmul.mubr.f32.vlgmr.msra.gmra.mrb[48].mxu0 %v35018_v15  ;;  %31562 = vmatmul.mubr.f32.vlgmr.msra.gmra.mrb[48].mxu1 %v35020_v57  ;;  %v24076_v21 = vand.u32 4294901760, %v35234_v56 }
 0x450   :  { %31535 = vmatpush3.msra.mxu0 %v36215_v40  ;;  %31565 = vmatpush3.msra.mxu1 %v36216_v11  ;;  %v36230_v40 = vld [vmem:[#allocation42_spill] sm:$0xff] }
 0x451   :  { %31536 = vmatprep.mubr.msk.f32.mxu0 %vm32634_vm2, %v36106_v43  ;;  %31566 = vmatprep.mubr.msk.f32.mxu1 %vm32634_vm2, %v36106_v43 }
 0x452   :  { %29116 = vrot.lane.b32.xlu0 %v17715_v48, %s32636_s0  ;;  %31569 = vmatprep.subr.mxu0 %v36106_v43 }
 0x453   :  { %31599 = vmatprep.subr.mxu1 %v36106_v43  ;;  %29118 = vrot.lane.b32.xlu1 %v18164_v33, %s32636_s0  ;;  %v23627_v33 = vand.u32 4294901760, %v35231_v63 }
 0x455   :  { %v23628_v23 = vsub.f32 %v35231_v63, %v23627_v33 }
 0x457   :  { %31537 = vmatmul.mubr.f32.vlgmr.msra.gmra.mrb[48].mxu0 %v35018_v15  ;;  %31567 = vmatmul.mubr.f32.vlgmr.msra.gmra.mrb[48].mxu1 %v35020_v57  ;;  %v36227_v15 = vld [vmem:[#allocation47_spill] sm:$0xff]  ;;  %v36228_v57 = vld [vmem:[#allocation48_spill] sm:$0xff] }
 0x458   :  { %31570 = vmatpush3.msra.mxu0 %v36225_v20  ;;  %31600 = vmatpush3.msra.mxu1 %v36226_v19 }
 0x459   :  { %31571 = vmatprep.mubr.msk.f32.mxu0 %vm32634_vm2, %v36106_v43  ;;  %31574 = vmatprep.subr.mxu0 %v36106_v43 }
 0x45a   :  { %31601 = vmatprep.mubr.msk.f32.mxu1 %vm32634_vm2, %v36106_v43  ;;  %31604 = vmatprep.subr.mxu1 %v36106_v43 }
 0x45b   :  { %31572 = vmatmul.mubr.f32.vlgmr.msra.gmra.mrb[50].mxu0 %v22731_v60  ;;  %31602 = vmatmul.mubr.f32.vlgmr.msra.gmra.mrb[50].mxu1 %v23180_v62  ;;  %v36236_v60 = vld [vmem:[#allocation50_spill] sm:$0xff]  ;;  %v36239_v62 = vld [vmem:[#allocation51_spill] sm:$0xff] }
 0x45c   :  { %31575 = vmatpush3.msra.mxu0 %v36227_v15  ;;  %31605 = vmatpush3.msra.mxu1 %v36228_v57 }
 0x45d   :  { %31576 = vmatprep.mubr.msk.f32.mxu0 %vm32634_vm2, %v36106_v43  ;;  %31579 = vmatprep.subr.mxu0 %v36106_v43 }
 0x45e   :  { %31606 = vmatprep.mubr.msk.f32.mxu1 %vm32634_vm2, %v36106_v43  ;;  %31609 = vmatprep.subr.mxu1 %v36106_v43 }
 0x463   :  { %31577 = vmatmul.mubr.f32.vlgmr.msra.gmra.mrb[50].mxu0 %v35118_v6  ;;  %31607 = vmatmul.mubr.f32.vlgmr.msra.gmra.mrb[50].mxu1 %v35120_v54 }
 0x464   :  { %31580 = vmatpush3.msra.mxu0 %v36229_v38  ;;  %31610 = vmatpush3.msra.mxu1 %v36230_v40  ;;  %v36241_v38 = vld [vmem:[#allocation33_spill] sm:$0xff] }
 0x465   :  { %31581 = vmatprep.mubr.msk.f32.mxu0 %vm32634_vm2, %v36106_v43  ;;  %31584 = vmatprep.subr.mxu0 %v36106_v43 }
 0x466   :  { %31611 = vmatprep.mubr.msk.f32.mxu1 %vm32634_vm2, %v36106_v43  ;;  %31614 = vmatprep.subr.mxu1 %v36106_v43 }
 0x468   :  { %v29109_v11 = vpop.permute.xlu0 %29108 }
 0x469   :  { %v29202_v25 = vadd.f32 %v29109_v11, %v36231_v47 }
 0x46a   :  { %v28981_v29 = vpop.permute.xlu1 %28980 }
 0x46b   :  { %v29074_v31 = vsub.f32 %v36231_v47, %v28981_v29  ;;  %31582 = vmatmul.mubr.f32.vlgmr.msra.gmra.mrb[50].mxu0 %v35135_v10  ;;  %31612 = vmatmul.mubr.f32.vlgmr.msra.gmra.mrb[50].mxu1 %v35138_v27  ;;  %v14566_v47 = vld [vmem:[%s35970_s1 + $0x2c] sm:$0x3] }
 0x46c   :  { %31585 = vmatpush3.msra.mxu0 %v36225_v20  ;;  %31615 = vmatpush3.msra.mxu1 %v36226_v19 }
 0x46d   :  { %v29234_v59 = vsel %vm78_vm1, %v29074_v31, %v29202_v25  ;;  %31586 = vmatprep.mubr.msk.f32.mxu0 %vm32634_vm2, %v36106_v43  ;;  %31589 = vmatprep.subr.mxu0 %v36106_v43  ;;  %v14567_v25 = vld [vmem:[%s35970_s1 + $0x2e] sm:$0x3] }
 0x46e   :  { %29267 = vst.msk [vmem:[%s35971_s3 + $0x4] sm:$0x3] %vm29264_vm3, %v29234_v59  ;;  %v28983_v37 = vpop.permute.xlu1 %28982  ;;  %31616 = vmatprep.mubr.msk.f32.mxu1 %vm32634_vm2, %v36106_v43  ;;  %31619 = vmatprep.subr.mxu1 %v36106_v43  ;;  %v36242_v59 = vld [vmem:[#allocation34_spill] sm:$0xff]  ;;  %v24904_v4 = vsel %vm78_vm1, %v14567_v25, 0 }
 0x46f   :  { %v29075_v9 = vsub.f32 %v36232_v8, %v28983_v37  ;;  %v24455_v37 = vsel %vm78_vm1, %v14566_v47, 0 }
 0x472   :  { %v29111_v17 = vpop.permute.xlu1 %29110 }
 0x473   :  { %v29203_v42 = vadd.f32 %v29111_v17, %v36232_v8  ;;  %31587 = vmatmul.mubr.f32.vlgmr.msra.gmra.mrb[50].mxu0 %v22729_v41  ;;  %31617 = vmatmul.mubr.f32.vlgmr.msra.gmra.mrb[50].mxu1 %v23178_v45  ;;  %v24077_v41 = vsub.f32 %v35234_v56, %v24076_v21  ;;  %v23629_v45 = vand.u32 4294901760, %v23628_v23  ;;  %v35318_v17 = vand.u32 4294901760, %v24455_v37 }
 0x474   :  { %31590 = vmatpush3.msra.mxu0 %v36233_v49  ;;  %31620 = vmatpush3.msra.mxu1 %v36234_v5  ;;  %v35320_v8 = vand.u32 4294901760, %v24904_v4 }
 0x475   :  { %v29235_v51 = vsel %vm78_vm1, %v29075_v9, %v29203_v42  ;;  %31591 = vmatprep.mubr.msk.f32.mxu0 %vm32634_vm2, %v36106_v43  ;;  %31594 = vmatprep.subr.mxu0 %v36106_v43  ;;  %v24078_v32 = vand.u32 4294901760, %v24077_v41  ;;  %v36243_v9 = vld [vmem:[#allocation55_spill] sm:$0xff]  ;;  %v36244_v42 = vld [vmem:[#allocation56_spill] sm:$0xff]  ;;  %v35331_v49 = vsub.f32 %v24455_v37, %v35318_v17  ;;  %v36253_v37 = vld [vmem:[#allocation65_spill] sm:$0xff] }
 0x476   :  { %29268 = vst.msk [vmem:[%s35971_s3 + $0x6] sm:$0x3] %vm29264_vm3, %v29235_v51  ;;  %31621 = vmatprep.mubr.msk.f32.mxu1 %vm32634_vm2, %v36106_v43  ;;  %31624 = vmatprep.subr.mxu1 %v36106_v43  ;;  %v35334_v5 = vsub.f32 %v24904_v4, %v35320_v8  ;;  %v36245_v41 = vld [vmem:[#allocation59_spill] sm:$0xff]  ;;  %v36254_v4 = vld [vmem:[#allocation66_spill] sm:$0xff] }
 0x479   :  { %v18613_v1 = vpop.f32.mrb[40].mxu0  ;;  %v19062_v10 = vpop.f32.mrb[40].mxu1 }
 0x47a   :  { %28992 = vrot.lane.b32.xlu0 %v18613_v1, %s32635_s4  ;;  %v31298_v27 = vpop.f32.mrb[41].mxu0  ;;  %v31328_v48 = vpop.f32.mrb[41].mxu1  ;;  %28994 = vrot.lane.b32.xlu1 %v19062_v10, %s32635_s4 }
 0x47b   :  { %31592 = vmatmul.mubr.f32.vlgmr.msra.gmra.mrb[50].mxu0 %v35118_v6  ;;  %31622 = vmatmul.mubr.f32.vlgmr.msra.gmra.mrb[50].mxu1 %v35120_v54  ;;  %v24974_v27 = vand.u32 4294901760, %v35334_v5 }
 0x47c   :  { %31595 = vmatpush3.msra.mxu0 %v36225_v20  ;;  %31625 = vmatpush3.msra.mxu1 %v36226_v19  ;;  %v36240_v20 = vld [vmem:[#allocation52_spill] sm:$0xff] }
 0x47d   :  { %31596 = vmatprep.mubr.msk.f32.mxu0 %vm32634_vm2, %v36106_v43  ;;  %31626 = vmatprep.mubr.msk.f32.mxu1 %vm32634_vm2, %v36106_v43 }
 0x47e   :  { %29120 = vrot.lane.b32.xlu0 %v18613_v1, %s32636_s0  ;;  %31629 = vmatprep.subr.mxu0 %v36106_v43 }
 0x47f   :  { %31659 = vmatprep.subr.mxu1 %v36106_v43  ;;  %29122 = vrot.lane.b32.xlu1 %v19062_v10, %s32636_s0  ;;  %v24525_v10 = vand.u32 4294901760, %v35331_v49 }
 0x481   :  { %v24526_v48 = vsub.f32 %v35331_v49, %v24525_v10 }
 0x483   :  { %31597 = vmatmul.mubr.f32.vlgmr.msra.gmra.mrb[50].mxu0 %v35118_v6  ;;  %31627 = vmatmul.mubr.f32.vlgmr.msra.gmra.mrb[50].mxu1 %v35120_v54  ;;  %v36237_v6 = vld [vmem:[#allocation57_spill] sm:$0xff]  ;;  %v36238_v54 = vld [vmem:[#allocation58_spill] sm:$0xff] }
 0x484   :  { %31630 = vmatpush3.msra.mxu0 %v36235_v34  ;;  %31660 = vmatpush3.msra.mxu1 %v36236_v60 }
 0x485   :  { %31631 = vmatprep.mubr.msk.f32.mxu0 %vm32634_vm2, %v36106_v43  ;;  %31634 = vmatprep.subr.mxu0 %v36106_v43 }
 0x486   :  { %31661 = vmatprep.mubr.msk.f32.mxu1 %vm32634_vm2, %v36106_v43  ;;  %31664 = vmatprep.subr.mxu1 %v36106_v43 }
 0x487   :  { %31632 = vmatmul.mubr.f32.vlgmr.msra.gmra.mrb[52].mxu0 %v23629_v45  ;;  %31662 = vmatmul.mubr.f32.vlgmr.msra.gmra.mrb[52].mxu1 %v24078_v32  ;;  %v36246_v45 = vld [vmem:[#allocation60_spill] sm:$0xff]  ;;  %v36249_v32 = vld [vmem:[#allocation61_spill] sm:$0xff] }
 0x488   :  { %31635 = vmatpush3.msra.mxu0 %v36237_v6  ;;  %31665 = vmatpush3.msra.mxu1 %v36238_v54 }
 0x489   :  { %31636 = vmatprep.mubr.msk.f32.mxu0 %vm32634_vm2, %v36106_v43  ;;  %31639 = vmatprep.subr.mxu0 %v36106_v43 }
 0x48a   :  { %31666 = vmatprep.mubr.msk.f32.mxu1 %vm32634_vm2, %v36106_v43  ;;  %31669 = vmatprep.subr.mxu1 %v36106_v43 }
 0x48f   :  { %31637 = vmatmul.mubr.f32.vlgmr.msra.gmra.mrb[52].mxu0 %v35213_v44  ;;  %31667 = vmatmul.mubr.f32.vlgmr.msra.gmra.mrb[52].mxu1 %v35215_v3 }
 0x490   :  { %31640 = vmatpush3.msra.mxu0 %v36239_v62  ;;  %31670 = vmatpush3.msra.mxu1 %v36240_v20  ;;  %v36251_v62 = vld [vmem:[#allocation43_spill] sm:$0xff] }
 0x491   :  { %31641 = vmatprep.mubr.msk.f32.mxu0 %vm32634_vm2, %v36106_v43  ;;  %31644 = vmatprep.subr.mxu0 %v36106_v43 }
 0x492   :  { %31671 = vmatprep.mubr.msk.f32.mxu1 %vm32634_vm2, %v36106_v43  ;;  %31674 = vmatprep.subr.mxu1 %v36106_v43 }
 0x494   :  { %v28985_v19 = vpop.permute.xlu0 %28984  ;;  %v28987_v15 = vpop.permute.xlu1 %28986 }
 0x495   :  { %v29076_v40 = vsub.f32 %v36241_v38, %v28985_v19  ;;  %v29077_v24 = vsub.f32 %v36242_v59, %v28987_v15  ;;  %v14568_v15 = vld [vmem:[%s35970_s1 + $0x30] sm:$0x3] }
 0x497   :  { %31642 = vmatmul.mubr.f32.vlgmr.msra.gmra.mrb[52].mxu0 %v35231_v63  ;;  %31672 = vmatmul.mubr.f32.vlgmr.msra.gmra.mrb[52].mxu1 %v35234_v56 }
 0x498   :  { %31645 = vmatpush3.msra.mxu0 %v36235_v34  ;;  %31675 = vmatpush3.msra.mxu1 %v36236_v60  ;;  %v29113_v57 = vpop.permute.xlu0 %29112 }
 0x499   :  { %v29204_v11 = vadd.f32 %v29113_v57, %v36241_v38  ;;  %31646 = vmatprep.mubr.msk.f32.mxu0 %vm32634_vm2, %v36106_v43  ;;  %31649 = vmatprep.subr.mxu0 %v36106_v43  ;;  %v29115_v29 = vpop.permute.xlu1 %29114  ;;  %v14569_v57 = vld [vmem:[%s35970_s1 + $0x32] sm:$0x3] }
 0x49a   :  { %31676 = vmatprep.mubr.msk.f32.mxu1 %vm32634_vm2, %v36106_v43  ;;  %31679 = vmatprep.subr.mxu1 %v36106_v43  ;;  %v29205_v30 = vadd.f32 %v29115_v29, %v36242_v59  ;;  %v25353_v29 = vsel %vm78_vm1, %v14568_v15, 0 }
 0x49b   :  { %v29236_v31 = vsel %vm78_vm1, %v29076_v40, %v29204_v11  ;;  %v36252_v11 = vld [vmem:[#allocation44_spill] sm:$0xff] }
 0x49c   :  { %29269 = vst.msk [vmem:[%s35971_s3 + $0x8] sm:$0x3] %vm29264_vm3, %v29236_v31  ;;  %v29237_v58 = vsel %vm78_vm1, %v29077_v24, %v29205_v30  ;;  %v25802_v31 = vsel %vm78_vm1, %v14569_v57, 0  ;;  %v35418_v24 = vand.u32 4294901760, %v25353_v29 }
 0x49d   :  { %29270 = vst.msk [vmem:[%s35971_s3 + $0xa] sm:$0x3] %vm29264_vm3, %v29237_v58  ;;  %v35420_v30 = vand.u32 4294901760, %v25802_v31 }
 0x49e   :  { %v35431_v58 = vsub.f32 %v25353_v29, %v35418_v24  ;;  %v36263_v29 = vld [vmem:[#allocation75_spill] sm:$0xff] }
 0x49f   :  { %31647 = vmatmul.mubr.f32.vlgmr.msra.gmra.mrb[52].mxu0 %v23627_v33  ;;  %31677 = vmatmul.mubr.f32.vlgmr.msra.gmra.mrb[52].mxu1 %v24076_v21  ;;  %v24975_v33 = vsub.f32 %v35334_v5, %v24974_v27  ;;  %v24527_v21 = vand.u32 4294901760, %v24526_v48 }
 0x4a0   :  { %31650 = vmatpush3.msra.mxu0 %v36243_v9  ;;  %31680 = vmatpush3.msra.mxu1 %v36244_v42  ;;  %v35434_v9 = vsub.f32 %v25802_v31, %v35420_v30  ;;  %v36264_v31 = vld [vmem:[#allocation76_spill] sm:$0xff] }
 0x4a1   :  { %31651 = vmatprep.mubr.msk.f32.mxu0 %vm32634_vm2, %v36106_v43  ;;  %31654 = vmatprep.subr.mxu0 %v36106_v43  ;;  %v24976_v23 = vand.u32 4294901760, %v24975_v33  ;;  %v36255_v33 = vld [vmem:[#allocation69_spill] sm:$0xff] }
 0x4a2   :  { %31681 = vmatprep.mubr.msk.f32.mxu1 %vm32634_vm2, %v36106_v43  ;;  %31684 = vmatprep.subr.mxu1 %v36106_v43 }
 0x4a5   :  { %v19511_v51 = vpop.f32.mrb[42].mxu0 }
 0x4a6   :  { %v19960_v63 = vpop.f32.mrb[42].mxu1  ;;  %28996 = vrot.lane.b32.xlu0 %v19511_v51, %s32635_s4  ;;  %v31358_v56 = vpop.f32.mrb[43].mxu0 }
 0x4a7   :  { %v31388_v1 = vpop.f32.mrb[43].mxu1  ;;  %31652 = vmatmul.mubr.f32.vlgmr.msra.gmra.mrb[52].mxu0 %v35213_v44  ;;  %31682 = vmatmul.mubr.f32.vlgmr.msra.gmra.mrb[52].mxu1 %v35215_v3  ;;  %v25872_v56 = vand.u32 4294901760, %v35434_v9 }
 0x4a8   :  { %31655 = vmatpush3.msra.mxu0 %v36235_v34  ;;  %31685 = vmatpush3.msra.mxu1 %v36236_v60  ;;  %v36250_v34 = vld [vmem:[#allocation62_spill] sm:$0xff] }
 0x4a9   :  { %28998 = vrot.lane.b32.xlu1 %v19960_v63, %s32635_s4  ;;  %31656 = vmatprep.mubr.msk.f32.mxu0 %vm32634_vm2, %v36106_v43 }
 0x4aa   :  { %29124 = vrot.lane.b32.xlu0 %v19511_v51, %s32636_s0  ;;  %31686 = vmatprep.mubr.msk.f32.mxu1 %vm32634_vm2, %v36106_v43 }
 0x4ab   :  { %31689 = vmatprep.subr.mxu0 %v36106_v43  ;;  %31719 = vmatprep.subr.mxu1 %v36106_v43 }
 0x4ad   :  { %29126 = vrot.lane.b32.xlu1 %v19960_v63, %s32636_s0  ;;  %v25423_v63 = vand.u32 4294901760, %v35431_v58 }
 0x4af   :  { %31657 = vmatmul.mubr.f32.vlgmr.msra.gmra.mrb[52].mxu0 %v35213_v44  ;;  %31687 = vmatmul.mubr.f32.vlgmr.msra.gmra.mrb[52].mxu1 %v35215_v3  ;;  %v36247_v44 = vld [vmem:[#allocation67_spill] sm:$0xff]  ;;  %v36248_v3 = vld [vmem:[#allocation68_spill] sm:$0xff]  ;;  %v25424_v1 = vsub.f32 %v35431_v58, %v25423_v63 }
 0x4b0   :  { %31690 = vmatpush3.msra.mxu0 %v36245_v41  ;;  %31720 = vmatpush3.msra.mxu1 %v36246_v45 }
 0x4b1   :  { %31691 = vmatprep.mubr.msk.f32.mxu0 %vm32634_vm2, %v36106_v43  ;;  %31694 = vmatprep.subr.mxu0 %v36106_v43 }
 0x4b2   :  { %31721 = vmatprep.mubr.msk.f32.mxu1 %vm32634_vm2, %v36106_v43  ;;  %31724 = vmatprep.subr.mxu1 %v36106_v43 }
 0x4b3   :  { %31692 = vmatmul.mubr.f32.vlgmr.msra.gmra.mrb[54].mxu0 %v24527_v21  ;;  %31722 = vmatmul.mubr.f32.vlgmr.msra.gmra.mrb[54].mxu1 %v24976_v23  ;;  %v36256_v21 = vld [vmem:[#allocation70_spill] sm:$0xff]  ;;  %v36259_v23 = vld [vmem:[#allocation71_spill] sm:$0xff] }
 0x4b4   :  { %31695 = vmatpush3.msra.mxu0 %v36247_v44  ;;  %31725 = vmatpush3.msra.mxu1 %v36248_v3 }
 0x4b5   :  { %31696 = vmatprep.mubr.msk.f32.mxu0 %vm32634_vm2, %v36106_v43  ;;  %31699 = vmatprep.subr.mxu0 %v36106_v43 }
 0x4b6   :  { %31726 = vmatprep.mubr.msk.f32.mxu1 %vm32634_vm2, %v36106_v43  ;;  %31729 = vmatprep.subr.mxu1 %v36106_v43 }
 0x4bb   :  { %31697 = vmatmul.mubr.f32.vlgmr.msra.gmra.mrb[54].mxu0 %v35318_v17  ;;  %31727 = vmatmul.mubr.f32.vlgmr.msra.gmra.mrb[54].mxu1 %v35320_v8 }
 0x4bc   :  { %31700 = vmatpush3.msra.mxu0 %v36249_v32  ;;  %31730 = vmatpush3.msra.mxu1 %v36250_v34  ;;  %v36261_v32 = vld [vmem:[#allocation53_spill] sm:$0xff] }
 0x4bd   :  { %31701 = vmatprep.mubr.msk.f32.mxu0 %vm32634_vm2, %v36106_v43  ;;  %31704 = vmatprep.subr.mxu0 %v36106_v43 }
 0x4be   :  { %31731 = vmatprep.mubr.msk.f32.mxu1 %vm32634_vm2, %v36106_v43  ;;  %31734 = vmatprep.subr.mxu1 %v36106_v43 }
 0x4c0   :  { %v28989_v60 = vpop.permute.xlu0 %28988  ;;  %v28991_v6 = vpop.permute.xlu1 %28990 }
 0x4c1   :  { %v29078_v20 = vsub.f32 %v36251_v62, %v28989_v60  ;;  %v29079_v47 = vsub.f32 %v36252_v11, %v28991_v6  ;;  %v14570_v6 = vld [vmem:[%s35970_s1 + $0x34] sm:$0x3] }
 0x4c3   :  { %31702 = vmatmul.mubr.f32.vlgmr.msra.gmra.mrb[54].mxu0 %v35331_v49  ;;  %31732 = vmatmul.mubr.f32.vlgmr.msra.gmra.mrb[54].mxu1 %v35334_v5 }
 0x4c4   :  { %31705 = vmatpush3.msra.mxu0 %v36245_v41  ;;  %31735 = vmatpush3.msra.mxu1 %v36246_v45  ;;  %v29117_v54 = vpop.permute.xlu0 %29116 }
 0x4c5   :  { %v29206_v19 = vadd.f32 %v29117_v54, %v36251_v62  ;;  %31706 = vmatprep.mubr.msk.f32.mxu0 %vm32634_vm2, %v36106_v43  ;;  %31709 = vmatprep.subr.mxu0 %v36106_v43  ;;  %v29119_v38 = vpop.permute.xlu1 %29118  ;;  %v14571_v54 = vld [vmem:[%s35970_s1 + $0x36] sm:$0x3] }
 0x4c6   :  { %31736 = vmatprep.mubr.msk.f32.mxu1 %vm32634_vm2, %v36106_v43  ;;  %31739 = vmatprep.subr.mxu1 %v36106_v43  ;;  %v29207_v25 = vadd.f32 %v29119_v38, %v36252_v11  ;;  %v26251_v38 = vsel %vm78_vm1, %v14570_v6, 0 }
 0x4c7   :  { %v29238_v40 = vsel %vm78_vm1, %v29078_v20, %v29206_v19  ;;  %v36262_v19 = vld [vmem:[#allocation54_spill] sm:$0xff] }
 0x4c8   :  { %29271 = vst.msk [vmem:[%s35971_s3 + $0xc] sm:$0x3] %vm29264_vm3, %v29238_v40  ;;  %v29239_v59 = vsel %vm78_vm1, %v29079_v47, %v29207_v25  ;;  %v26700_v40 = vsel %vm78_vm1, %v14571_v54, 0  ;;  %v35518_v47 = vand.u32 4294901760, %v26251_v38 }
 0x4c9   :  { %29272 = vst.msk [vmem:[%s35971_s3 + $0xe] sm:$0x3] %vm29264_vm3, %v29239_v59  ;;  %v35520_v25 = vand.u32 4294901760, %v26700_v40 }
 0x4ca   :  { %v35531_v59 = vsub.f32 %v26251_v38, %v35518_v47  ;;  %v36273_v38 = vld [vmem:[#allocation85_spill] sm:$0xff] }
 0x4cb   :  { %31707 = vmatmul.mubr.f32.vlgmr.msra.gmra.mrb[54].mxu0 %v24525_v10  ;;  %31737 = vmatmul.mubr.f32.vlgmr.msra.gmra.mrb[54].mxu1 %v24974_v27  ;;  %v25873_v10 = vsub.f32 %v35434_v9, %v25872_v56  ;;  %v25425_v27 = vand.u32 4294901760, %v25424_v1 }
 0x4cc   :  { %31710 = vmatpush3.msra.mxu0 %v36253_v37  ;;  %31740 = vmatpush3.msra.mxu1 %v36254_v4  ;;  %v35534_v37 = vsub.f32 %v26700_v40, %v35520_v25  ;;  %v36274_v40 = vld [vmem:[#allocation86_spill] sm:$0xff] }
 0x4cd   :  { %31711 = vmatprep.mubr.msk.f32.mxu0 %vm32634_vm2, %v36106_v43  ;;  %31714 = vmatprep.subr.mxu0 %v36106_v43  ;;  %v25874_v48 = vand.u32 4294901760, %v25873_v10  ;;  %v36265_v10 = vld [vmem:[#allocation79_spill] sm:$0xff] }
 0x4ce   :  { %31741 = vmatprep.mubr.msk.f32.mxu1 %vm32634_vm2, %v36106_v43  ;;  %31744 = vmatprep.subr.mxu1 %v36106_v43 }
 0x4d1   :  { %v20409_v42 = vpop.f32.mrb[44].mxu0 }
 0x4d2   :  { %v20858_v49 = vpop.f32.mrb[44].mxu1  ;;  %29000 = vrot.lane.b32.xlu0 %v20409_v42, %s32635_s4  ;;  %v31418_v5 = vpop.f32.mrb[45].mxu0 }
 0x4d3   :  { %v31448_v51 = vpop.f32.mrb[45].mxu1  ;;  %31712 = vmatmul.mubr.f32.vlgmr.msra.gmra.mrb[54].mxu0 %v35318_v17  ;;  %31742 = vmatmul.mubr.f32.vlgmr.msra.gmra.mrb[54].mxu1 %v35320_v8  ;;  %v26770_v5 = vand.u32 4294901760, %v35534_v37 }
 0x4d4   :  { %31715 = vmatpush3.msra.mxu0 %v36245_v41  ;;  %31745 = vmatpush3.msra.mxu1 %v36246_v45  ;;  %v36260_v41 = vld [vmem:[#allocation72_spill] sm:$0xff] }
 0x4d5   :  { %29002 = vrot.lane.b32.xlu1 %v20858_v49, %s32635_s4  ;;  %31716 = vmatprep.mubr.msk.f32.mxu0 %vm32634_vm2, %v36106_v43 }
 0x4d6   :  { %29128 = vrot.lane.b32.xlu0 %v20409_v42, %s32636_s0  ;;  %31746 = vmatprep.mubr.msk.f32.mxu1 %vm32634_vm2, %v36106_v43 }
 0x4d7   :  { %31749 = vmatprep.subr.mxu0 %v36106_v43  ;;  %31779 = vmatprep.subr.mxu1 %v36106_v43 }
 0x4d9   :  { %29130 = vrot.lane.b32.xlu1 %v20858_v49, %s32636_s0  ;;  %v26321_v49 = vand.u32 4294901760, %v35531_v59 }
 0x4db   :  { %31717 = vmatmul.mubr.f32.vlgmr.msra.gmra.mrb[54].mxu0 %v35318_v17  ;;  %31747 = vmatmul.mubr.f32.vlgmr.msra.gmra.mrb[54].mxu1 %v35320_v8  ;;  %v36257_v17 = vld [vmem:[#allocation77_spill] sm:$0xff]  ;;  %v36258_v8 = vld [vmem:[#allocation78_spill] sm:$0xff]  ;;  %v26322_v51 = vsub.f32 %v35531_v59, %v26321_v49 }
 0x4dc   :  { %31750 = vmatpush3.msra.mxu0 %v36255_v33  ;;  %31780 = vmatpush3.msra.mxu1 %v36256_v21 }
 0x4dd   :  { %31751 = vmatprep.mubr.msk.f32.mxu0 %vm32634_vm2, %v36106_v43  ;;  %31754 = vmatprep.subr.mxu0 %v36106_v43 }
 0x4de   :  { %31781 = vmatprep.mubr.msk.f32.mxu1 %vm32634_vm2, %v36106_v43  ;;  %31784 = vmatprep.subr.mxu1 %v36106_v43 }
 0x4df   :  { %31752 = vmatmul.mubr.f32.vlgmr.msra.gmra.mrb[56].mxu0 %v25425_v27  ;;  %31782 = vmatmul.mubr.f32.vlgmr.msra.gmra.mrb[56].mxu1 %v25874_v48  ;;  %v36266_v27 = vld [vmem:[#allocation80_spill] sm:$0xff]  ;;  %v36269_v48 = vld [vmem:[#allocation81_spill] sm:$0xff] }
 0x4e0   :  { %31755 = vmatpush3.msra.mxu0 %v36257_v17  ;;  %31785 = vmatpush3.msra.mxu1 %v36258_v8 }
 0x4e1   :  { %31756 = vmatprep.mubr.msk.f32.mxu0 %vm32634_vm2, %v36106_v43  ;;  %31759 = vmatprep.subr.mxu0 %v36106_v43 }
 0x4e2   :  { %31786 = vmatprep.mubr.msk.f32.mxu1 %vm32634_vm2, %v36106_v43  ;;  %31789 = vmatprep.subr.mxu1 %v36106_v43 }
 0x4e7   :  { %31757 = vmatmul.mubr.f32.vlgmr.msra.gmra.mrb[56].mxu0 %v35418_v24  ;;  %31787 = vmatmul.mubr.f32.vlgmr.msra.gmra.mrb[56].mxu1 %v35420_v30 }
 0x4e8   :  { %31760 = vmatpush3.msra.mxu0 %v36259_v23  ;;  %31790 = vmatpush3.msra.mxu1 %v36260_v41  ;;  %v36271_v23 = vld [vmem:[#allocation63_spill] sm:$0xff] }
 0x4e9   :  { %31761 = vmatprep.mubr.msk.f32.mxu0 %vm32634_vm2, %v36106_v43  ;;  %31764 = vmatprep.subr.mxu0 %v36106_v43 }
 0x4ea   :  { %31791 = vmatprep.mubr.msk.f32.mxu1 %vm32634_vm2, %v36106_v43  ;;  %31794 = vmatprep.subr.mxu1 %v36106_v43 }
 0x4ec   :  { %v28993_v45 = vpop.permute.xlu0 %28992  ;;  %v28995_v44 = vpop.permute.xlu1 %28994 }
 0x4ed   :  { %v29080_v34 = vsub.f32 %v36261_v32, %v28993_v45  ;;  %v29081_v15 = vsub.f32 %v36262_v19, %v28995_v44  ;;  %v14572_v44 = vld [vmem:[%s35970_s1 + $0x38] sm:$0x3] }
 0x4ef   :  { %31762 = vmatmul.mubr.f32.vlgmr.msra.gmra.mrb[56].mxu0 %v35431_v58  ;;  %31792 = vmatmul.mubr.f32.vlgmr.msra.gmra.mrb[56].mxu1 %v35434_v9 }
 0x4f0   :  { %31765 = vmatpush3.msra.mxu0 %v36255_v33  ;;  %31795 = vmatpush3.msra.mxu1 %v36256_v21  ;;  %v29121_v3 = vpop.permute.xlu0 %29120 }
 0x4f1   :  { %v29208_v60 = vadd.f32 %v29121_v3, %v36261_v32  ;;  %31766 = vmatprep.mubr.msk.f32.mxu0 %vm32634_vm2, %v36106_v43  ;;  %31769 = vmatprep.subr.mxu0 %v36106_v43  ;;  %v29123_v62 = vpop.permute.xlu1 %29122  ;;  %v14573_v3 = vld [vmem:[%s35970_s1 + $0x3a] sm:$0x3] }
 0x4f2   :  { %31796 = vmatprep.mubr.msk.f32.mxu1 %vm32634_vm2, %v36106_v43  ;;  %31799 = vmatprep.subr.mxu1 %v36106_v43  ;;  %v29209_v57 = vadd.f32 %v29123_v62, %v36262_v19  ;;  %v27149_v62 = vsel %vm78_vm1, %v14572_v44, 0 }
 0x4f3   :  { %v29240_v20 = vsel %vm78_vm1, %v29080_v34, %v29208_v60  ;;  %v36272_v60 = vld [vmem:[#allocation64_spill] sm:$0xff] }
 0x4f4   :  { %29273 = vst.msk [vmem:[%s35971_s3 + $0x10] sm:$0x3] %vm29264_vm3, %v29240_v20  ;;  %v29241_v11 = vsel %vm78_vm1, %v29081_v15, %v29209_v57  ;;  %v27598_v20 = vsel %vm78_vm1, %v14573_v3, 0  ;;  %v35622_v15 = vand.u32 4294901760, %v27149_v62 }
 0x4f5   :  { %29274 = vst.msk [vmem:[%s35971_s3 + $0x12] sm:$0x3] %vm29264_vm3, %v29241_v11  ;;  %v35624_v57 = vand.u32 4294901760, %v27598_v20 }
 0x4f6   :  { %v35635_v11 = vsub.f32 %v27149_v62, %v35622_v15  ;;  %v36283_v62 = vld [vmem:[#allocation95_spill] sm:$0xff] }
 0x4f7   :  { %31767 = vmatmul.mubr.f32.vlgmr.msra.gmra.mrb[56].mxu0 %v25423_v63  ;;  %31797 = vmatmul.mubr.f32.vlgmr.msra.gmra.mrb[56].mxu1 %v25872_v56  ;;  %v26771_v63 = vsub.f32 %v35534_v37, %v26770_v5  ;;  %v26323_v56 = vand.u32 4294901760, %v26322_v51 }
 0x4f8   :  { %31770 = vmatpush3.msra.mxu0 %v36263_v29  ;;  %31800 = vmatpush3.msra.mxu1 %v36264_v31  ;;  %v35638_v29 = vsub.f32 %v27598_v20, %v35624_v57  ;;  %v36284_v20 = vld [vmem:[#allocation96_spill] sm:$0xff] }
 0x4f9   :  { %31771 = vmatprep.mubr.msk.f32.mxu0 %vm32634_vm2, %v36106_v43  ;;  %31774 = vmatprep.subr.mxu0 %v36106_v43  ;;  %v26772_v1 = vand.u32 4294901760, %v26771_v63  ;;  %v36275_v63 = vld [vmem:[#allocation89_spill] sm:$0xff] }
 0x4fa   :  { %31801 = vmatprep.mubr.msk.f32.mxu1 %vm32634_vm2, %v36106_v43  ;;  %31804 = vmatprep.subr.mxu1 %v36106_v43 }
 0x4fe   :  { %v21307_v4 = vpop.f32.mrb[46].mxu0  ;;  %v21756_v58 = vpop.f32.mrb[46].mxu1 }
 0x4ff   :  { %v31508_v9 = vpop.f32.mrb[47].mxu1  ;;  %31772 = vmatmul.mubr.f32.vlgmr.msra.gmra.mrb[56].mxu0 %v35418_v24  ;;  %31802 = vmatmul.mubr.f32.vlgmr.msra.gmra.mrb[56].mxu1 %v35420_v30  ;;  %v31478_v42 = vpop.f32.mrb[47].mxu0 }
 0x500   :  { %31775 = vmatpush3.msra.mxu0 %v36255_v33  ;;  %31805 = vmatpush3.msra.mxu1 %v36256_v21  ;;  %v36270_v33 = vld [vmem:[#allocation82_spill] sm:$0xff]  ;;  %v27668_v9 = vand.u32 4294901760, %v35638_v29 }
 0x501   :  { %29006 = vrot.lane.b32.xlu1 %v21756_v58, %s32635_s4  ;;  %29004 = vrot.lane.b32.xlu0 %v21307_v4, %s32635_s4 }
 0x502   :  { %31776 = vmatprep.mubr.msk.f32.mxu0 %vm32634_vm2, %v36106_v43  ;;  %31806 = vmatprep.mubr.msk.f32.mxu1 %vm32634_vm2, %v36106_v43 }
 0x503   :  { %31809 = vmatprep.subr.mxu0 %v36106_v43  ;;  %31839 = vmatprep.subr.mxu1 %v36106_v43 }
 0x505   :  { %29134 = vrot.lane.b32.xlu1 %v21756_v58, %s32636_s0  ;;  %29132 = vrot.lane.b32.xlu0 %v21307_v4, %s32636_s0  ;;  %v27219_v58 = vand.u32 4294901760, %v35635_v11 }
 0x507   :  { %31777 = vmatmul.mubr.f32.vlgmr.msra.gmra.mrb[56].mxu0 %v35418_v24  ;;  %31807 = vmatmul.mubr.f32.vlgmr.msra.gmra.mrb[56].mxu1 %v35420_v30  ;;  %v36267_v24 = vld [vmem:[#allocation87_spill] sm:$0xff]  ;;  %v36268_v30 = vld [vmem:[#allocation88_spill] sm:$0xff]  ;;  %v27220_v42 = vsub.f32 %v35635_v11, %v27219_v58 }
 0x508   :  { %31810 = vmatpush3.msra.mxu0 %v36265_v10  ;;  %31840 = vmatpush3.msra.mxu1 %v36266_v27 }
 0x509   :  { %31811 = vmatprep.mubr.msk.f32.mxu0 %vm32634_vm2, %v36106_v43  ;;  %31814 = vmatprep.subr.mxu0 %v36106_v43 }
 0x50a   :  { %31841 = vmatprep.mubr.msk.f32.mxu1 %vm32634_vm2, %v36106_v43  ;;  %31844 = vmatprep.subr.mxu1 %v36106_v43 }
 0x50b   :  { %31812 = vmatmul.mubr.f32.vlgmr.msra.gmra.mrb[58].mxu0 %v26323_v56  ;;  %31842 = vmatmul.mubr.f32.vlgmr.msra.gmra.mrb[58].mxu1 %v26772_v1  ;;  %v36276_v56 = vld [vmem:[#allocation90_spill] sm:$0xff]  ;;  %v36279_v1 = vld [vmem:[#allocation91_spill] sm:$0xff] }
 0x50c   :  { %31815 = vmatpush3.msra.mxu0 %v36267_v24  ;;  %31845 = vmatpush3.msra.mxu1 %v36268_v30 }
 0x50d   :  { %31816 = vmatprep.mubr.msk.f32.mxu0 %vm32634_vm2, %v36106_v43  ;;  %31819 = vmatprep.subr.mxu0 %v36106_v43 }
 0x50e   :  { %31846 = vmatprep.mubr.msk.f32.mxu1 %vm32634_vm2, %v36106_v43  ;;  %31849 = vmatprep.subr.mxu1 %v36106_v43 }
 0x513   :  { %31817 = vmatmul.mubr.f32.vlgmr.msra.gmra.mrb[58].mxu0 %v35518_v47  ;;  %31847 = vmatmul.mubr.f32.vlgmr.msra.gmra.mrb[58].mxu1 %v35520_v25 }
 0x514   :  { %31820 = vmatpush3.msra.mxu0 %v36269_v48  ;;  %31850 = vmatpush3.msra.mxu1 %v36270_v33  ;;  %v36281_v48 = vld [vmem:[#allocation73_spill] sm:$0xff] }
 0x515   :  { %31821 = vmatprep.mubr.msk.f32.mxu0 %vm32634_vm2, %v36106_v43  ;;  %31824 = vmatprep.subr.mxu0 %v36106_v43 }
 0x516   :  { %31851 = vmatprep.mubr.msk.f32.mxu1 %vm32634_vm2, %v36106_v43  ;;  %31854 = vmatprep.subr.mxu1 %v36106_v43 }
 0x518   :  { %v28997_v21 = vpop.permute.xlu0 %28996 }
 0x519   :  { %v29082_v41 = vsub.f32 %v36271_v23, %v28997_v21 }
 0x51b   :  { %v28999_v17 = vpop.permute.xlu1 %28998  ;;  %31822 = vmatmul.mubr.f32.vlgmr.msra.gmra.mrb[58].mxu0 %v35531_v59  ;;  %31852 = vmatmul.mubr.f32.vlgmr.msra.gmra.mrb[58].mxu1 %v35534_v37 }
 0x51c   :  { %31825 = vmatpush3.msra.mxu0 %v36265_v10  ;;  %31855 = vmatpush3.msra.mxu1 %v36266_v27  ;;  %v29125_v8 = vpop.permute.xlu0 %29124  ;;  %v29083_v6 = vsub.f32 %v36272_v60, %v28999_v17  ;;  %v14574_v17 = vld [vmem:[%s35970_s1 + $0x3c] sm:$0x3] }
 0x51d   :  { %v29210_v45 = vadd.f32 %v29125_v8, %v36271_v23  ;;  %31826 = vmatprep.mubr.msk.f32.mxu0 %vm32634_vm2, %v36106_v43  ;;  %31829 = vmatprep.subr.mxu0 %v36106_v43  ;;  %v14575_v8 = vld [vmem:[%s35970_s1 + $0x3e] sm:$0x3] }
 0x51e   :  { %31856 = vmatprep.mubr.msk.f32.mxu1 %vm32634_vm2, %v36106_v43  ;;  %31859 = vmatprep.subr.mxu1 %v36106_v43 }
 0x51f   :  { %v29127_v32 = vpop.permute.xlu1 %29126  ;;  %v29242_v34 = vsel %vm78_vm1, %v29082_v41, %v29210_v45  ;;  %v36282_v45 = vld [vmem:[#allocation74_spill] sm:$0xff] }
 0x520   :  { %v29211_v54 = vadd.f32 %v29127_v32, %v36272_v60  ;;  %29275 = vst.msk [vmem:[%s35971_s3 + $0x14] sm:$0x3] %vm29264_vm3, %v29242_v34  ;;  %v28047_v32 = vsel %vm78_vm1, %v14574_v17, 0  ;;  %v28496_v34 = vsel %vm78_vm1, %v14575_v8, 0 }
 0x522   :  { %v29243_v19 = vsel %vm78_vm1, %v29083_v6, %v29211_v54  ;;  %v35726_v6 = vand.u32 4294901760, %v28047_v32  ;;  %v35728_v54 = vand.u32 4294901760, %v28496_v34 }
 0x523   :  { %29276 = vst.msk [vmem:[%s35971_s3 + $0x16] sm:$0x3] %vm29264_vm3, %v29243_v19  ;;  %31827 = vmatmul.mubr.f32.vlgmr.msra.gmra.mrb[58].mxu0 %v26321_v49  ;;  %31857 = vmatmul.mubr.f32.vlgmr.msra.gmra.mrb[58].mxu1 %v26770_v5  ;;  %v27669_v49 = vsub.f32 %v35638_v29, %v27668_v9  ;;  %v27221_v5 = vand.u32 4294901760, %v27220_v42 }
 0x524   :  { %31830 = vmatpush3.msra.mxu0 %v36273_v38  ;;  %31860 = vmatpush3.msra.mxu1 %v36274_v40  ;;  %v35739_v19 = vsub.f32 %v28047_v32, %v35726_v6  ;;  %v35742_v38 = vsub.f32 %v28496_v34, %v35728_v54 }
 0x525   :  { %31831 = vmatprep.mubr.msk.f32.mxu0 %vm32634_vm2, %v36106_v43  ;;  %31834 = vmatprep.subr.mxu0 %v36106_v43  ;;  %v27670_v51 = vand.u32 4294901760, %v27669_v49  ;;  %v36286_v49 = vld [vmem:[#allocation83_spill] sm:$0xff] }
 0x526   :  { %31861 = vmatprep.mubr.msk.f32.mxu1 %vm32634_vm2, %v36106_v43  ;;  %31864 = vmatprep.subr.mxu1 %v36106_v43 }
 0x52a   :  { %v22205_v31 = vpop.f32.mrb[48].mxu0  ;;  %v22654_v59 = vpop.f32.mrb[48].mxu1 }
 0x52b   :  { %v31568_v37 = vpop.f32.mrb[49].mxu1  ;;  %31832 = vmatmul.mubr.f32.vlgmr.msra.gmra.mrb[58].mxu0 %v35518_v47  ;;  %31862 = vmatmul.mubr.f32.vlgmr.msra.gmra.mrb[58].mxu1 %v35520_v25  ;;  %v31538_v4 = vpop.f32.mrb[49].mxu0 }
 0x52c   :  { %31835 = vmatpush3.msra.mxu0 %v36265_v10  ;;  %31865 = vmatpush3.msra.mxu1 %v36266_v27  ;;  %v36280_v10 = vld [vmem:[#allocation92_spill] sm:$0xff]  ;;  %v28566_v37 = vand.u32 4294901760, %v35742_v38 }
 0x52d   :  { %29010 = vrot.lane.b32.xlu1 %v22654_v59, %s32635_s4  ;;  %29008 = vrot.lane.b32.xlu0 %v22205_v31, %s32635_s4 }
 0x52e   :  { %31836 = vmatprep.mubr.msk.f32.mxu0 %vm32634_vm2, %v36106_v43  ;;  %31866 = vmatprep.mubr.msk.f32.mxu1 %vm32634_vm2, %v36106_v43 }
 0x52f   :  { %31869 = vmatprep.subr.mxu0 %v36106_v43  ;;  %31899 = vmatprep.subr.mxu1 %v36106_v43 }
 0x531   :  { %29138 = vrot.lane.b32.xlu1 %v22654_v59, %s32636_s0  ;;  %29136 = vrot.lane.b32.xlu0 %v22205_v31, %s32636_s0  ;;  %v28117_v59 = vand.u32 4294901760, %v35739_v19 }
 0x533   :  { %31837 = vmatmul.mubr.f32.vlgmr.msra.gmra.mrb[58].mxu0 %v35518_v47  ;;  %31867 = vmatmul.mubr.f32.vlgmr.msra.gmra.mrb[58].mxu1 %v35520_v25  ;;  %v36277_v47 = vld [vmem:[#allocation97_spill] sm:$0xff]  ;;  %v36278_v25 = vld [vmem:[#allocation98_spill] sm:$0xff]  ;;  %v28118_v4 = vsub.f32 %v35739_v19, %v28117_v59 }
 0x534   :  { %31870 = vmatpush3.msra.mxu0 %v36275_v63  ;;  %31900 = vmatpush3.msra.mxu1 %v36276_v56 }
 0x535   :  { %31871 = vmatprep.mubr.msk.f32.mxu0 %vm32634_vm2, %v36106_v43  ;;  %31874 = vmatprep.subr.mxu0 %v36106_v43 }
 0x536   :  { %31901 = vmatprep.mubr.msk.f32.mxu1 %vm32634_vm2, %v36106_v43  ;;  %31904 = vmatprep.subr.mxu1 %v36106_v43 }
 0x537   :  { %31872 = vmatmul.mubr.f32.vlgmr.msra.gmra.mrb[60].mxu0 %v27221_v5  ;;  %31902 = vmatmul.mubr.f32.vlgmr.msra.gmra.mrb[60].mxu1 %v27670_v51 }
 0x538   :  { %31875 = vmatpush3.msra.mxu0 %v36277_v47  ;;  %31905 = vmatpush3.msra.mxu1 %v36278_v25 }
 0x539   :  { %31876 = vmatprep.mubr.msk.f32.mxu0 %vm32634_vm2, %v36106_v43  ;;  %31879 = vmatprep.subr.mxu0 %v36106_v43 }
 0x53a   :  { %31906 = vmatprep.mubr.msk.f32.mxu1 %vm32634_vm2, %v36106_v43  ;;  %31909 = vmatprep.subr.mxu1 %v36106_v43 }
 0x53f   :  { %31877 = vmatmul.mubr.f32.vlgmr.msra.gmra.mrb[60].mxu0 %v35622_v15  ;;  %31907 = vmatmul.mubr.f32.vlgmr.msra.gmra.mrb[60].mxu1 %v35624_v57 }
 0x540   :  { %31880 = vmatpush3.msra.mxu0 %v36279_v1  ;;  %31910 = vmatpush3.msra.mxu1 %v36280_v10 }
 0x541   :  { %31881 = vmatprep.mubr.msk.f32.mxu0 %vm32634_vm2, %v36106_v43  ;;  %31884 = vmatprep.subr.mxu0 %v36106_v43 }
 0x542   :  { %31911 = vmatprep.mubr.msk.f32.mxu1 %vm32634_vm2, %v36106_v43  ;;  %31914 = vmatprep.subr.mxu1 %v36106_v43 }
 0x544   :  { %v29001_v27 = vpop.permute.xlu0 %29000 }
 0x545   :  { %v29084_v33 = vsub.f32 %v36281_v48, %v29001_v27 }
 0x547   :  { %v29003_v24 = vpop.permute.xlu1 %29002  ;;  %31882 = vmatmul.mubr.f32.vlgmr.msra.gmra.mrb[60].mxu0 %v35635_v11  ;;  %31912 = vmatmul.mubr.f32.vlgmr.msra.gmra.mrb[60].mxu1 %v35638_v29 }
 0x548   :  { %31885 = vmatpush3.msra.mxu0 %v36275_v63  ;;  %31915 = vmatpush3.msra.mxu1 %v36276_v56  ;;  %v29129_v30 = vpop.permute.xlu0 %29128  ;;  %v29085_v44 = vsub.f32 %v36282_v45, %v29003_v24  ;;  %v36287_v24 = vld [vmem:[#allocation94_spill] sm:$0xff] }
 0x549   :  { %v29212_v21 = vadd.f32 %v29129_v30, %v36281_v48  ;;  %31886 = vmatprep.mubr.msk.f32.mxu0 %vm32634_vm2, %v36106_v43  ;;  %31889 = vmatprep.subr.mxu0 %v36106_v43  ;;  %v36288_v48 = vld [vmem:[#allocation93_spill] sm:$0xff] }
 0x54a   :  { %31916 = vmatprep.mubr.msk.f32.mxu1 %vm32634_vm2, %v36106_v43  ;;  %31919 = vmatprep.subr.mxu1 %v36106_v43 }
 0x54b   :  { %v29131_v23 = vpop.permute.xlu1 %29130  ;;  %v29244_v41 = vsel %vm78_vm1, %v29084_v33, %v29212_v21 }
 0x54c   :  { %v29213_v3 = vadd.f32 %v29131_v23, %v36282_v45  ;;  %29277 = vst.msk [vmem:[%s35971_s3 + $0x18] sm:$0x3] %vm29264_vm3, %v29244_v41 }
 0x54e   :  { %v29245_v60 = vsel %vm78_vm1, %v29085_v44, %v29213_v3 }
 0x54f   :  { %29278 = vst.msk [vmem:[%s35971_s3 + $0x1a] sm:$0x3] %vm29264_vm3, %v29245_v60  ;;  %31887 = vmatmul.mubr.f32.vlgmr.msra.gmra.mrb[60].mxu0 %v27219_v58  ;;  %31917 = vmatmul.mubr.f32.vlgmr.msra.gmra.mrb[60].mxu1 %v27668_v9  ;;  %v28567_v58 = vsub.f32 %v35742_v38, %v28566_v37  ;;  %v28119_v9 = vand.u32 4294901760, %v28118_v4 }
 0x550   :  { %31890 = vmatpush3.msra.mxu0 %v36283_v62  ;;  %31920 = vmatpush3.msra.mxu1 %v36284_v20  ;;  %v36290_v62 = vld [vmem:[#allocation99_spill] sm:$0xff] }
 0x551   :  { %31891 = vmatprep.mubr.msk.f32.mxu0 %vm32634_vm2, %v36106_v43  ;;  %31894 = vmatprep.subr.mxu0 %v36106_v43  ;;  %v28568_v42 = vand.u32 4294901760, %v28567_v58 }
 0x552   :  { %31921 = vmatprep.mubr.msk.f32.mxu1 %vm32634_vm2, %v36106_v43  ;;  %31924 = vmatprep.subr.mxu1 %v36106_v43 }
 0x556   :  { %v23103_v40 = vpop.f32.mrb[50].mxu0  ;;  %v23552_v11 = vpop.f32.mrb[50].mxu1 }
 0x557   :  { %v31628_v29 = vpop.f32.mrb[51].mxu1  ;;  %31892 = vmatmul.mubr.f32.vlgmr.msra.gmra.mrb[60].mxu0 %v35622_v15  ;;  %31922 = vmatmul.mubr.f32.vlgmr.msra.gmra.mrb[60].mxu1 %v35624_v57  ;;  %v31598_v31 = vpop.f32.mrb[51].mxu0 }
 0x558   :  { %31895 = vmatpush3.msra.mxu0 %v36275_v63  ;;  %31925 = vmatpush3.msra.mxu1 %v36276_v56 }
 0x559   :  { %29014 = vrot.lane.b32.xlu1 %v23552_v11, %s32635_s4  ;;  %29012 = vrot.lane.b32.xlu0 %v23103_v40, %s32635_s4 }
 0x55a   :  { %31896 = vmatprep.mubr.msk.f32.mxu0 %vm32634_vm2, %v36106_v43  ;;  %31926 = vmatprep.mubr.msk.f32.mxu1 %vm32634_vm2, %v36106_v43 }
 0x55b   :  { %31929 = vmatprep.subr.mxu0 %v36106_v43  ;;  %31959 = vmatprep.subr.mxu1 %v36106_v43 }
 0x55d   :  { %29142 = vrot.lane.b32.xlu1 %v23552_v11, %s32636_s0  ;;  %29140 = vrot.lane.b32.xlu0 %v23103_v40, %s32636_s0 }
 0x55f   :  { %31897 = vmatmul.mubr.f32.vlgmr.msra.gmra.mrb[60].mxu0 %v35622_v15  ;;  %31927 = vmatmul.mubr.f32.vlgmr.msra.gmra.mrb[60].mxu1 %v35624_v57  ;;  %v36285_v15 = vld [vmem:[#allocation84_spill] sm:$0xff] }
 0x560   :  { %31930 = vmatpush3.msra.mxu0 %v34334_v52  ;;  %31960 = vmatpush3.msra.mxu1 %v34341_v0 }
 0x561   :  { %31931 = vmatprep.mubr.msk.f32.mxu0 %vm32634_vm2, %v36106_v43  ;;  %31934 = vmatprep.subr.mxu0 %v36106_v43 }
 0x562   :  { %31961 = vmatprep.mubr.msk.f32.mxu1 %vm32634_vm2, %v36106_v43  ;;  %31964 = vmatprep.subr.mxu1 %v36106_v43 }
 0x563   :  { %31932 = vmatmul.mubr.f32.vlgmr.msra.gmra.mrb[62].mxu0 %v28119_v9  ;;  %31962 = vmatmul.mubr.f32.vlgmr.msra.gmra.mrb[62].mxu1 %v28568_v42 }
 0x564   :  { %31935 = vmatpush3.msra.mxu0 %v34390_v12  ;;  %31965 = vmatpush3.msra.mxu1 %v34395_v39 }
 0x565   :  { %31936 = vmatprep.mubr.msk.f32.mxu0 %vm32634_vm2, %v36106_v43  ;;  %31939 = vmatprep.subr.mxu0 %v36106_v43 }
 0x566   :  { %31966 = vmatprep.mubr.msk.f32.mxu1 %vm32634_vm2, %v36106_v43  ;;  %31969 = vmatprep.subr.mxu1 %v36106_v43 }
 0x56b   :  { %31937 = vmatmul.mubr.f32.vlgmr.msra.gmra.mrb[62].mxu0 %v35726_v6  ;;  %31967 = vmatmul.mubr.f32.vlgmr.msra.gmra.mrb[62].mxu1 %v35728_v54 }
 0x56c   :  { %31940 = vmatpush3.msra.mxu0 %v34351_v28  ;;  %31970 = vmatpush3.msra.mxu1 %v34357_v2 }
 0x56d   :  { %31941 = vmatprep.mubr.msk.f32.mxu0 %vm32634_vm2, %v36106_v43  ;;  %31944 = vmatprep.subr.mxu0 %v36106_v43 }
 0x56e   :  { %31971 = vmatprep.mubr.msk.f32.mxu1 %vm32634_vm2, %v36106_v43  ;;  %31974 = vmatprep.subr.mxu1 %v36106_v43 }
 0x573   :  { %v29007_v12 = vpop.permute.xlu1 %29006  ;;  %v29005_v39 = vpop.permute.xlu0 %29004  ;;  %31942 = vmatmul.mubr.f32.vlgmr.msra.gmra.mrb[62].mxu0 %v35739_v19  ;;  %31972 = vmatmul.mubr.f32.vlgmr.msra.gmra.mrb[62].mxu1 %v35742_v38 }
 0x574   :  { %31945 = vmatpush3.msra.mxu0 %v34334_v52  ;;  %31975 = vmatpush3.msra.mxu1 %v34341_v0  ;;  %v29087_v57 = vsub.f32 %v36285_v15, %v29007_v12  ;;  %v29086_v5 = vsub.f32 %v36286_v49, %v29005_v39 }
 0x575   :  { %31946 = vmatprep.mubr.msk.f32.mxu0 %vm32634_vm2, %v36106_v43  ;;  %31949 = vmatprep.subr.mxu0 %v36106_v43 }
 0x576   :  { %31976 = vmatprep.mubr.msk.f32.mxu1 %vm32634_vm2, %v36106_v43  ;;  %31979 = vmatprep.subr.mxu1 %v36106_v43 }
 0x577   :  { %v29135_v28 = vpop.permute.xlu1 %29134  ;;  %v29133_v2 = vpop.permute.xlu0 %29132 }
 0x578   :  { %v29215_v51 = vadd.f32 %v29135_v28, %v36285_v15  ;;  %v29214_v63 = vadd.f32 %v29133_v2, %v36286_v49 }
 0x57a   :  { %v29247_v56 = vsel %vm78_vm1, %v29087_v57, %v29215_v51  ;;  %v29246_v47 = vsel %vm78_vm1, %v29086_v5, %v29214_v63 }
 0x57b   :  { %29280 = vst.msk [vmem:[%s35971_s3 + $0x1e] sm:$0x3] %vm29264_vm3, %v29247_v56  ;;  %29279 = vst.msk [vmem:[%s35971_s3 + $0x1c] sm:$0x3] %vm29264_vm3, %v29246_v47  ;;  %31947 = vmatmul.mubr.f32.vlgmr.msra.gmra.mrb[62].mxu0 %v28117_v59  ;;  %31977 = vmatmul.mubr.f32.vlgmr.msra.gmra.mrb[62].mxu1 %v28566_v37 }
 0x57c   :  { %31950 = vmatpush3.msra.mxu0 %v34368_v35  ;;  %31980 = vmatpush3.msra.mxu1 %v34375_v16 }
 0x57d   :  { %31951 = vmatprep.mubr.msk.f32.mxu0 %vm32634_vm2, %v36106_v43  ;;  %31954 = vmatprep.subr.mxu0 %v36106_v43 }
 0x57e   :  { %31981 = vmatprep.mubr.msk.f32.mxu1 %vm32634_vm2, %v36106_v43  ;;  %31984 = vmatprep.subr.mxu1 %v36106_v43 }
 0x582   :  { %v24001_v25 = vpop.f32.mrb[52].mxu0  ;;  %v24450_v1 = vpop.f32.mrb[52].mxu1 }
 0x583   :  { %v31688_v10 = vpop.f32.mrb[53].mxu1  ;;  %31952 = vmatmul.mubr.f32.vlgmr.msra.gmra.mrb[62].mxu0 %v35726_v6  ;;  %31982 = vmatmul.mubr.f32.vlgmr.msra.gmra.mrb[62].mxu1 %v35728_v54  ;;  %v31658_v35 = vpop.f32.mrb[53].mxu0 }
 0x584   :  { %31955 = vmatpush3.msra.mxu0 %v34334_v52  ;;  %31985 = vmatpush3.msra.mxu1 %v34341_v0 }
 0x585   :  { %29018 = vrot.lane.b32.xlu1 %v24450_v1, %s32635_s4  ;;  %29016 = vrot.lane.b32.xlu0 %v24001_v25, %s32635_s4 }
 0x586   :  { %31956 = vmatprep.mubr.msk.f32.mxu0 %vm32634_vm2, %v36106_v43  ;;  %31986 = vmatprep.mubr.msk.f32.mxu1 %vm32634_vm2, %v36106_v43 }
 0x589   :  { %29146 = vrot.lane.b32.xlu1 %v24450_v1, %s32636_s0  ;;  %29144 = vrot.lane.b32.xlu0 %v24001_v25, %s32636_s0 }
 0x58b   :  { %31957 = vmatmul.mubr.f32.vlgmr.msra.gmra.mrb[62].mxu0 %v35726_v6  ;;  %31987 = vmatmul.mubr.f32.vlgmr.msra.gmra.mrb[62].mxu1 %v35728_v54  ;;  %v36289_v6 = vld [vmem:[#allocation100_spill] sm:$0xff] }
 0x59f   :  { %v29011_v52 = vpop.permute.xlu1 %29010  ;;  %v29009_v0 = vpop.permute.xlu0 %29008 }
 0x5a0   :  { %v29089_v30 = vsub.f32 %v36287_v24, %v29011_v52  ;;  %v29088_v33 = vsub.f32 %v36288_v48, %v29009_v0 }
 0x5a3   :  { %v29139_v16 = vpop.permute.xlu1 %29138  ;;  %v29137_v27 = vpop.permute.xlu0 %29136 }
 0x5a4   :  { %v29217_v21 = vadd.f32 %v29139_v16, %v36287_v24  ;;  %v29216_v43 = vadd.f32 %v29137_v27, %v36288_v48 }
 0x5a6   :  { %v29249_v17 = vsel %vm78_vm1, %v29089_v30, %v29217_v21  ;;  %v29248_v8 = vsel %vm78_vm1, %v29088_v33, %v29216_v43 }
 0x5a7   :  { %29282 = vst.msk [vmem:[%s35971_s3 + $0x22] sm:$0x3] %vm29264_vm3, %v29249_v17  ;;  %29281 = vst.msk [vmem:[%s35971_s3 + $0x20] sm:$0x3] %vm29264_vm3, %v29248_v8 }
 0x5ae   :  { %v24899_v23 = vpop.f32.mrb[54].mxu0  ;;  %v25348_v41 = vpop.f32.mrb[54].mxu1 }
 0x5af   :  { %v31748_v45 = vpop.f32.mrb[55].mxu1  ;;  %29022 = vrot.lane.b32.xlu1 %v25348_v41, %s32635_s4  ;;  %29020 = vrot.lane.b32.xlu0 %v24899_v23, %s32635_s4  ;;  %v31718_v44 = vpop.f32.mrb[55].mxu0 }
 0x5b3   :  { %29150 = vrot.lane.b32.xlu1 %v25348_v41, %s32636_s0  ;;  %29148 = vrot.lane.b32.xlu0 %v24899_v23, %s32636_s0 }
 0x5cb   :  { %v29015_v3 = vpop.permute.xlu1 %29014  ;;  %v29013_v32 = vpop.permute.xlu0 %29012 }
 0x5cc   :  { %v29091_v54 = vsub.f32 %v36289_v6, %v29015_v3  ;;  %v29090_v20 = vsub.f32 %v36290_v62, %v29013_v32 }
 0x5cf   :  { %v29143_v34 = vpop.permute.xlu1 %29142  ;;  %v29141_v60 = vpop.permute.xlu0 %29140 }
 0x5d0   :  { %v29219_v19 = vadd.f32 %v29143_v34, %v36289_v6  ;;  %v29218_v38 = vadd.f32 %v29141_v60, %v36290_v62 }
 0x5d2   :  { %v29251_v40 = vsel %vm78_vm1, %v29091_v54, %v29219_v19  ;;  %v29250_v11 = vsel %vm78_vm1, %v29090_v20, %v29218_v38 }
 0x5d3   :  { %29284 = vst.msk [vmem:[%s35971_s3 + $0x26] sm:$0x3] %vm29264_vm3, %v29251_v40  ;;  %29283 = vst.msk [vmem:[%s35971_s3 + $0x24] sm:$0x3] %vm29264_vm3, %v29250_v11 }
 0x5da   :  { %v25797_v29 = vpop.f32.mrb[56].mxu0  ;;  %v26246_v31 = vpop.f32.mrb[56].mxu1 }
 0x5db   :  { %v31808_v59 = vpop.f32.mrb[57].mxu1  ;;  %29026 = vrot.lane.b32.xlu1 %v26246_v31, %s32635_s4  ;;  %29024 = vrot.lane.b32.xlu0 %v25797_v29, %s32635_s4  ;;  %v31778_v37 = vpop.f32.mrb[57].mxu0 }
 0x5df   :  { %29154 = vrot.lane.b32.xlu1 %v26246_v31, %s32636_s0  ;;  %29152 = vrot.lane.b32.xlu0 %v25797_v29, %s32636_s0 }
 0x5f7   :  { %v29019_v4 = vpop.permute.xlu1 %29018  ;;  %v29017_v58 = vpop.permute.xlu0 %29016 }
 0x5f8   :  { %v29093_v12 = vsub.f32 %v34453_v50, %v29019_v4  ;;  %v29092_v39 = vsub.f32 %v34451_v61, %v29017_v58 }
 0x5fb   :  { %v29147_v9 = vpop.permute.xlu1 %29146  ;;  %v29145_v42 = vpop.permute.xlu0 %29144 }
 0x5fc   :  { %v29221_v28 = vadd.f32 %v29147_v9, %v34453_v50  ;;  %v29220_v2 = vadd.f32 %v29145_v42, %v34451_v61 }
 0x5fe   :  { %v29253_v15 = vsel %vm78_vm1, %v29093_v12, %v29221_v28  ;;  %v29252_v57 = vsel %vm78_vm1, %v29092_v39, %v29220_v2 }
 0x5ff   :  { %29286 = vst.msk [vmem:[%s35971_s3 + $0x2a] sm:$0x3] %vm29264_vm3, %v29253_v15  ;;  %29285 = vst.msk [vmem:[%s35971_s3 + $0x28] sm:$0x3] %vm29264_vm3, %v29252_v57 }
 0x606   :  { %v26695_v49 = vpop.f32.mrb[58].mxu0  ;;  %v27144_v5 = vpop.f32.mrb[58].mxu1 }
 0x607   :  { %v31868_v51 = vpop.f32.mrb[59].mxu1  ;;  %29030 = vrot.lane.b32.xlu1 %v27144_v5, %s32635_s4  ;;  %29028 = vrot.lane.b32.xlu0 %v26695_v49, %s32635_s4  ;;  %v31838_v61 = vpop.f32.mrb[59].mxu0 }
 0x60b   :  { %29158 = vrot.lane.b32.xlu1 %v27144_v5, %s32636_s0  ;;  %29156 = vrot.lane.b32.xlu0 %v26695_v49, %s32636_s0 }
 0x621   :  { %v29023_v50 = vpop.permute.xlu1 %29022  ;;  %v29021_v63 = vpop.permute.xlu0 %29020 }
 0x622   :  { %v29095_v25 = vsub.f32 %v34525_v22, %v29023_v50  ;;  %v29094_v1 = vsub.f32 %v34523_v18, %v29021_v63 }
 0x625   :  { %v29151_v56 = vpop.permute.xlu1 %29150  ;;  %v29149_v47 = vpop.permute.xlu0 %29148 }
 0x626   :  { %v29223_v10 = vadd.f32 %v29151_v56, %v34525_v22  ;;  %v29222_v35 = vadd.f32 %v29149_v47, %v34523_v18 }
 0x628   :  { %v29255_v52 = vsel %vm78_vm1, %v29095_v25, %v29223_v10  ;;  %v29254_v0 = vsel %vm78_vm1, %v29094_v1, %v29222_v35 }
 0x629   :  { %29288 = vst.msk [vmem:[%s35971_s3 + $0x2e] sm:$0x3] %vm29264_vm3, %v29255_v52  ;;  %29287 = vst.msk [vmem:[%s35971_s3 + $0x2c] sm:$0x3] %vm29264_vm3, %v29254_v0 }
 0x632   :  { %v27593_v16 = vpop.f32.mrb[60].mxu0  ;;  %v28042_v27 = vpop.f32.mrb[60].mxu1 }
 0x633   :  { %v31928_v24 = vpop.f32.mrb[61].mxu1  ;;  %29034 = vrot.lane.b32.xlu1 %v28042_v27, %s32635_s4  ;;  %29032 = vrot.lane.b32.xlu0 %v27593_v16, %s32635_s4  ;;  %v31898_v18 = vpop.f32.mrb[61].mxu0 }
 0x637   :  { %29162 = vrot.lane.b32.xlu1 %v28042_v27, %s32636_s0  ;;  %29160 = vrot.lane.b32.xlu0 %v27593_v16, %s32636_s0 }
 0x64d   :  { %v29027_v22 = vpop.permute.xlu1 %29026  ;;  %v29025_v30 = vpop.permute.xlu0 %29024 }
 0x64e   :  { %v29097_v21 = vsub.f32 %v34597_v26, %v29027_v22  ;;  %v29096_v43 = vsub.f32 %v34595_v46, %v29025_v30 }
 0x651   :  { %v29155_v48 = vpop.permute.xlu1 %29154  ;;  %v29153_v33 = vpop.permute.xlu0 %29152 }
 0x652   :  { %v29225_v17 = vadd.f32 %v29155_v48, %v34597_v26  ;;  %v29224_v8 = vadd.f32 %v29153_v33, %v34595_v46 }
 0x654   :  { %v29257_v23 = vsel %vm78_vm1, %v29097_v21, %v29225_v17  ;;  %v29256_v41 = vsel %vm78_vm1, %v29096_v43, %v29224_v8 }
 0x655   :  { %29290 = vst.msk [vmem:[%s35971_s3 + $0x32] sm:$0x3] %vm29264_vm3, %v29257_v23  ;;  %29289 = vst.msk [vmem:[%s35971_s3 + $0x30] sm:$0x3] %vm29264_vm3, %v29256_v41 }
 0x65e   :  { %v28491_v45 = vpop.f32.mrb[62].mxu0  ;;  %v28940_v44 = vpop.f32.mrb[62].mxu1 }
 0x65f   :  { %v31988_v3 = vpop.f32.mrb[63].mxu1  ;;  %29038 = vrot.lane.b32.xlu1 %v28940_v44, %s32635_s4  ;;  %29036 = vrot.lane.b32.xlu0 %v28491_v45, %s32635_s4  ;;  %v31958_v46 = vpop.f32.mrb[63].mxu0 }
 0x663   :  { %29166 = vrot.lane.b32.xlu1 %v28940_v44, %s32636_s0  ;;  %29164 = vrot.lane.b32.xlu0 %v28491_v45, %s32636_s0 }
 0x679   :  { %v29031_v26 = vpop.permute.xlu1 %29030  ;;  %v29029_v32 = vpop.permute.xlu0 %29028 }
 0x67a   :  { %v29099_v6 = vsub.f32 %v34669_v55, %v29031_v26  ;;  %v29098_v54 = vsub.f32 %v34667_v13, %v29029_v32 }
 0x67d   :  { %v29159_v34 = vpop.permute.xlu1 %29158  ;;  %v29157_v60 = vpop.permute.xlu0 %29156 }
 0x67e   :  { %v29227_v62 = vadd.f32 %v29159_v34, %v34669_v55  ;;  %v29226_v20 = vadd.f32 %v29157_v60, %v34667_v13 }
 0x680   :  { %v29259_v19 = vsel %vm78_vm1, %v29099_v6, %v29227_v62  ;;  %v29258_v38 = vsel %vm78_vm1, %v29098_v54, %v29226_v20 }
 0x681   :  { %29292 = vst.msk [vmem:[%s35971_s3 + $0x36] sm:$0x3] %vm29264_vm3, %v29259_v19  ;;  %29291 = vst.msk [vmem:[%s35971_s3 + $0x34] sm:$0x3] %vm29264_vm3, %v29258_v38 }
 0x6a5   :  { %v29035_v40 = vpop.permute.xlu1 %29034  ;;  %v29033_v11 = vpop.permute.xlu0 %29032 }
 0x6a6   :  { %v29101_v13 = vsub.f32 %v34741_v14, %v29035_v40  ;;  %v29100_v31 = vsub.f32 %v34739_v53, %v29033_v11 }
 0x6a9   :  { %v29163_v29 = vpop.permute.xlu1 %29162  ;;  %v29161_v55 = vpop.permute.xlu0 %29160 }
 0x6aa   :  { %v29229_v59 = vadd.f32 %v29163_v29, %v34741_v14  ;;  %v29228_v37 = vadd.f32 %v29161_v55, %v34739_v53 }
 0x6ac   :  { %v29261_v4 = vsel %vm78_vm1, %v29101_v13, %v29229_v59  ;;  %v29260_v58 = vsel %vm78_vm1, %v29100_v31, %v29228_v37 }
 0x6ad   :  { %29294 = vst.msk [vmem:[%s35971_s3 + $0x3a] sm:$0x3] %vm29264_vm3, %v29261_v4  ;;  %29293 = vst.msk [vmem:[%s35971_s3 + $0x38] sm:$0x3] %vm29264_vm3, %v29260_v58 }
 0x6d1   :  { %v29039_v9 = vpop.permute.xlu1 %29038  ;;  %v29037_v42 = vpop.permute.xlu0 %29036 }
 0x6d2   :  { %v29103_v53 = vsub.f32 %v34813_v7, %v29039_v9  ;;  %v29102_v39 = vsub.f32 %v34811_v36, %v29037_v42 }
 0x6d5   :  { %v29167_v12 = vpop.permute.xlu1 %29166  ;;  %v29165_v14 = vpop.permute.xlu0 %29164 }
 0x6d6   :  { %v29231_v28 = vadd.f32 %v29167_v12, %v34813_v7  ;;  %v29230_v2 = vadd.f32 %v29165_v14, %v34811_v36 }
 0x6d8   :  { %v29263_v15 = vsel %vm78_vm1, %v29103_v53, %v29231_v28  ;;  %v29262_v57 = vsel %vm78_vm1, %v29102_v39, %v29230_v2 }
 0x6d9   :  { %29296 = vst.msk [vmem:[%s35971_s3 + $0x3e] sm:$0x3] %vm29264_vm3, %v29263_v15  ;;  %29295 = vst.msk [vmem:[%s35971_s3 + $0x3c] sm:$0x3] %vm29264_vm3, %v29262_v57 }

</bundles_post_ra>
